<compile_context>
chip_gen: v7x
topology: tpu7x:2x2x1
jax: 0.10.0
libtpu: 0.0.40
codegen_flags: <defaults>
</compile_context>

<pallas_src>
import jax
import jax.numpy as jnp
from jax import lax
from jax.experimental import pallas as pl
from jax.experimental.pallas import tpu as pltpu

LAYERS = [2, 10, 10, 10, 3]
CHUNK = 8                      # sublane rows per inner chunk -> CHUNK * 128 = 1024 batch elems


def _build_layer_specs():
    """Static per-layer specs: (flat offset, K=fan_in, N=fan_out, apply_relu)."""
    specs, off = [], 0
    for i, (k, n) in enumerate(zip(LAYERS[:-1], LAYERS[1:])):
        specs.append((off, k, n, i < len(LAYERS) - 2))
        off += n * k + n          # W (N*K, row-major over (out, in)) followed by b (N)
    return tuple(specs), off


LAYER_SPECS, N_PARAMS = _build_layer_specs()      # N_PARAMS == 283


def _mlp_kernel(params_ref, x_ref, o_ref):
    """Whole 4-layer forward pass on one batch tile, feature-major.

    params_ref: (N_PARAMS,) f32 in SMEM (scalar reads).
    x_ref:      (in_dim, tile_rows, 128) f32 — batch on (sublane, lane).
    o_ref:      (out_dim, tile_rows, 128) f32 — lane-dense output.
    """
    n_chunks = x_ref.shape[1] // CHUNK
    # Hoist every scalar parameter read out of the batch-chunk loop.
    p = [params_ref[i] for i in range(N_PARAMS)]

    def chunk_body(c, carry):
        r0 = pl.multiple_of(c * CHUNK, CHUNK)
        # Activations: one (CHUNK, 128) vreg-slab per feature.
        act = [x_ref[k, pl.ds(r0, CHUNK), :] for k in range(LAYERS[0])]
        for off, k_dim, n_dim, relu in LAYER_SPECS:
            b_off = off + n_dim * k_dim
            nxt = []
            for n in range(n_dim):
                w0 = off + n * k_dim
                # scalar-weight * full-lane vreg MACs; bias folded into first term
                acc = act[0] * p[w0] + p[b_off + n]
                for k in range(1, k_dim):
                    acc = acc + act[k] * p[w0 + k]
                nxt.append(jnp.maximum(acc, 0.0) if relu else acc)
            act = nxt
        for n in range(LAYERS[-1]):
            o_ref[n, pl.ds(r0, CHUNK), :] = act[n]
        return carry

    lax.fori_loop(0, n_chunks, chunk_body, 0, unroll=True)


def pack_params(params):
    """Pack nn.Linear-style [(W(out,in), b(out,)), ...] into one flat 1-D f32 vector.

    Layer i occupies [off, off + N*K) with W row-major over (out, in), then N bias
    values.  Done once at init; the flat array lives in SMEM (pads to ~2 KiB only
    because it is 1-D — a 2-D SMEM slab would pad to 32 KiB).
    """
    vals = []
    for w, b in params:
        vals.append(jnp.asarray(w, jnp.float32).reshape(-1))
        vals.append(jnp.asarray(b, jnp.float32).reshape(-1))
    flat = jnp.concatenate(vals)
    assert flat.shape[0] == N_PARAMS
    return flat


def net_forward(x, flat_params, *, tile_rows=64):
    """Forward pass.  `flat_params` is the packed 1-D slab from pack_params()."""
    batch = x.shape[0]
    in_dim, out_dim = LAYERS[0], LAYERS[-1]
    x = x.astype(jnp.float32)

    tile_rows = max(CHUNK, (tile_rows // CHUNK) * CHUNK)

    # Sublane rows needed (each row = 128 batch elements), padded to chunk/tile boundaries.
    rows = pl.cdiv(batch, CHUNK * 128) * CHUNK
    if rows > tile_rows:
        rows = pl.cdiv(rows, tile_rows) * tile_rows   # whole number of grid tiles
        grid_n = rows // tile_rows
    else:
        tile_rows = rows                              # single tile
        grid_n = 1
    padded_batch = rows * 128

    # Feature-major, lane-dense layout: batch index b -> (row b // 128, lane b % 128).
    xp = jnp.pad(x, ((0, padded_batch - batch), (0, 0)))
    x_t = xp.T.reshape(in_dim, rows, 128)

    out_t = pl.pallas_call(
        _mlp_kernel,
        out_shape=jax.ShapeDtypeStruct((out_dim, rows, 128), jnp.float32),
        grid=(grid_n,),
        in_specs=[
            pl.BlockSpec(memory_space=pltpu.MemorySpace.SMEM),            # flat params, whole array
            pl.BlockSpec((in_dim, tile_rows, 128), lambda i: (0, i, 0)),  # batch tile
        ],
        out_specs=pl.BlockSpec((out_dim, tile_rows, 128), lambda i: (0, i, 0)),
        compiler_params=pltpu.CompilerParams(dimension_semantics=("parallel",)),
    )(flat_params, x_t)

    return out_t.reshape(out_dim, padded_batch).T[:batch]


def init_params(key, layers):
    """Deterministic nn.Linear-style init: W, b ~ U(-k, k), k = 1/sqrt(fan_in)."""
    params = []
    for fan_in, fan_out in zip(layers, layers[1:]):
        key, kw, kb = jax.random.split(key, 3)
        bound = 1.0 / jnp.sqrt(jnp.float32(fan_in))
        w = jax.random.uniform(kw, (fan_out, fan_in), jnp.float32, -bound, bound)
        b = jax.random.uniform(kb, (fan_out,), jnp.float32, -bound, bound)
        params.append((w, b))
    return params


def net_forward_ref(x, params):
    """Pure-JAX reference matching the PyTorch module."""
    a = x
    for i, (w, b) in enumerate(params):
        a = a @ w.T + b
        if i < len(params) - 1:
            a = jnp.maximum(a, 0.0)
    return a


if __name__ == "__main__":
    key = jax.random.PRNGKey(0)
    key, kx = jax.random.split(key)

    params = init_params(key, LAYERS)
    flat_params = pack_params(params)          # packed once, outside the per-call path

    # Small batch: single tile / single grid step.
    x = jax.random.normal(kx, (8, LAYERS[0]), jnp.float32)
    out = jax.block_until_ready(net_forward(x, flat_params))
    ref = net_forward_ref(x, params)
    assert out.shape == (8, LAYERS[-1])
    assert jnp.allclose(out, ref, atol=1e-5, rtol=1e-4), "small-batch mismatch vs JAX reference"

    # Moderate batch: exercises the multi-tile "parallel" grid path (2 tiles).
    xb = jax.random.normal(jax.random.PRNGKey(1), (4096, LAYERS[0]), jnp.float32)
    outb = jax.block_until_ready(net_forward(xb, flat_params, tile_rows=16))
    refb = net_forward_ref(xb, params)
    assert outb.shape == (4096, LAYERS[-1])
    assert jnp.allclose(outb, refb, atol=1e-5, rtol=1e-4), "grid-path mismatch vs JAX reference"

    print("KERNEL_OK")
</pallas_src>

<mosaic_0001>
module attributes {stable_mosaic.version = 11 : i64} {
  func.func @_mlp_kernel(%arg0: i32, %arg1: memref<283xf32, #tpu.memory_space<smem>>, %arg2: memref<2x8x128xf32, #tpu.memory_space<vmem>>, %arg3: memref<3x8x128xf32, #tpu.memory_space<vmem>>) attributes {dimension_semantics = [#tpu.dimension_semantics<parallel>], iteration_bounds = array<i64: 1>, scalar_prefetch = 0 : i64, scratch_operands = 0 : i64, tpu.core_type = #tpu.core_type<tc>, window_params = [{transform_indices = @transform_0, window_bounds = array<i64: 283>}, {transform_indices = @transform_1, window_bounds = array<i64: 2, 8, 128>}, {transform_indices = @transform_2, window_bounds = array<i64: 3, 8, 128>}]} {
    %c0 = arith.constant 0 : index
    %0 = memref.load %arg1[%c0] : memref<283xf32, #tpu.memory_space<smem>>
    %c1 = arith.constant 1 : index
    %1 = memref.load %arg1[%c1] : memref<283xf32, #tpu.memory_space<smem>>
    %c2 = arith.constant 2 : index
    %2 = memref.load %arg1[%c2] : memref<283xf32, #tpu.memory_space<smem>>
    %c3 = arith.constant 3 : index
    %3 = memref.load %arg1[%c3] : memref<283xf32, #tpu.memory_space<smem>>
    %c4 = arith.constant 4 : index
    %4 = memref.load %arg1[%c4] : memref<283xf32, #tpu.memory_space<smem>>
    %c5 = arith.constant 5 : index
    %5 = memref.load %arg1[%c5] : memref<283xf32, #tpu.memory_space<smem>>
    %c6 = arith.constant 6 : index
    %6 = memref.load %arg1[%c6] : memref<283xf32, #tpu.memory_space<smem>>
    %c7 = arith.constant 7 : index
    %7 = memref.load %arg1[%c7] : memref<283xf32, #tpu.memory_space<smem>>
    %c8 = arith.constant 8 : index
    %8 = memref.load %arg1[%c8] : memref<283xf32, #tpu.memory_space<smem>>
    %c9 = arith.constant 9 : index
    %9 = memref.load %arg1[%c9] : memref<283xf32, #tpu.memory_space<smem>>
    %c10 = arith.constant 10 : index
    %10 = memref.load %arg1[%c10] : memref<283xf32, #tpu.memory_space<smem>>
    %c11 = arith.constant 11 : index
    %11 = memref.load %arg1[%c11] : memref<283xf32, #tpu.memory_space<smem>>
    %c12 = arith.constant 12 : index
    %12 = memref.load %arg1[%c12] : memref<283xf32, #tpu.memory_space<smem>>
    %c13 = arith.constant 13 : index
    %13 = memref.load %arg1[%c13] : memref<283xf32, #tpu.memory_space<smem>>
    %c14 = arith.constant 14 : index
    %14 = memref.load %arg1[%c14] : memref<283xf32, #tpu.memory_space<smem>>
    %c15 = arith.constant 15 : index
    %15 = memref.load %arg1[%c15] : memref<283xf32, #tpu.memory_space<smem>>
    %c16 = arith.constant 16 : index
    %16 = memref.load %arg1[%c16] : memref<283xf32, #tpu.memory_space<smem>>
    %c17 = arith.constant 17 : index
    %17 = memref.load %arg1[%c17] : memref<283xf32, #tpu.memory_space<smem>>
    %c18 = arith.constant 18 : index
    %18 = memref.load %arg1[%c18] : memref<283xf32, #tpu.memory_space<smem>>
    %c19 = arith.constant 19 : index
    %19 = memref.load %arg1[%c19] : memref<283xf32, #tpu.memory_space<smem>>
    %c20 = arith.constant 20 : index
    %20 = memref.load %arg1[%c20] : memref<283xf32, #tpu.memory_space<smem>>
    %c21 = arith.constant 21 : index
    %21 = memref.load %arg1[%c21] : memref<283xf32, #tpu.memory_space<smem>>
    %c22 = arith.constant 22 : index
    %22 = memref.load %arg1[%c22] : memref<283xf32, #tpu.memory_space<smem>>
    %c23 = arith.constant 23 : index
    %23 = memref.load %arg1[%c23] : memref<283xf32, #tpu.memory_space<smem>>
    %c24 = arith.constant 24 : index
    %24 = memref.load %arg1[%c24] : memref<283xf32, #tpu.memory_space<smem>>
    %c25 = arith.constant 25 : index
    %25 = memref.load %arg1[%c25] : memref<283xf32, #tpu.memory_space<smem>>
    %c26 = arith.constant 26 : index
    %26 = memref.load %arg1[%c26] : memref<283xf32, #tpu.memory_space<smem>>
    %c27 = arith.constant 27 : index
    %27 = memref.load %arg1[%c27] : memref<283xf32, #tpu.memory_space<smem>>
    %c28 = arith.constant 28 : index
    %28 = memref.load %arg1[%c28] : memref<283xf32, #tpu.memory_space<smem>>
    %c29 = arith.constant 29 : index
    %29 = memref.load %arg1[%c29] : memref<283xf32, #tpu.memory_space<smem>>
    %c30 = arith.constant 30 : index
    %30 = memref.load %arg1[%c30] : memref<283xf32, #tpu.memory_space<smem>>
    %c31 = arith.constant 31 : index
    %31 = memref.load %arg1[%c31] : memref<283xf32, #tpu.memory_space<smem>>
    %c32 = arith.constant 32 : index
    %32 = memref.load %arg1[%c32] : memref<283xf32, #tpu.memory_space<smem>>
    %c33 = arith.constant 33 : index
    %33 = memref.load %arg1[%c33] : memref<283xf32, #tpu.memory_space<smem>>
    %c34 = arith.constant 34 : index
    %34 = memref.load %arg1[%c34] : memref<283xf32, #tpu.memory_space<smem>>
    %c35 = arith.constant 35 : index
    %35 = memref.load %arg1[%c35] : memref<283xf32, #tpu.memory_space<smem>>
    %c36 = arith.constant 36 : index
    %36 = memref.load %arg1[%c36] : memref<283xf32, #tpu.memory_space<smem>>
    %c37 = arith.constant 37 : index
    %37 = memref.load %arg1[%c37] : memref<283xf32, #tpu.memory_space<smem>>
    %c38 = arith.constant 38 : index
    %38 = memref.load %arg1[%c38] : memref<283xf32, #tpu.memory_space<smem>>
    %c39 = arith.constant 39 : index
    %39 = memref.load %arg1[%c39] : memref<283xf32, #tpu.memory_space<smem>>
    %c40 = arith.constant 40 : index
    %40 = memref.load %arg1[%c40] : memref<283xf32, #tpu.memory_space<smem>>
    %c41 = arith.constant 41 : index
    %41 = memref.load %arg1[%c41] : memref<283xf32, #tpu.memory_space<smem>>
    %c42 = arith.constant 42 : index
    %42 = memref.load %arg1[%c42] : memref<283xf32, #tpu.memory_space<smem>>
    %c43 = arith.constant 43 : index
    %43 = memref.load %arg1[%c43] : memref<283xf32, #tpu.memory_space<smem>>
    %c44 = arith.constant 44 : index
    %44 = memref.load %arg1[%c44] : memref<283xf32, #tpu.memory_space<smem>>
    %c45 = arith.constant 45 : index
    %45 = memref.load %arg1[%c45] : memref<283xf32, #tpu.memory_space<smem>>
    %c46 = arith.constant 46 : index
    %46 = memref.load %arg1[%c46] : memref<283xf32, #tpu.memory_space<smem>>
    %c47 = arith.constant 47 : index
    %47 = memref.load %arg1[%c47] : memref<283xf32, #tpu.memory_space<smem>>
    %c48 = arith.constant 48 : index
    %48 = memref.load %arg1[%c48] : memref<283xf32, #tpu.memory_space<smem>>
    %c49 = arith.constant 49 : index
    %49 = memref.load %arg1[%c49] : memref<283xf32, #tpu.memory_space<smem>>
    %c50 = arith.constant 50 : index
    %50 = memref.load %arg1[%c50] : memref<283xf32, #tpu.memory_space<smem>>
    %c51 = arith.constant 51 : index
    %51 = memref.load %arg1[%c51] : memref<283xf32, #tpu.memory_space<smem>>
    %c52 = arith.constant 52 : index
    %52 = memref.load %arg1[%c52] : memref<283xf32, #tpu.memory_space<smem>>
    %c53 = arith.constant 53 : index
    %53 = memref.load %arg1[%c53] : memref<283xf32, #tpu.memory_space<smem>>
    %c54 = arith.constant 54 : index
    %54 = memref.load %arg1[%c54] : memref<283xf32, #tpu.memory_space<smem>>
    %c55 = arith.constant 55 : index
    %55 = memref.load %arg1[%c55] : memref<283xf32, #tpu.memory_space<smem>>
    %c56 = arith.constant 56 : index
    %56 = memref.load %arg1[%c56] : memref<283xf32, #tpu.memory_space<smem>>
    %c57 = arith.constant 57 : index
    %57 = memref.load %arg1[%c57] : memref<283xf32, #tpu.memory_space<smem>>
    %c58 = arith.constant 58 : index
    %58 = memref.load %arg1[%c58] : memref<283xf32, #tpu.memory_space<smem>>
    %c59 = arith.constant 59 : index
    %59 = memref.load %arg1[%c59] : memref<283xf32, #tpu.memory_space<smem>>
    %c60 = arith.constant 60 : index
    %60 = memref.load %arg1[%c60] : memref<283xf32, #tpu.memory_space<smem>>
    %c61 = arith.constant 61 : index
    %61 = memref.load %arg1[%c61] : memref<283xf32, #tpu.memory_space<smem>>
    %c62 = arith.constant 62 : index
    %62 = memref.load %arg1[%c62] : memref<283xf32, #tpu.memory_space<smem>>
    %c63 = arith.constant 63 : index
    %63 = memref.load %arg1[%c63] : memref<283xf32, #tpu.memory_space<smem>>
    %c64 = arith.constant 64 : index
    %64 = memref.load %arg1[%c64] : memref<283xf32, #tpu.memory_space<smem>>
    %c65 = arith.constant 65 : index
    %65 = memref.load %arg1[%c65] : memref<283xf32, #tpu.memory_space<smem>>
    %c66 = arith.constant 66 : index
    %66 = memref.load %arg1[%c66] : memref<283xf32, #tpu.memory_space<smem>>
    %c67 = arith.constant 67 : index
    %67 = memref.load %arg1[%c67] : memref<283xf32, #tpu.memory_space<smem>>
    %c68 = arith.constant 68 : index
    %68 = memref.load %arg1[%c68] : memref<283xf32, #tpu.memory_space<smem>>
    %c69 = arith.constant 69 : index
    %69 = memref.load %arg1[%c69] : memref<283xf32, #tpu.memory_space<smem>>
    %c70 = arith.constant 70 : index
    %70 = memref.load %arg1[%c70] : memref<283xf32, #tpu.memory_space<smem>>
    %c71 = arith.constant 71 : index
    %71 = memref.load %arg1[%c71] : memref<283xf32, #tpu.memory_space<smem>>
    %c72 = arith.constant 72 : index
    %72 = memref.load %arg1[%c72] : memref<283xf32, #tpu.memory_space<smem>>
    %c73 = arith.constant 73 : index
    %73 = memref.load %arg1[%c73] : memref<283xf32, #tpu.memory_space<smem>>
    %c74 = arith.constant 74 : index
    %74 = memref.load %arg1[%c74] : memref<283xf32, #tpu.memory_space<smem>>
    %c75 = arith.constant 75 : index
    %75 = memref.load %arg1[%c75] : memref<283xf32, #tpu.memory_space<smem>>
    %c76 = arith.constant 76 : index
    %76 = memref.load %arg1[%c76] : memref<283xf32, #tpu.memory_space<smem>>
    %c77 = arith.constant 77 : index
    %77 = memref.load %arg1[%c77] : memref<283xf32, #tpu.memory_space<smem>>
    %c78 = arith.constant 78 : index
    %78 = memref.load %arg1[%c78] : memref<283xf32, #tpu.memory_space<smem>>
    %c79 = arith.constant 79 : index
    %79 = memref.load %arg1[%c79] : memref<283xf32, #tpu.memory_space<smem>>
    %c80 = arith.constant 80 : index
    %80 = memref.load %arg1[%c80] : memref<283xf32, #tpu.memory_space<smem>>
    %c81 = arith.constant 81 : index
    %81 = memref.load %arg1[%c81] : memref<283xf32, #tpu.memory_space<smem>>
    %c82 = arith.constant 82 : index
    %82 = memref.load %arg1[%c82] : memref<283xf32, #tpu.memory_space<smem>>
    %c83 = arith.constant 83 : index
    %83 = memref.load %arg1[%c83] : memref<283xf32, #tpu.memory_space<smem>>
    %c84 = arith.constant 84 : index
    %84 = memref.load %arg1[%c84] : memref<283xf32, #tpu.memory_space<smem>>
    %c85 = arith.constant 85 : index
    %85 = memref.load %arg1[%c85] : memref<283xf32, #tpu.memory_space<smem>>
    %c86 = arith.constant 86 : index
    %86 = memref.load %arg1[%c86] : memref<283xf32, #tpu.memory_space<smem>>
    %c87 = arith.constant 87 : index
    %87 = memref.load %arg1[%c87] : memref<283xf32, #tpu.memory_space<smem>>
    %c88 = arith.constant 88 : index
    %88 = memref.load %arg1[%c88] : memref<283xf32, #tpu.memory_space<smem>>
    %c89 = arith.constant 89 : index
    %89 = memref.load %arg1[%c89] : memref<283xf32, #tpu.memory_space<smem>>
    %c90 = arith.constant 90 : index
    %90 = memref.load %arg1[%c90] : memref<283xf32, #tpu.memory_space<smem>>
    %c91 = arith.constant 91 : index
    %91 = memref.load %arg1[%c91] : memref<283xf32, #tpu.memory_space<smem>>
    %c92 = arith.constant 92 : index
    %92 = memref.load %arg1[%c92] : memref<283xf32, #tpu.memory_space<smem>>
    %c93 = arith.constant 93 : index
    %93 = memref.load %arg1[%c93] : memref<283xf32, #tpu.memory_space<smem>>
    %c94 = arith.constant 94 : index
    %94 = memref.load %arg1[%c94] : memref<283xf32, #tpu.memory_space<smem>>
    %c95 = arith.constant 95 : index
    %95 = memref.load %arg1[%c95] : memref<283xf32, #tpu.memory_space<smem>>
    %c96 = arith.constant 96 : index
    %96 = memref.load %arg1[%c96] : memref<283xf32, #tpu.memory_space<smem>>
    %c97 = arith.constant 97 : index
    %97 = memref.load %arg1[%c97] : memref<283xf32, #tpu.memory_space<smem>>
    %c98 = arith.constant 98 : index
    %98 = memref.load %arg1[%c98] : memref<283xf32, #tpu.memory_space<smem>>
    %c99 = arith.constant 99 : index
    %99 = memref.load %arg1[%c99] : memref<283xf32, #tpu.memory_space<smem>>
    %c100 = arith.constant 100 : index
    %100 = memref.load %arg1[%c100] : memref<283xf32, #tpu.memory_space<smem>>
    %c101 = arith.constant 101 : index
    %101 = memref.load %arg1[%c101] : memref<283xf32, #tpu.memory_space<smem>>
    %c102 = arith.constant 102 : index
    %102 = memref.load %arg1[%c102] : memref<283xf32, #tpu.memory_space<smem>>
    %c103 = arith.constant 103 : index
    %103 = memref.load %arg1[%c103] : memref<283xf32, #tpu.memory_space<smem>>
    %c104 = arith.constant 104 : index
    %104 = memref.load %arg1[%c104] : memref<283xf32, #tpu.memory_space<smem>>
    %c105 = arith.constant 105 : index
    %105 = memref.load %arg1[%c105] : memref<283xf32, #tpu.memory_space<smem>>
    %c106 = arith.constant 106 : index
    %106 = memref.load %arg1[%c106] : memref<283xf32, #tpu.memory_space<smem>>
    %c107 = arith.constant 107 : index
    %107 = memref.load %arg1[%c107] : memref<283xf32, #tpu.memory_space<smem>>
    %c108 = arith.constant 108 : index
    %108 = memref.load %arg1[%c108] : memref<283xf32, #tpu.memory_space<smem>>
    %c109 = arith.constant 109 : index
    %109 = memref.load %arg1[%c109] : memref<283xf32, #tpu.memory_space<smem>>
    %c110 = arith.constant 110 : index
    %110 = memref.load %arg1[%c110] : memref<283xf32, #tpu.memory_space<smem>>
    %c111 = arith.constant 111 : index
    %111 = memref.load %arg1[%c111] : memref<283xf32, #tpu.memory_space<smem>>
    %c112 = arith.constant 112 : index
    %112 = memref.load %arg1[%c112] : memref<283xf32, #tpu.memory_space<smem>>
    %c113 = arith.constant 113 : index
    %113 = memref.load %arg1[%c113] : memref<283xf32, #tpu.memory_space<smem>>
    %c114 = arith.constant 114 : index
    %114 = memref.load %arg1[%c114] : memref<283xf32, #tpu.memory_space<smem>>
    %c115 = arith.constant 115 : index
    %115 = memref.load %arg1[%c115] : memref<283xf32, #tpu.memory_space<smem>>
    %c116 = arith.constant 116 : index
    %116 = memref.load %arg1[%c116] : memref<283xf32, #tpu.memory_space<smem>>
    %c117 = arith.constant 117 : index
    %117 = memref.load %arg1[%c117] : memref<283xf32, #tpu.memory_space<smem>>
    %c118 = arith.constant 118 : index
    %118 = memref.load %arg1[%c118] : memref<283xf32, #tpu.memory_space<smem>>
    %c119 = arith.constant 119 : index
    %119 = memref.load %arg1[%c119] : memref<283xf32, #tpu.memory_space<smem>>
    %c120 = arith.constant 120 : index
    %120 = memref.load %arg1[%c120] : memref<283xf32, #tpu.memory_space<smem>>
    %c121 = arith.constant 121 : index
    %121 = memref.load %arg1[%c121] : memref<283xf32, #tpu.memory_space<smem>>
    %c122 = arith.constant 122 : index
    %122 = memref.load %arg1[%c122] : memref<283xf32, #tpu.memory_space<smem>>
    %c123 = arith.constant 123 : index
    %123 = memref.load %arg1[%c123] : memref<283xf32, #tpu.memory_space<smem>>
    %c124 = arith.constant 124 : index
    %124 = memref.load %arg1[%c124] : memref<283xf32, #tpu.memory_space<smem>>
    %c125 = arith.constant 125 : index
    %125 = memref.load %arg1[%c125] : memref<283xf32, #tpu.memory_space<smem>>
    %c126 = arith.constant 126 : index
    %126 = memref.load %arg1[%c126] : memref<283xf32, #tpu.memory_space<smem>>
    %c127 = arith.constant 127 : index
    %127 = memref.load %arg1[%c127] : memref<283xf32, #tpu.memory_space<smem>>
    %c128 = arith.constant 128 : index
    %128 = memref.load %arg1[%c128] : memref<283xf32, #tpu.memory_space<smem>>
    %c129 = arith.constant 129 : index
    %129 = memref.load %arg1[%c129] : memref<283xf32, #tpu.memory_space<smem>>
    %c130 = arith.constant 130 : index
    %130 = memref.load %arg1[%c130] : memref<283xf32, #tpu.memory_space<smem>>
    %c131 = arith.constant 131 : index
    %131 = memref.load %arg1[%c131] : memref<283xf32, #tpu.memory_space<smem>>
    %c132 = arith.constant 132 : index
    %132 = memref.load %arg1[%c132] : memref<283xf32, #tpu.memory_space<smem>>
    %c133 = arith.constant 133 : index
    %133 = memref.load %arg1[%c133] : memref<283xf32, #tpu.memory_space<smem>>
    %c134 = arith.constant 134 : index
    %134 = memref.load %arg1[%c134] : memref<283xf32, #tpu.memory_space<smem>>
    %c135 = arith.constant 135 : index
    %135 = memref.load %arg1[%c135] : memref<283xf32, #tpu.memory_space<smem>>
    %c136 = arith.constant 136 : index
    %136 = memref.load %arg1[%c136] : memref<283xf32, #tpu.memory_space<smem>>
    %c137 = arith.constant 137 : index
    %137 = memref.load %arg1[%c137] : memref<283xf32, #tpu.memory_space<smem>>
    %c138 = arith.constant 138 : index
    %138 = memref.load %arg1[%c138] : memref<283xf32, #tpu.memory_space<smem>>
    %c139 = arith.constant 139 : index
    %139 = memref.load %arg1[%c139] : memref<283xf32, #tpu.memory_space<smem>>
    %c140 = arith.constant 140 : index
    %140 = memref.load %arg1[%c140] : memref<283xf32, #tpu.memory_space<smem>>
    %c141 = arith.constant 141 : index
    %141 = memref.load %arg1[%c141] : memref<283xf32, #tpu.memory_space<smem>>
    %c142 = arith.constant 142 : index
    %142 = memref.load %arg1[%c142] : memref<283xf32, #tpu.memory_space<smem>>
    %c143 = arith.constant 143 : index
    %143 = memref.load %arg1[%c143] : memref<283xf32, #tpu.memory_space<smem>>
    %c144 = arith.constant 144 : index
    %144 = memref.load %arg1[%c144] : memref<283xf32, #tpu.memory_space<smem>>
    %c145 = arith.constant 145 : index
    %145 = memref.load %arg1[%c145] : memref<283xf32, #tpu.memory_space<smem>>
    %c146 = arith.constant 146 : index
    %146 = memref.load %arg1[%c146] : memref<283xf32, #tpu.memory_space<smem>>
    %c147 = arith.constant 147 : index
    %147 = memref.load %arg1[%c147] : memref<283xf32, #tpu.memory_space<smem>>
    %c148 = arith.constant 148 : index
    %148 = memref.load %arg1[%c148] : memref<283xf32, #tpu.memory_space<smem>>
    %c149 = arith.constant 149 : index
    %149 = memref.load %arg1[%c149] : memref<283xf32, #tpu.memory_space<smem>>
    %c150 = arith.constant 150 : index
    %150 = memref.load %arg1[%c150] : memref<283xf32, #tpu.memory_space<smem>>
    %c151 = arith.constant 151 : index
    %151 = memref.load %arg1[%c151] : memref<283xf32, #tpu.memory_space<smem>>
    %c152 = arith.constant 152 : index
    %152 = memref.load %arg1[%c152] : memref<283xf32, #tpu.memory_space<smem>>
    %c153 = arith.constant 153 : index
    %153 = memref.load %arg1[%c153] : memref<283xf32, #tpu.memory_space<smem>>
    %c154 = arith.constant 154 : index
    %154 = memref.load %arg1[%c154] : memref<283xf32, #tpu.memory_space<smem>>
    %c155 = arith.constant 155 : index
    %155 = memref.load %arg1[%c155] : memref<283xf32, #tpu.memory_space<smem>>
    %c156 = arith.constant 156 : index
    %156 = memref.load %arg1[%c156] : memref<283xf32, #tpu.memory_space<smem>>
    %c157 = arith.constant 157 : index
    %157 = memref.load %arg1[%c157] : memref<283xf32, #tpu.memory_space<smem>>
    %c158 = arith.constant 158 : index
    %158 = memref.load %arg1[%c158] : memref<283xf32, #tpu.memory_space<smem>>
    %c159 = arith.constant 159 : index
    %159 = memref.load %arg1[%c159] : memref<283xf32, #tpu.memory_space<smem>>
    %c160 = arith.constant 160 : index
    %160 = memref.load %arg1[%c160] : memref<283xf32, #tpu.memory_space<smem>>
    %c161 = arith.constant 161 : index
    %161 = memref.load %arg1[%c161] : memref<283xf32, #tpu.memory_space<smem>>
    %c162 = arith.constant 162 : index
    %162 = memref.load %arg1[%c162] : memref<283xf32, #tpu.memory_space<smem>>
    %c163 = arith.constant 163 : index
    %163 = memref.load %arg1[%c163] : memref<283xf32, #tpu.memory_space<smem>>
    %c164 = arith.constant 164 : index
    %164 = memref.load %arg1[%c164] : memref<283xf32, #tpu.memory_space<smem>>
    %c165 = arith.constant 165 : index
    %165 = memref.load %arg1[%c165] : memref<283xf32, #tpu.memory_space<smem>>
    %c166 = arith.constant 166 : index
    %166 = memref.load %arg1[%c166] : memref<283xf32, #tpu.memory_space<smem>>
    %c167 = arith.constant 167 : index
    %167 = memref.load %arg1[%c167] : memref<283xf32, #tpu.memory_space<smem>>
    %c168 = arith.constant 168 : index
    %168 = memref.load %arg1[%c168] : memref<283xf32, #tpu.memory_space<smem>>
    %c169 = arith.constant 169 : index
    %169 = memref.load %arg1[%c169] : memref<283xf32, #tpu.memory_space<smem>>
    %c170 = arith.constant 170 : index
    %170 = memref.load %arg1[%c170] : memref<283xf32, #tpu.memory_space<smem>>
    %c171 = arith.constant 171 : index
    %171 = memref.load %arg1[%c171] : memref<283xf32, #tpu.memory_space<smem>>
    %c172 = arith.constant 172 : index
    %172 = memref.load %arg1[%c172] : memref<283xf32, #tpu.memory_space<smem>>
    %c173 = arith.constant 173 : index
    %173 = memref.load %arg1[%c173] : memref<283xf32, #tpu.memory_space<smem>>
    %c174 = arith.constant 174 : index
    %174 = memref.load %arg1[%c174] : memref<283xf32, #tpu.memory_space<smem>>
    %c175 = arith.constant 175 : index
    %175 = memref.load %arg1[%c175] : memref<283xf32, #tpu.memory_space<smem>>
    %c176 = arith.constant 176 : index
    %176 = memref.load %arg1[%c176] : memref<283xf32, #tpu.memory_space<smem>>
    %c177 = arith.constant 177 : index
    %177 = memref.load %arg1[%c177] : memref<283xf32, #tpu.memory_space<smem>>
    %c178 = arith.constant 178 : index
    %178 = memref.load %arg1[%c178] : memref<283xf32, #tpu.memory_space<smem>>
    %c179 = arith.constant 179 : index
    %179 = memref.load %arg1[%c179] : memref<283xf32, #tpu.memory_space<smem>>
    %c180 = arith.constant 180 : index
    %180 = memref.load %arg1[%c180] : memref<283xf32, #tpu.memory_space<smem>>
    %c181 = arith.constant 181 : index
    %181 = memref.load %arg1[%c181] : memref<283xf32, #tpu.memory_space<smem>>
    %c182 = arith.constant 182 : index
    %182 = memref.load %arg1[%c182] : memref<283xf32, #tpu.memory_space<smem>>
    %c183 = arith.constant 183 : index
    %183 = memref.load %arg1[%c183] : memref<283xf32, #tpu.memory_space<smem>>
    %c184 = arith.constant 184 : index
    %184 = memref.load %arg1[%c184] : memref<283xf32, #tpu.memory_space<smem>>
    %c185 = arith.constant 185 : index
    %185 = memref.load %arg1[%c185] : memref<283xf32, #tpu.memory_space<smem>>
    %c186 = arith.constant 186 : index
    %186 = memref.load %arg1[%c186] : memref<283xf32, #tpu.memory_space<smem>>
    %c187 = arith.constant 187 : index
    %187 = memref.load %arg1[%c187] : memref<283xf32, #tpu.memory_space<smem>>
    %c188 = arith.constant 188 : index
    %188 = memref.load %arg1[%c188] : memref<283xf32, #tpu.memory_space<smem>>
    %c189 = arith.constant 189 : index
    %189 = memref.load %arg1[%c189] : memref<283xf32, #tpu.memory_space<smem>>
    %c190 = arith.constant 190 : index
    %190 = memref.load %arg1[%c190] : memref<283xf32, #tpu.memory_space<smem>>
    %c191 = arith.constant 191 : index
    %191 = memref.load %arg1[%c191] : memref<283xf32, #tpu.memory_space<smem>>
    %c192 = arith.constant 192 : index
    %192 = memref.load %arg1[%c192] : memref<283xf32, #tpu.memory_space<smem>>
    %c193 = arith.constant 193 : index
    %193 = memref.load %arg1[%c193] : memref<283xf32, #tpu.memory_space<smem>>
    %c194 = arith.constant 194 : index
    %194 = memref.load %arg1[%c194] : memref<283xf32, #tpu.memory_space<smem>>
    %c195 = arith.constant 195 : index
    %195 = memref.load %arg1[%c195] : memref<283xf32, #tpu.memory_space<smem>>
    %c196 = arith.constant 196 : index
    %196 = memref.load %arg1[%c196] : memref<283xf32, #tpu.memory_space<smem>>
    %c197 = arith.constant 197 : index
    %197 = memref.load %arg1[%c197] : memref<283xf32, #tpu.memory_space<smem>>
    %c198 = arith.constant 198 : index
    %198 = memref.load %arg1[%c198] : memref<283xf32, #tpu.memory_space<smem>>
    %c199 = arith.constant 199 : index
    %199 = memref.load %arg1[%c199] : memref<283xf32, #tpu.memory_space<smem>>
    %c200 = arith.constant 200 : index
    %200 = memref.load %arg1[%c200] : memref<283xf32, #tpu.memory_space<smem>>
    %c201 = arith.constant 201 : index
    %201 = memref.load %arg1[%c201] : memref<283xf32, #tpu.memory_space<smem>>
    %c202 = arith.constant 202 : index
    %202 = memref.load %arg1[%c202] : memref<283xf32, #tpu.memory_space<smem>>
    %c203 = arith.constant 203 : index
    %203 = memref.load %arg1[%c203] : memref<283xf32, #tpu.memory_space<smem>>
    %c204 = arith.constant 204 : index
    %204 = memref.load %arg1[%c204] : memref<283xf32, #tpu.memory_space<smem>>
    %c205 = arith.constant 205 : index
    %205 = memref.load %arg1[%c205] : memref<283xf32, #tpu.memory_space<smem>>
    %c206 = arith.constant 206 : index
    %206 = memref.load %arg1[%c206] : memref<283xf32, #tpu.memory_space<smem>>
    %c207 = arith.constant 207 : index
    %207 = memref.load %arg1[%c207] : memref<283xf32, #tpu.memory_space<smem>>
    %c208 = arith.constant 208 : index
    %208 = memref.load %arg1[%c208] : memref<283xf32, #tpu.memory_space<smem>>
    %c209 = arith.constant 209 : index
    %209 = memref.load %arg1[%c209] : memref<283xf32, #tpu.memory_space<smem>>
    %c210 = arith.constant 210 : index
    %210 = memref.load %arg1[%c210] : memref<283xf32, #tpu.memory_space<smem>>
    %c211 = arith.constant 211 : index
    %211 = memref.load %arg1[%c211] : memref<283xf32, #tpu.memory_space<smem>>
    %c212 = arith.constant 212 : index
    %212 = memref.load %arg1[%c212] : memref<283xf32, #tpu.memory_space<smem>>
    %c213 = arith.constant 213 : index
    %213 = memref.load %arg1[%c213] : memref<283xf32, #tpu.memory_space<smem>>
    %c214 = arith.constant 214 : index
    %214 = memref.load %arg1[%c214] : memref<283xf32, #tpu.memory_space<smem>>
    %c215 = arith.constant 215 : index
    %215 = memref.load %arg1[%c215] : memref<283xf32, #tpu.memory_space<smem>>
    %c216 = arith.constant 216 : index
    %216 = memref.load %arg1[%c216] : memref<283xf32, #tpu.memory_space<smem>>
    %c217 = arith.constant 217 : index
    %217 = memref.load %arg1[%c217] : memref<283xf32, #tpu.memory_space<smem>>
    %c218 = arith.constant 218 : index
    %218 = memref.load %arg1[%c218] : memref<283xf32, #tpu.memory_space<smem>>
    %c219 = arith.constant 219 : index
    %219 = memref.load %arg1[%c219] : memref<283xf32, #tpu.memory_space<smem>>
    %c220 = arith.constant 220 : index
    %220 = memref.load %arg1[%c220] : memref<283xf32, #tpu.memory_space<smem>>
    %c221 = arith.constant 221 : index
    %221 = memref.load %arg1[%c221] : memref<283xf32, #tpu.memory_space<smem>>
    %c222 = arith.constant 222 : index
    %222 = memref.load %arg1[%c222] : memref<283xf32, #tpu.memory_space<smem>>
    %c223 = arith.constant 223 : index
    %223 = memref.load %arg1[%c223] : memref<283xf32, #tpu.memory_space<smem>>
    %c224 = arith.constant 224 : index
    %224 = memref.load %arg1[%c224] : memref<283xf32, #tpu.memory_space<smem>>
    %c225 = arith.constant 225 : index
    %225 = memref.load %arg1[%c225] : memref<283xf32, #tpu.memory_space<smem>>
    %c226 = arith.constant 226 : index
    %226 = memref.load %arg1[%c226] : memref<283xf32, #tpu.memory_space<smem>>
    %c227 = arith.constant 227 : index
    %227 = memref.load %arg1[%c227] : memref<283xf32, #tpu.memory_space<smem>>
    %c228 = arith.constant 228 : index
    %228 = memref.load %arg1[%c228] : memref<283xf32, #tpu.memory_space<smem>>
    %c229 = arith.constant 229 : index
    %229 = memref.load %arg1[%c229] : memref<283xf32, #tpu.memory_space<smem>>
    %c230 = arith.constant 230 : index
    %230 = memref.load %arg1[%c230] : memref<283xf32, #tpu.memory_space<smem>>
    %c231 = arith.constant 231 : index
    %231 = memref.load %arg1[%c231] : memref<283xf32, #tpu.memory_space<smem>>
    %c232 = arith.constant 232 : index
    %232 = memref.load %arg1[%c232] : memref<283xf32, #tpu.memory_space<smem>>
    %c233 = arith.constant 233 : index
    %233 = memref.load %arg1[%c233] : memref<283xf32, #tpu.memory_space<smem>>
    %c234 = arith.constant 234 : index
    %234 = memref.load %arg1[%c234] : memref<283xf32, #tpu.memory_space<smem>>
    %c235 = arith.constant 235 : index
    %235 = memref.load %arg1[%c235] : memref<283xf32, #tpu.memory_space<smem>>
    %c236 = arith.constant 236 : index
    %236 = memref.load %arg1[%c236] : memref<283xf32, #tpu.memory_space<smem>>
    %c237 = arith.constant 237 : index
    %237 = memref.load %arg1[%c237] : memref<283xf32, #tpu.memory_space<smem>>
    %c238 = arith.constant 238 : index
    %238 = memref.load %arg1[%c238] : memref<283xf32, #tpu.memory_space<smem>>
    %c239 = arith.constant 239 : index
    %239 = memref.load %arg1[%c239] : memref<283xf32, #tpu.memory_space<smem>>
    %c240 = arith.constant 240 : index
    %240 = memref.load %arg1[%c240] : memref<283xf32, #tpu.memory_space<smem>>
    %c241 = arith.constant 241 : index
    %241 = memref.load %arg1[%c241] : memref<283xf32, #tpu.memory_space<smem>>
    %c242 = arith.constant 242 : index
    %242 = memref.load %arg1[%c242] : memref<283xf32, #tpu.memory_space<smem>>
    %c243 = arith.constant 243 : index
    %243 = memref.load %arg1[%c243] : memref<283xf32, #tpu.memory_space<smem>>
    %c244 = arith.constant 244 : index
    %244 = memref.load %arg1[%c244] : memref<283xf32, #tpu.memory_space<smem>>
    %c245 = arith.constant 245 : index
    %245 = memref.load %arg1[%c245] : memref<283xf32, #tpu.memory_space<smem>>
    %c246 = arith.constant 246 : index
    %246 = memref.load %arg1[%c246] : memref<283xf32, #tpu.memory_space<smem>>
    %c247 = arith.constant 247 : index
    %247 = memref.load %arg1[%c247] : memref<283xf32, #tpu.memory_space<smem>>
    %c248 = arith.constant 248 : index
    %248 = memref.load %arg1[%c248] : memref<283xf32, #tpu.memory_space<smem>>
    %c249 = arith.constant 249 : index
    %249 = memref.load %arg1[%c249] : memref<283xf32, #tpu.memory_space<smem>>
    %c250 = arith.constant 250 : index
    %250 = memref.load %arg1[%c250] : memref<283xf32, #tpu.memory_space<smem>>
    %c251 = arith.constant 251 : index
    %251 = memref.load %arg1[%c251] : memref<283xf32, #tpu.memory_space<smem>>
    %c252 = arith.constant 252 : index
    %252 = memref.load %arg1[%c252] : memref<283xf32, #tpu.memory_space<smem>>
    %c253 = arith.constant 253 : index
    %253 = memref.load %arg1[%c253] : memref<283xf32, #tpu.memory_space<smem>>
    %c254 = arith.constant 254 : index
    %254 = memref.load %arg1[%c254] : memref<283xf32, #tpu.memory_space<smem>>
    %c255 = arith.constant 255 : index
    %255 = memref.load %arg1[%c255] : memref<283xf32, #tpu.memory_space<smem>>
    %c256 = arith.constant 256 : index
    %256 = memref.load %arg1[%c256] : memref<283xf32, #tpu.memory_space<smem>>
    %c257 = arith.constant 257 : index
    %257 = memref.load %arg1[%c257] : memref<283xf32, #tpu.memory_space<smem>>
    %c258 = arith.constant 258 : index
    %258 = memref.load %arg1[%c258] : memref<283xf32, #tpu.memory_space<smem>>
    %c259 = arith.constant 259 : index
    %259 = memref.load %arg1[%c259] : memref<283xf32, #tpu.memory_space<smem>>
    %c260 = arith.constant 260 : index
    %260 = memref.load %arg1[%c260] : memref<283xf32, #tpu.memory_space<smem>>
    %c261 = arith.constant 261 : index
    %261 = memref.load %arg1[%c261] : memref<283xf32, #tpu.memory_space<smem>>
    %c262 = arith.constant 262 : index
    %262 = memref.load %arg1[%c262] : memref<283xf32, #tpu.memory_space<smem>>
    %c263 = arith.constant 263 : index
    %263 = memref.load %arg1[%c263] : memref<283xf32, #tpu.memory_space<smem>>
    %c264 = arith.constant 264 : index
    %264 = memref.load %arg1[%c264] : memref<283xf32, #tpu.memory_space<smem>>
    %c265 = arith.constant 265 : index
    %265 = memref.load %arg1[%c265] : memref<283xf32, #tpu.memory_space<smem>>
    %c266 = arith.constant 266 : index
    %266 = memref.load %arg1[%c266] : memref<283xf32, #tpu.memory_space<smem>>
    %c267 = arith.constant 267 : index
    %267 = memref.load %arg1[%c267] : memref<283xf32, #tpu.memory_space<smem>>
    %c268 = arith.constant 268 : index
    %268 = memref.load %arg1[%c268] : memref<283xf32, #tpu.memory_space<smem>>
    %c269 = arith.constant 269 : index
    %269 = memref.load %arg1[%c269] : memref<283xf32, #tpu.memory_space<smem>>
    %c270 = arith.constant 270 : index
    %270 = memref.load %arg1[%c270] : memref<283xf32, #tpu.memory_space<smem>>
    %c271 = arith.constant 271 : index
    %271 = memref.load %arg1[%c271] : memref<283xf32, #tpu.memory_space<smem>>
    %c272 = arith.constant 272 : index
    %272 = memref.load %arg1[%c272] : memref<283xf32, #tpu.memory_space<smem>>
    %c273 = arith.constant 273 : index
    %273 = memref.load %arg1[%c273] : memref<283xf32, #tpu.memory_space<smem>>
    %c274 = arith.constant 274 : index
    %274 = memref.load %arg1[%c274] : memref<283xf32, #tpu.memory_space<smem>>
    %c275 = arith.constant 275 : index
    %275 = memref.load %arg1[%c275] : memref<283xf32, #tpu.memory_space<smem>>
    %c276 = arith.constant 276 : index
    %276 = memref.load %arg1[%c276] : memref<283xf32, #tpu.memory_space<smem>>
    %c277 = arith.constant 277 : index
    %277 = memref.load %arg1[%c277] : memref<283xf32, #tpu.memory_space<smem>>
    %c278 = arith.constant 278 : index
    %278 = memref.load %arg1[%c278] : memref<283xf32, #tpu.memory_space<smem>>
    %c279 = arith.constant 279 : index
    %279 = memref.load %arg1[%c279] : memref<283xf32, #tpu.memory_space<smem>>
    %c280 = arith.constant 280 : index
    %280 = memref.load %arg1[%c280] : memref<283xf32, #tpu.memory_space<smem>>
    %c281 = arith.constant 281 : index
    %281 = memref.load %arg1[%c281] : memref<283xf32, #tpu.memory_space<smem>>
    %c282 = arith.constant 282 : index
    %282 = memref.load %arg1[%c282] : memref<283xf32, #tpu.memory_space<smem>>
    %c0_i32 = arith.constant 0 : i32
    %c8_i32 = arith.constant 8 : i32
    %283 = arith.muli %c0_i32, %c8_i32 : i32
    %284 = tpu.assume_multiple %283, 8 : i32
    %c0_0 = arith.constant 0 : index
    %285 = arith.index_cast %284 : i32 to index
    %c0_1 = arith.constant 0 : index
    %286 = vector.load %arg2[%c0_0, %285, %c0_1] : memref<2x8x128xf32, #tpu.memory_space<vmem>>, vector<1x8x128xf32>
    %287 = vector.shape_cast %286 : vector<1x8x128xf32> to vector<8x128xf32>
    %c1_2 = arith.constant 1 : index
    %288 = arith.index_cast %284 : i32 to index
    %c0_3 = arith.constant 0 : index
    %289 = vector.load %arg2[%c1_2, %288, %c0_3] : memref<2x8x128xf32, #tpu.memory_space<vmem>>, vector<1x8x128xf32>
    %290 = vector.shape_cast %289 : vector<1x8x128xf32> to vector<8x128xf32>
    %291 = vector.broadcast %0 : f32 to vector<8x128xf32>
    %292 = arith.mulf %287, %291 : vector<8x128xf32>
    %293 = vector.broadcast %20 : f32 to vector<8x128xf32>
    %294 = arith.addf %292, %293 : vector<8x128xf32>
    %295 = vector.broadcast %1 : f32 to vector<8x128xf32>
    %296 = arith.mulf %290, %295 : vector<8x128xf32>
    %297 = arith.addf %294, %296 : vector<8x128xf32>
    %cst = arith.constant 0.000000e+00 : f32
    %298 = vector.broadcast %cst : f32 to vector<8x128xf32>
    %299 = arith.maximumf %297, %298 : vector<8x128xf32>
    %300 = vector.broadcast %2 : f32 to vector<8x128xf32>
    %301 = arith.mulf %287, %300 : vector<8x128xf32>
    %302 = vector.broadcast %21 : f32 to vector<8x128xf32>
    %303 = arith.addf %301, %302 : vector<8x128xf32>
    %304 = vector.broadcast %3 : f32 to vector<8x128xf32>
    %305 = arith.mulf %290, %304 : vector<8x128xf32>
    %306 = arith.addf %303, %305 : vector<8x128xf32>
    %cst_4 = arith.constant 0.000000e+00 : f32
    %307 = vector.broadcast %cst_4 : f32 to vector<8x128xf32>
    %308 = arith.maximumf %306, %307 : vector<8x128xf32>
    %309 = vector.broadcast %4 : f32 to vector<8x128xf32>
    %310 = arith.mulf %287, %309 : vector<8x128xf32>
    %311 = vector.broadcast %22 : f32 to vector<8x128xf32>
    %312 = arith.addf %310, %311 : vector<8x128xf32>
    %313 = vector.broadcast %5 : f32 to vector<8x128xf32>
    %314 = arith.mulf %290, %313 : vector<8x128xf32>
    %315 = arith.addf %312, %314 : vector<8x128xf32>
    %cst_5 = arith.constant 0.000000e+00 : f32
    %316 = vector.broadcast %cst_5 : f32 to vector<8x128xf32>
    %317 = arith.maximumf %315, %316 : vector<8x128xf32>
    %318 = vector.broadcast %6 : f32 to vector<8x128xf32>
    %319 = arith.mulf %287, %318 : vector<8x128xf32>
    %320 = vector.broadcast %23 : f32 to vector<8x128xf32>
    %321 = arith.addf %319, %320 : vector<8x128xf32>
    %322 = vector.broadcast %7 : f32 to vector<8x128xf32>
    %323 = arith.mulf %290, %322 : vector<8x128xf32>
    %324 = arith.addf %321, %323 : vector<8x128xf32>
    %cst_6 = arith.constant 0.000000e+00 : f32
    %325 = vector.broadcast %cst_6 : f32 to vector<8x128xf32>
    %326 = arith.maximumf %324, %325 : vector<8x128xf32>
    %327 = vector.broadcast %8 : f32 to vector<8x128xf32>
    %328 = arith.mulf %287, %327 : vector<8x128xf32>
    %329 = vector.broadcast %24 : f32 to vector<8x128xf32>
    %330 = arith.addf %328, %329 : vector<8x128xf32>
    %331 = vector.broadcast %9 : f32 to vector<8x128xf32>
    %332 = arith.mulf %290, %331 : vector<8x128xf32>
    %333 = arith.addf %330, %332 : vector<8x128xf32>
    %cst_7 = arith.constant 0.000000e+00 : f32
    %334 = vector.broadcast %cst_7 : f32 to vector<8x128xf32>
    %335 = arith.maximumf %333, %334 : vector<8x128xf32>
    %336 = vector.broadcast %10 : f32 to vector<8x128xf32>
    %337 = arith.mulf %287, %336 : vector<8x128xf32>
    %338 = vector.broadcast %25 : f32 to vector<8x128xf32>
    %339 = arith.addf %337, %338 : vector<8x128xf32>
    %340 = vector.broadcast %11 : f32 to vector<8x128xf32>
    %341 = arith.mulf %290, %340 : vector<8x128xf32>
    %342 = arith.addf %339, %341 : vector<8x128xf32>
    %cst_8 = arith.constant 0.000000e+00 : f32
    %343 = vector.broadcast %cst_8 : f32 to vector<8x128xf32>
    %344 = arith.maximumf %342, %343 : vector<8x128xf32>
    %345 = vector.broadcast %12 : f32 to vector<8x128xf32>
    %346 = arith.mulf %287, %345 : vector<8x128xf32>
    %347 = vector.broadcast %26 : f32 to vector<8x128xf32>
    %348 = arith.addf %346, %347 : vector<8x128xf32>
    %349 = vector.broadcast %13 : f32 to vector<8x128xf32>
    %350 = arith.mulf %290, %349 : vector<8x128xf32>
    %351 = arith.addf %348, %350 : vector<8x128xf32>
    %cst_9 = arith.constant 0.000000e+00 : f32
    %352 = vector.broadcast %cst_9 : f32 to vector<8x128xf32>
    %353 = arith.maximumf %351, %352 : vector<8x128xf32>
    %354 = vector.broadcast %14 : f32 to vector<8x128xf32>
    %355 = arith.mulf %287, %354 : vector<8x128xf32>
    %356 = vector.broadcast %27 : f32 to vector<8x128xf32>
    %357 = arith.addf %355, %356 : vector<8x128xf32>
    %358 = vector.broadcast %15 : f32 to vector<8x128xf32>
    %359 = arith.mulf %290, %358 : vector<8x128xf32>
    %360 = arith.addf %357, %359 : vector<8x128xf32>
    %cst_10 = arith.constant 0.000000e+00 : f32
    %361 = vector.broadcast %cst_10 : f32 to vector<8x128xf32>
    %362 = arith.maximumf %360, %361 : vector<8x128xf32>
    %363 = vector.broadcast %16 : f32 to vector<8x128xf32>
    %364 = arith.mulf %287, %363 : vector<8x128xf32>
    %365 = vector.broadcast %28 : f32 to vector<8x128xf32>
    %366 = arith.addf %364, %365 : vector<8x128xf32>
    %367 = vector.broadcast %17 : f32 to vector<8x128xf32>
    %368 = arith.mulf %290, %367 : vector<8x128xf32>
    %369 = arith.addf %366, %368 : vector<8x128xf32>
    %cst_11 = arith.constant 0.000000e+00 : f32
    %370 = vector.broadcast %cst_11 : f32 to vector<8x128xf32>
    %371 = arith.maximumf %369, %370 : vector<8x128xf32>
    %372 = vector.broadcast %18 : f32 to vector<8x128xf32>
    %373 = arith.mulf %287, %372 : vector<8x128xf32>
    %374 = vector.broadcast %29 : f32 to vector<8x128xf32>
    %375 = arith.addf %373, %374 : vector<8x128xf32>
    %376 = vector.broadcast %19 : f32 to vector<8x128xf32>
    %377 = arith.mulf %290, %376 : vector<8x128xf32>
    %378 = arith.addf %375, %377 : vector<8x128xf32>
    %cst_12 = arith.constant 0.000000e+00 : f32
    %379 = vector.broadcast %cst_12 : f32 to vector<8x128xf32>
    %380 = arith.maximumf %378, %379 : vector<8x128xf32>
    %381 = vector.broadcast %30 : f32 to vector<8x128xf32>
    %382 = arith.mulf %299, %381 : vector<8x128xf32>
    %383 = vector.broadcast %130 : f32 to vector<8x128xf32>
    %384 = arith.addf %382, %383 : vector<8x128xf32>
    %385 = vector.broadcast %31 : f32 to vector<8x128xf32>
    %386 = arith.mulf %308, %385 : vector<8x128xf32>
    %387 = arith.addf %384, %386 : vector<8x128xf32>
    %388 = vector.broadcast %32 : f32 to vector<8x128xf32>
    %389 = arith.mulf %317, %388 : vector<8x128xf32>
    %390 = arith.addf %387, %389 : vector<8x128xf32>
    %391 = vector.broadcast %33 : f32 to vector<8x128xf32>
    %392 = arith.mulf %326, %391 : vector<8x128xf32>
    %393 = arith.addf %390, %392 : vector<8x128xf32>
    %394 = vector.broadcast %34 : f32 to vector<8x128xf32>
    %395 = arith.mulf %335, %394 : vector<8x128xf32>
    %396 = arith.addf %393, %395 : vector<8x128xf32>
    %397 = vector.broadcast %35 : f32 to vector<8x128xf32>
    %398 = arith.mulf %344, %397 : vector<8x128xf32>
    %399 = arith.addf %396, %398 : vector<8x128xf32>
    %400 = vector.broadcast %36 : f32 to vector<8x128xf32>
    %401 = arith.mulf %353, %400 : vector<8x128xf32>
    %402 = arith.addf %399, %401 : vector<8x128xf32>
    %403 = vector.broadcast %37 : f32 to vector<8x128xf32>
    %404 = arith.mulf %362, %403 : vector<8x128xf32>
    %405 = arith.addf %402, %404 : vector<8x128xf32>
    %406 = vector.broadcast %38 : f32 to vector<8x128xf32>
    %407 = arith.mulf %371, %406 : vector<8x128xf32>
    %408 = arith.addf %405, %407 : vector<8x128xf32>
    %409 = vector.broadcast %39 : f32 to vector<8x128xf32>
    %410 = arith.mulf %380, %409 : vector<8x128xf32>
    %411 = arith.addf %408, %410 : vector<8x128xf32>
    %cst_13 = arith.constant 0.000000e+00 : f32
    %412 = vector.broadcast %cst_13 : f32 to vector<8x128xf32>
    %413 = arith.maximumf %411, %412 : vector<8x128xf32>
    %414 = vector.broadcast %40 : f32 to vector<8x128xf32>
    %415 = arith.mulf %299, %414 : vector<8x128xf32>
    %416 = vector.broadcast %131 : f32 to vector<8x128xf32>
    %417 = arith.addf %415, %416 : vector<8x128xf32>
    %418 = vector.broadcast %41 : f32 to vector<8x128xf32>
    %419 = arith.mulf %308, %418 : vector<8x128xf32>
    %420 = arith.addf %417, %419 : vector<8x128xf32>
    %421 = vector.broadcast %42 : f32 to vector<8x128xf32>
    %422 = arith.mulf %317, %421 : vector<8x128xf32>
    %423 = arith.addf %420, %422 : vector<8x128xf32>
    %424 = vector.broadcast %43 : f32 to vector<8x128xf32>
    %425 = arith.mulf %326, %424 : vector<8x128xf32>
    %426 = arith.addf %423, %425 : vector<8x128xf32>
    %427 = vector.broadcast %44 : f32 to vector<8x128xf32>
    %428 = arith.mulf %335, %427 : vector<8x128xf32>
    %429 = arith.addf %426, %428 : vector<8x128xf32>
    %430 = vector.broadcast %45 : f32 to vector<8x128xf32>
    %431 = arith.mulf %344, %430 : vector<8x128xf32>
    %432 = arith.addf %429, %431 : vector<8x128xf32>
    %433 = vector.broadcast %46 : f32 to vector<8x128xf32>
    %434 = arith.mulf %353, %433 : vector<8x128xf32>
    %435 = arith.addf %432, %434 : vector<8x128xf32>
    %436 = vector.broadcast %47 : f32 to vector<8x128xf32>
    %437 = arith.mulf %362, %436 : vector<8x128xf32>
    %438 = arith.addf %435, %437 : vector<8x128xf32>
    %439 = vector.broadcast %48 : f32 to vector<8x128xf32>
    %440 = arith.mulf %371, %439 : vector<8x128xf32>
    %441 = arith.addf %438, %440 : vector<8x128xf32>
    %442 = vector.broadcast %49 : f32 to vector<8x128xf32>
    %443 = arith.mulf %380, %442 : vector<8x128xf32>
    %444 = arith.addf %441, %443 : vector<8x128xf32>
    %cst_14 = arith.constant 0.000000e+00 : f32
    %445 = vector.broadcast %cst_14 : f32 to vector<8x128xf32>
    %446 = arith.maximumf %444, %445 : vector<8x128xf32>
    %447 = vector.broadcast %50 : f32 to vector<8x128xf32>
    %448 = arith.mulf %299, %447 : vector<8x128xf32>
    %449 = vector.broadcast %132 : f32 to vector<8x128xf32>
    %450 = arith.addf %448, %449 : vector<8x128xf32>
    %451 = vector.broadcast %51 : f32 to vector<8x128xf32>
    %452 = arith.mulf %308, %451 : vector<8x128xf32>
    %453 = arith.addf %450, %452 : vector<8x128xf32>
    %454 = vector.broadcast %52 : f32 to vector<8x128xf32>
    %455 = arith.mulf %317, %454 : vector<8x128xf32>
    %456 = arith.addf %453, %455 : vector<8x128xf32>
    %457 = vector.broadcast %53 : f32 to vector<8x128xf32>
    %458 = arith.mulf %326, %457 : vector<8x128xf32>
    %459 = arith.addf %456, %458 : vector<8x128xf32>
    %460 = vector.broadcast %54 : f32 to vector<8x128xf32>
    %461 = arith.mulf %335, %460 : vector<8x128xf32>
    %462 = arith.addf %459, %461 : vector<8x128xf32>
    %463 = vector.broadcast %55 : f32 to vector<8x128xf32>
    %464 = arith.mulf %344, %463 : vector<8x128xf32>
    %465 = arith.addf %462, %464 : vector<8x128xf32>
    %466 = vector.broadcast %56 : f32 to vector<8x128xf32>
    %467 = arith.mulf %353, %466 : vector<8x128xf32>
    %468 = arith.addf %465, %467 : vector<8x128xf32>
    %469 = vector.broadcast %57 : f32 to vector<8x128xf32>
    %470 = arith.mulf %362, %469 : vector<8x128xf32>
    %471 = arith.addf %468, %470 : vector<8x128xf32>
    %472 = vector.broadcast %58 : f32 to vector<8x128xf32>
    %473 = arith.mulf %371, %472 : vector<8x128xf32>
    %474 = arith.addf %471, %473 : vector<8x128xf32>
    %475 = vector.broadcast %59 : f32 to vector<8x128xf32>
    %476 = arith.mulf %380, %475 : vector<8x128xf32>
    %477 = arith.addf %474, %476 : vector<8x128xf32>
    %cst_15 = arith.constant 0.000000e+00 : f32
    %478 = vector.broadcast %cst_15 : f32 to vector<8x128xf32>
    %479 = arith.maximumf %477, %478 : vector<8x128xf32>
    %480 = vector.broadcast %60 : f32 to vector<8x128xf32>
    %481 = arith.mulf %299, %480 : vector<8x128xf32>
    %482 = vector.broadcast %133 : f32 to vector<8x128xf32>
    %483 = arith.addf %481, %482 : vector<8x128xf32>
    %484 = vector.broadcast %61 : f32 to vector<8x128xf32>
    %485 = arith.mulf %308, %484 : vector<8x128xf32>
    %486 = arith.addf %483, %485 : vector<8x128xf32>
    %487 = vector.broadcast %62 : f32 to vector<8x128xf32>
    %488 = arith.mulf %317, %487 : vector<8x128xf32>
    %489 = arith.addf %486, %488 : vector<8x128xf32>
    %490 = vector.broadcast %63 : f32 to vector<8x128xf32>
    %491 = arith.mulf %326, %490 : vector<8x128xf32>
    %492 = arith.addf %489, %491 : vector<8x128xf32>
    %493 = vector.broadcast %64 : f32 to vector<8x128xf32>
    %494 = arith.mulf %335, %493 : vector<8x128xf32>
    %495 = arith.addf %492, %494 : vector<8x128xf32>
    %496 = vector.broadcast %65 : f32 to vector<8x128xf32>
    %497 = arith.mulf %344, %496 : vector<8x128xf32>
    %498 = arith.addf %495, %497 : vector<8x128xf32>
    %499 = vector.broadcast %66 : f32 to vector<8x128xf32>
    %500 = arith.mulf %353, %499 : vector<8x128xf32>
    %501 = arith.addf %498, %500 : vector<8x128xf32>
    %502 = vector.broadcast %67 : f32 to vector<8x128xf32>
    %503 = arith.mulf %362, %502 : vector<8x128xf32>
    %504 = arith.addf %501, %503 : vector<8x128xf32>
    %505 = vector.broadcast %68 : f32 to vector<8x128xf32>
    %506 = arith.mulf %371, %505 : vector<8x128xf32>
    %507 = arith.addf %504, %506 : vector<8x128xf32>
    %508 = vector.broadcast %69 : f32 to vector<8x128xf32>
    %509 = arith.mulf %380, %508 : vector<8x128xf32>
    %510 = arith.addf %507, %509 : vector<8x128xf32>
    %cst_16 = arith.constant 0.000000e+00 : f32
    %511 = vector.broadcast %cst_16 : f32 to vector<8x128xf32>
    %512 = arith.maximumf %510, %511 : vector<8x128xf32>
    %513 = vector.broadcast %70 : f32 to vector<8x128xf32>
    %514 = arith.mulf %299, %513 : vector<8x128xf32>
    %515 = vector.broadcast %134 : f32 to vector<8x128xf32>
    %516 = arith.addf %514, %515 : vector<8x128xf32>
    %517 = vector.broadcast %71 : f32 to vector<8x128xf32>
    %518 = arith.mulf %308, %517 : vector<8x128xf32>
    %519 = arith.addf %516, %518 : vector<8x128xf32>
    %520 = vector.broadcast %72 : f32 to vector<8x128xf32>
    %521 = arith.mulf %317, %520 : vector<8x128xf32>
    %522 = arith.addf %519, %521 : vector<8x128xf32>
    %523 = vector.broadcast %73 : f32 to vector<8x128xf32>
    %524 = arith.mulf %326, %523 : vector<8x128xf32>
    %525 = arith.addf %522, %524 : vector<8x128xf32>
    %526 = vector.broadcast %74 : f32 to vector<8x128xf32>
    %527 = arith.mulf %335, %526 : vector<8x128xf32>
    %528 = arith.addf %525, %527 : vector<8x128xf32>
    %529 = vector.broadcast %75 : f32 to vector<8x128xf32>
    %530 = arith.mulf %344, %529 : vector<8x128xf32>
    %531 = arith.addf %528, %530 : vector<8x128xf32>
    %532 = vector.broadcast %76 : f32 to vector<8x128xf32>
    %533 = arith.mulf %353, %532 : vector<8x128xf32>
    %534 = arith.addf %531, %533 : vector<8x128xf32>
    %535 = vector.broadcast %77 : f32 to vector<8x128xf32>
    %536 = arith.mulf %362, %535 : vector<8x128xf32>
    %537 = arith.addf %534, %536 : vector<8x128xf32>
    %538 = vector.broadcast %78 : f32 to vector<8x128xf32>
    %539 = arith.mulf %371, %538 : vector<8x128xf32>
    %540 = arith.addf %537, %539 : vector<8x128xf32>
    %541 = vector.broadcast %79 : f32 to vector<8x128xf32>
    %542 = arith.mulf %380, %541 : vector<8x128xf32>
    %543 = arith.addf %540, %542 : vector<8x128xf32>
    %cst_17 = arith.constant 0.000000e+00 : f32
    %544 = vector.broadcast %cst_17 : f32 to vector<8x128xf32>
    %545 = arith.maximumf %543, %544 : vector<8x128xf32>
    %546 = vector.broadcast %80 : f32 to vector<8x128xf32>
    %547 = arith.mulf %299, %546 : vector<8x128xf32>
    %548 = vector.broadcast %135 : f32 to vector<8x128xf32>
    %549 = arith.addf %547, %548 : vector<8x128xf32>
    %550 = vector.broadcast %81 : f32 to vector<8x128xf32>
    %551 = arith.mulf %308, %550 : vector<8x128xf32>
    %552 = arith.addf %549, %551 : vector<8x128xf32>
    %553 = vector.broadcast %82 : f32 to vector<8x128xf32>
    %554 = arith.mulf %317, %553 : vector<8x128xf32>
    %555 = arith.addf %552, %554 : vector<8x128xf32>
    %556 = vector.broadcast %83 : f32 to vector<8x128xf32>
    %557 = arith.mulf %326, %556 : vector<8x128xf32>
    %558 = arith.addf %555, %557 : vector<8x128xf32>
    %559 = vector.broadcast %84 : f32 to vector<8x128xf32>
    %560 = arith.mulf %335, %559 : vector<8x128xf32>
    %561 = arith.addf %558, %560 : vector<8x128xf32>
    %562 = vector.broadcast %85 : f32 to vector<8x128xf32>
    %563 = arith.mulf %344, %562 : vector<8x128xf32>
    %564 = arith.addf %561, %563 : vector<8x128xf32>
    %565 = vector.broadcast %86 : f32 to vector<8x128xf32>
    %566 = arith.mulf %353, %565 : vector<8x128xf32>
    %567 = arith.addf %564, %566 : vector<8x128xf32>
    %568 = vector.broadcast %87 : f32 to vector<8x128xf32>
    %569 = arith.mulf %362, %568 : vector<8x128xf32>
    %570 = arith.addf %567, %569 : vector<8x128xf32>
    %571 = vector.broadcast %88 : f32 to vector<8x128xf32>
    %572 = arith.mulf %371, %571 : vector<8x128xf32>
    %573 = arith.addf %570, %572 : vector<8x128xf32>
    %574 = vector.broadcast %89 : f32 to vector<8x128xf32>
    %575 = arith.mulf %380, %574 : vector<8x128xf32>
    %576 = arith.addf %573, %575 : vector<8x128xf32>
    %cst_18 = arith.constant 0.000000e+00 : f32
    %577 = vector.broadcast %cst_18 : f32 to vector<8x128xf32>
    %578 = arith.maximumf %576, %577 : vector<8x128xf32>
    %579 = vector.broadcast %90 : f32 to vector<8x128xf32>
    %580 = arith.mulf %299, %579 : vector<8x128xf32>
    %581 = vector.broadcast %136 : f32 to vector<8x128xf32>
    %582 = arith.addf %580, %581 : vector<8x128xf32>
    %583 = vector.broadcast %91 : f32 to vector<8x128xf32>
    %584 = arith.mulf %308, %583 : vector<8x128xf32>
    %585 = arith.addf %582, %584 : vector<8x128xf32>
    %586 = vector.broadcast %92 : f32 to vector<8x128xf32>
    %587 = arith.mulf %317, %586 : vector<8x128xf32>
    %588 = arith.addf %585, %587 : vector<8x128xf32>
    %589 = vector.broadcast %93 : f32 to vector<8x128xf32>
    %590 = arith.mulf %326, %589 : vector<8x128xf32>
    %591 = arith.addf %588, %590 : vector<8x128xf32>
    %592 = vector.broadcast %94 : f32 to vector<8x128xf32>
    %593 = arith.mulf %335, %592 : vector<8x128xf32>
    %594 = arith.addf %591, %593 : vector<8x128xf32>
    %595 = vector.broadcast %95 : f32 to vector<8x128xf32>
    %596 = arith.mulf %344, %595 : vector<8x128xf32>
    %597 = arith.addf %594, %596 : vector<8x128xf32>
    %598 = vector.broadcast %96 : f32 to vector<8x128xf32>
    %599 = arith.mulf %353, %598 : vector<8x128xf32>
    %600 = arith.addf %597, %599 : vector<8x128xf32>
    %601 = vector.broadcast %97 : f32 to vector<8x128xf32>
    %602 = arith.mulf %362, %601 : vector<8x128xf32>
    %603 = arith.addf %600, %602 : vector<8x128xf32>
    %604 = vector.broadcast %98 : f32 to vector<8x128xf32>
    %605 = arith.mulf %371, %604 : vector<8x128xf32>
    %606 = arith.addf %603, %605 : vector<8x128xf32>
    %607 = vector.broadcast %99 : f32 to vector<8x128xf32>
    %608 = arith.mulf %380, %607 : vector<8x128xf32>
    %609 = arith.addf %606, %608 : vector<8x128xf32>
    %cst_19 = arith.constant 0.000000e+00 : f32
    %610 = vector.broadcast %cst_19 : f32 to vector<8x128xf32>
    %611 = arith.maximumf %609, %610 : vector<8x128xf32>
    %612 = vector.broadcast %100 : f32 to vector<8x128xf32>
    %613 = arith.mulf %299, %612 : vector<8x128xf32>
    %614 = vector.broadcast %137 : f32 to vector<8x128xf32>
    %615 = arith.addf %613, %614 : vector<8x128xf32>
    %616 = vector.broadcast %101 : f32 to vector<8x128xf32>
    %617 = arith.mulf %308, %616 : vector<8x128xf32>
    %618 = arith.addf %615, %617 : vector<8x128xf32>
    %619 = vector.broadcast %102 : f32 to vector<8x128xf32>
    %620 = arith.mulf %317, %619 : vector<8x128xf32>
    %621 = arith.addf %618, %620 : vector<8x128xf32>
    %622 = vector.broadcast %103 : f32 to vector<8x128xf32>
    %623 = arith.mulf %326, %622 : vector<8x128xf32>
    %624 = arith.addf %621, %623 : vector<8x128xf32>
    %625 = vector.broadcast %104 : f32 to vector<8x128xf32>
    %626 = arith.mulf %335, %625 : vector<8x128xf32>
    %627 = arith.addf %624, %626 : vector<8x128xf32>
    %628 = vector.broadcast %105 : f32 to vector<8x128xf32>
    %629 = arith.mulf %344, %628 : vector<8x128xf32>
    %630 = arith.addf %627, %629 : vector<8x128xf32>
    %631 = vector.broadcast %106 : f32 to vector<8x128xf32>
    %632 = arith.mulf %353, %631 : vector<8x128xf32>
    %633 = arith.addf %630, %632 : vector<8x128xf32>
    %634 = vector.broadcast %107 : f32 to vector<8x128xf32>
    %635 = arith.mulf %362, %634 : vector<8x128xf32>
    %636 = arith.addf %633, %635 : vector<8x128xf32>
    %637 = vector.broadcast %108 : f32 to vector<8x128xf32>
    %638 = arith.mulf %371, %637 : vector<8x128xf32>
    %639 = arith.addf %636, %638 : vector<8x128xf32>
    %640 = vector.broadcast %109 : f32 to vector<8x128xf32>
    %641 = arith.mulf %380, %640 : vector<8x128xf32>
    %642 = arith.addf %639, %641 : vector<8x128xf32>
    %cst_20 = arith.constant 0.000000e+00 : f32
    %643 = vector.broadcast %cst_20 : f32 to vector<8x128xf32>
    %644 = arith.maximumf %642, %643 : vector<8x128xf32>
    %645 = vector.broadcast %110 : f32 to vector<8x128xf32>
    %646 = arith.mulf %299, %645 : vector<8x128xf32>
    %647 = vector.broadcast %138 : f32 to vector<8x128xf32>
    %648 = arith.addf %646, %647 : vector<8x128xf32>
    %649 = vector.broadcast %111 : f32 to vector<8x128xf32>
    %650 = arith.mulf %308, %649 : vector<8x128xf32>
    %651 = arith.addf %648, %650 : vector<8x128xf32>
    %652 = vector.broadcast %112 : f32 to vector<8x128xf32>
    %653 = arith.mulf %317, %652 : vector<8x128xf32>
    %654 = arith.addf %651, %653 : vector<8x128xf32>
    %655 = vector.broadcast %113 : f32 to vector<8x128xf32>
    %656 = arith.mulf %326, %655 : vector<8x128xf32>
    %657 = arith.addf %654, %656 : vector<8x128xf32>
    %658 = vector.broadcast %114 : f32 to vector<8x128xf32>
    %659 = arith.mulf %335, %658 : vector<8x128xf32>
    %660 = arith.addf %657, %659 : vector<8x128xf32>
    %661 = vector.broadcast %115 : f32 to vector<8x128xf32>
    %662 = arith.mulf %344, %661 : vector<8x128xf32>
    %663 = arith.addf %660, %662 : vector<8x128xf32>
    %664 = vector.broadcast %116 : f32 to vector<8x128xf32>
    %665 = arith.mulf %353, %664 : vector<8x128xf32>
    %666 = arith.addf %663, %665 : vector<8x128xf32>
    %667 = vector.broadcast %117 : f32 to vector<8x128xf32>
    %668 = arith.mulf %362, %667 : vector<8x128xf32>
    %669 = arith.addf %666, %668 : vector<8x128xf32>
    %670 = vector.broadcast %118 : f32 to vector<8x128xf32>
    %671 = arith.mulf %371, %670 : vector<8x128xf32>
    %672 = arith.addf %669, %671 : vector<8x128xf32>
    %673 = vector.broadcast %119 : f32 to vector<8x128xf32>
    %674 = arith.mulf %380, %673 : vector<8x128xf32>
    %675 = arith.addf %672, %674 : vector<8x128xf32>
    %cst_21 = arith.constant 0.000000e+00 : f32
    %676 = vector.broadcast %cst_21 : f32 to vector<8x128xf32>
    %677 = arith.maximumf %675, %676 : vector<8x128xf32>
    %678 = vector.broadcast %120 : f32 to vector<8x128xf32>
    %679 = arith.mulf %299, %678 : vector<8x128xf32>
    %680 = vector.broadcast %139 : f32 to vector<8x128xf32>
    %681 = arith.addf %679, %680 : vector<8x128xf32>
    %682 = vector.broadcast %121 : f32 to vector<8x128xf32>
    %683 = arith.mulf %308, %682 : vector<8x128xf32>
    %684 = arith.addf %681, %683 : vector<8x128xf32>
    %685 = vector.broadcast %122 : f32 to vector<8x128xf32>
    %686 = arith.mulf %317, %685 : vector<8x128xf32>
    %687 = arith.addf %684, %686 : vector<8x128xf32>
    %688 = vector.broadcast %123 : f32 to vector<8x128xf32>
    %689 = arith.mulf %326, %688 : vector<8x128xf32>
    %690 = arith.addf %687, %689 : vector<8x128xf32>
    %691 = vector.broadcast %124 : f32 to vector<8x128xf32>
    %692 = arith.mulf %335, %691 : vector<8x128xf32>
    %693 = arith.addf %690, %692 : vector<8x128xf32>
    %694 = vector.broadcast %125 : f32 to vector<8x128xf32>
    %695 = arith.mulf %344, %694 : vector<8x128xf32>
    %696 = arith.addf %693, %695 : vector<8x128xf32>
    %697 = vector.broadcast %126 : f32 to vector<8x128xf32>
    %698 = arith.mulf %353, %697 : vector<8x128xf32>
    %699 = arith.addf %696, %698 : vector<8x128xf32>
    %700 = vector.broadcast %127 : f32 to vector<8x128xf32>
    %701 = arith.mulf %362, %700 : vector<8x128xf32>
    %702 = arith.addf %699, %701 : vector<8x128xf32>
    %703 = vector.broadcast %128 : f32 to vector<8x128xf32>
    %704 = arith.mulf %371, %703 : vector<8x128xf32>
    %705 = arith.addf %702, %704 : vector<8x128xf32>
    %706 = vector.broadcast %129 : f32 to vector<8x128xf32>
    %707 = arith.mulf %380, %706 : vector<8x128xf32>
    %708 = arith.addf %705, %707 : vector<8x128xf32>
    %cst_22 = arith.constant 0.000000e+00 : f32
    %709 = vector.broadcast %cst_22 : f32 to vector<8x128xf32>
    %710 = arith.maximumf %708, %709 : vector<8x128xf32>
    %711 = vector.broadcast %140 : f32 to vector<8x128xf32>
    %712 = arith.mulf %413, %711 : vector<8x128xf32>
    %713 = vector.broadcast %240 : f32 to vector<8x128xf32>
    %714 = arith.addf %712, %713 : vector<8x128xf32>
    %715 = vector.broadcast %141 : f32 to vector<8x128xf32>
    %716 = arith.mulf %446, %715 : vector<8x128xf32>
    %717 = arith.addf %714, %716 : vector<8x128xf32>
    %718 = vector.broadcast %142 : f32 to vector<8x128xf32>
    %719 = arith.mulf %479, %718 : vector<8x128xf32>
    %720 = arith.addf %717, %719 : vector<8x128xf32>
    %721 = vector.broadcast %143 : f32 to vector<8x128xf32>
    %722 = arith.mulf %512, %721 : vector<8x128xf32>
    %723 = arith.addf %720, %722 : vector<8x128xf32>
    %724 = vector.broadcast %144 : f32 to vector<8x128xf32>
    %725 = arith.mulf %545, %724 : vector<8x128xf32>
    %726 = arith.addf %723, %725 : vector<8x128xf32>
    %727 = vector.broadcast %145 : f32 to vector<8x128xf32>
    %728 = arith.mulf %578, %727 : vector<8x128xf32>
    %729 = arith.addf %726, %728 : vector<8x128xf32>
    %730 = vector.broadcast %146 : f32 to vector<8x128xf32>
    %731 = arith.mulf %611, %730 : vector<8x128xf32>
    %732 = arith.addf %729, %731 : vector<8x128xf32>
    %733 = vector.broadcast %147 : f32 to vector<8x128xf32>
    %734 = arith.mulf %644, %733 : vector<8x128xf32>
    %735 = arith.addf %732, %734 : vector<8x128xf32>
    %736 = vector.broadcast %148 : f32 to vector<8x128xf32>
    %737 = arith.mulf %677, %736 : vector<8x128xf32>
    %738 = arith.addf %735, %737 : vector<8x128xf32>
    %739 = vector.broadcast %149 : f32 to vector<8x128xf32>
    %740 = arith.mulf %710, %739 : vector<8x128xf32>
    %741 = arith.addf %738, %740 : vector<8x128xf32>
    %cst_23 = arith.constant 0.000000e+00 : f32
    %742 = vector.broadcast %cst_23 : f32 to vector<8x128xf32>
    %743 = arith.maximumf %741, %742 : vector<8x128xf32>
    %744 = vector.broadcast %150 : f32 to vector<8x128xf32>
    %745 = arith.mulf %413, %744 : vector<8x128xf32>
    %746 = vector.broadcast %241 : f32 to vector<8x128xf32>
    %747 = arith.addf %745, %746 : vector<8x128xf32>
    %748 = vector.broadcast %151 : f32 to vector<8x128xf32>
    %749 = arith.mulf %446, %748 : vector<8x128xf32>
    %750 = arith.addf %747, %749 : vector<8x128xf32>
    %751 = vector.broadcast %152 : f32 to vector<8x128xf32>
    %752 = arith.mulf %479, %751 : vector<8x128xf32>
    %753 = arith.addf %750, %752 : vector<8x128xf32>
    %754 = vector.broadcast %153 : f32 to vector<8x128xf32>
    %755 = arith.mulf %512, %754 : vector<8x128xf32>
    %756 = arith.addf %753, %755 : vector<8x128xf32>
    %757 = vector.broadcast %154 : f32 to vector<8x128xf32>
    %758 = arith.mulf %545, %757 : vector<8x128xf32>
    %759 = arith.addf %756, %758 : vector<8x128xf32>
    %760 = vector.broadcast %155 : f32 to vector<8x128xf32>
    %761 = arith.mulf %578, %760 : vector<8x128xf32>
    %762 = arith.addf %759, %761 : vector<8x128xf32>
    %763 = vector.broadcast %156 : f32 to vector<8x128xf32>
    %764 = arith.mulf %611, %763 : vector<8x128xf32>
    %765 = arith.addf %762, %764 : vector<8x128xf32>
    %766 = vector.broadcast %157 : f32 to vector<8x128xf32>
    %767 = arith.mulf %644, %766 : vector<8x128xf32>
    %768 = arith.addf %765, %767 : vector<8x128xf32>
    %769 = vector.broadcast %158 : f32 to vector<8x128xf32>
    %770 = arith.mulf %677, %769 : vector<8x128xf32>
    %771 = arith.addf %768, %770 : vector<8x128xf32>
    %772 = vector.broadcast %159 : f32 to vector<8x128xf32>
    %773 = arith.mulf %710, %772 : vector<8x128xf32>
    %774 = arith.addf %771, %773 : vector<8x128xf32>
    %cst_24 = arith.constant 0.000000e+00 : f32
    %775 = vector.broadcast %cst_24 : f32 to vector<8x128xf32>
    %776 = arith.maximumf %774, %775 : vector<8x128xf32>
    %777 = vector.broadcast %160 : f32 to vector<8x128xf32>
    %778 = arith.mulf %413, %777 : vector<8x128xf32>
    %779 = vector.broadcast %242 : f32 to vector<8x128xf32>
    %780 = arith.addf %778, %779 : vector<8x128xf32>
    %781 = vector.broadcast %161 : f32 to vector<8x128xf32>
    %782 = arith.mulf %446, %781 : vector<8x128xf32>
    %783 = arith.addf %780, %782 : vector<8x128xf32>
    %784 = vector.broadcast %162 : f32 to vector<8x128xf32>
    %785 = arith.mulf %479, %784 : vector<8x128xf32>
    %786 = arith.addf %783, %785 : vector<8x128xf32>
    %787 = vector.broadcast %163 : f32 to vector<8x128xf32>
    %788 = arith.mulf %512, %787 : vector<8x128xf32>
    %789 = arith.addf %786, %788 : vector<8x128xf32>
    %790 = vector.broadcast %164 : f32 to vector<8x128xf32>
    %791 = arith.mulf %545, %790 : vector<8x128xf32>
    %792 = arith.addf %789, %791 : vector<8x128xf32>
    %793 = vector.broadcast %165 : f32 to vector<8x128xf32>
    %794 = arith.mulf %578, %793 : vector<8x128xf32>
    %795 = arith.addf %792, %794 : vector<8x128xf32>
    %796 = vector.broadcast %166 : f32 to vector<8x128xf32>
    %797 = arith.mulf %611, %796 : vector<8x128xf32>
    %798 = arith.addf %795, %797 : vector<8x128xf32>
    %799 = vector.broadcast %167 : f32 to vector<8x128xf32>
    %800 = arith.mulf %644, %799 : vector<8x128xf32>
    %801 = arith.addf %798, %800 : vector<8x128xf32>
    %802 = vector.broadcast %168 : f32 to vector<8x128xf32>
    %803 = arith.mulf %677, %802 : vector<8x128xf32>
    %804 = arith.addf %801, %803 : vector<8x128xf32>
    %805 = vector.broadcast %169 : f32 to vector<8x128xf32>
    %806 = arith.mulf %710, %805 : vector<8x128xf32>
    %807 = arith.addf %804, %806 : vector<8x128xf32>
    %cst_25 = arith.constant 0.000000e+00 : f32
    %808 = vector.broadcast %cst_25 : f32 to vector<8x128xf32>
    %809 = arith.maximumf %807, %808 : vector<8x128xf32>
    %810 = vector.broadcast %170 : f32 to vector<8x128xf32>
    %811 = arith.mulf %413, %810 : vector<8x128xf32>
    %812 = vector.broadcast %243 : f32 to vector<8x128xf32>
    %813 = arith.addf %811, %812 : vector<8x128xf32>
    %814 = vector.broadcast %171 : f32 to vector<8x128xf32>
    %815 = arith.mulf %446, %814 : vector<8x128xf32>
    %816 = arith.addf %813, %815 : vector<8x128xf32>
    %817 = vector.broadcast %172 : f32 to vector<8x128xf32>
    %818 = arith.mulf %479, %817 : vector<8x128xf32>
    %819 = arith.addf %816, %818 : vector<8x128xf32>
    %820 = vector.broadcast %173 : f32 to vector<8x128xf32>
    %821 = arith.mulf %512, %820 : vector<8x128xf32>
    %822 = arith.addf %819, %821 : vector<8x128xf32>
    %823 = vector.broadcast %174 : f32 to vector<8x128xf32>
    %824 = arith.mulf %545, %823 : vector<8x128xf32>
    %825 = arith.addf %822, %824 : vector<8x128xf32>
    %826 = vector.broadcast %175 : f32 to vector<8x128xf32>
    %827 = arith.mulf %578, %826 : vector<8x128xf32>
    %828 = arith.addf %825, %827 : vector<8x128xf32>
    %829 = vector.broadcast %176 : f32 to vector<8x128xf32>
    %830 = arith.mulf %611, %829 : vector<8x128xf32>
    %831 = arith.addf %828, %830 : vector<8x128xf32>
    %832 = vector.broadcast %177 : f32 to vector<8x128xf32>
    %833 = arith.mulf %644, %832 : vector<8x128xf32>
    %834 = arith.addf %831, %833 : vector<8x128xf32>
    %835 = vector.broadcast %178 : f32 to vector<8x128xf32>
    %836 = arith.mulf %677, %835 : vector<8x128xf32>
    %837 = arith.addf %834, %836 : vector<8x128xf32>
    %838 = vector.broadcast %179 : f32 to vector<8x128xf32>
    %839 = arith.mulf %710, %838 : vector<8x128xf32>
    %840 = arith.addf %837, %839 : vector<8x128xf32>
    %cst_26 = arith.constant 0.000000e+00 : f32
    %841 = vector.broadcast %cst_26 : f32 to vector<8x128xf32>
    %842 = arith.maximumf %840, %841 : vector<8x128xf32>
    %843 = vector.broadcast %180 : f32 to vector<8x128xf32>
    %844 = arith.mulf %413, %843 : vector<8x128xf32>
    %845 = vector.broadcast %244 : f32 to vector<8x128xf32>
    %846 = arith.addf %844, %845 : vector<8x128xf32>
    %847 = vector.broadcast %181 : f32 to vector<8x128xf32>
    %848 = arith.mulf %446, %847 : vector<8x128xf32>
    %849 = arith.addf %846, %848 : vector<8x128xf32>
    %850 = vector.broadcast %182 : f32 to vector<8x128xf32>
    %851 = arith.mulf %479, %850 : vector<8x128xf32>
    %852 = arith.addf %849, %851 : vector<8x128xf32>
    %853 = vector.broadcast %183 : f32 to vector<8x128xf32>
    %854 = arith.mulf %512, %853 : vector<8x128xf32>
    %855 = arith.addf %852, %854 : vector<8x128xf32>
    %856 = vector.broadcast %184 : f32 to vector<8x128xf32>
    %857 = arith.mulf %545, %856 : vector<8x128xf32>
    %858 = arith.addf %855, %857 : vector<8x128xf32>
    %859 = vector.broadcast %185 : f32 to vector<8x128xf32>
    %860 = arith.mulf %578, %859 : vector<8x128xf32>
    %861 = arith.addf %858, %860 : vector<8x128xf32>
    %862 = vector.broadcast %186 : f32 to vector<8x128xf32>
    %863 = arith.mulf %611, %862 : vector<8x128xf32>
    %864 = arith.addf %861, %863 : vector<8x128xf32>
    %865 = vector.broadcast %187 : f32 to vector<8x128xf32>
    %866 = arith.mulf %644, %865 : vector<8x128xf32>
    %867 = arith.addf %864, %866 : vector<8x128xf32>
    %868 = vector.broadcast %188 : f32 to vector<8x128xf32>
    %869 = arith.mulf %677, %868 : vector<8x128xf32>
    %870 = arith.addf %867, %869 : vector<8x128xf32>
    %871 = vector.broadcast %189 : f32 to vector<8x128xf32>
    %872 = arith.mulf %710, %871 : vector<8x128xf32>
    %873 = arith.addf %870, %872 : vector<8x128xf32>
    %cst_27 = arith.constant 0.000000e+00 : f32
    %874 = vector.broadcast %cst_27 : f32 to vector<8x128xf32>
    %875 = arith.maximumf %873, %874 : vector<8x128xf32>
    %876 = vector.broadcast %190 : f32 to vector<8x128xf32>
    %877 = arith.mulf %413, %876 : vector<8x128xf32>
    %878 = vector.broadcast %245 : f32 to vector<8x128xf32>
    %879 = arith.addf %877, %878 : vector<8x128xf32>
    %880 = vector.broadcast %191 : f32 to vector<8x128xf32>
    %881 = arith.mulf %446, %880 : vector<8x128xf32>
    %882 = arith.addf %879, %881 : vector<8x128xf32>
    %883 = vector.broadcast %192 : f32 to vector<8x128xf32>
    %884 = arith.mulf %479, %883 : vector<8x128xf32>
    %885 = arith.addf %882, %884 : vector<8x128xf32>
    %886 = vector.broadcast %193 : f32 to vector<8x128xf32>
    %887 = arith.mulf %512, %886 : vector<8x128xf32>
    %888 = arith.addf %885, %887 : vector<8x128xf32>
    %889 = vector.broadcast %194 : f32 to vector<8x128xf32>
    %890 = arith.mulf %545, %889 : vector<8x128xf32>
    %891 = arith.addf %888, %890 : vector<8x128xf32>
    %892 = vector.broadcast %195 : f32 to vector<8x128xf32>
    %893 = arith.mulf %578, %892 : vector<8x128xf32>
    %894 = arith.addf %891, %893 : vector<8x128xf32>
    %895 = vector.broadcast %196 : f32 to vector<8x128xf32>
    %896 = arith.mulf %611, %895 : vector<8x128xf32>
    %897 = arith.addf %894, %896 : vector<8x128xf32>
    %898 = vector.broadcast %197 : f32 to vector<8x128xf32>
    %899 = arith.mulf %644, %898 : vector<8x128xf32>
    %900 = arith.addf %897, %899 : vector<8x128xf32>
    %901 = vector.broadcast %198 : f32 to vector<8x128xf32>
    %902 = arith.mulf %677, %901 : vector<8x128xf32>
    %903 = arith.addf %900, %902 : vector<8x128xf32>
    %904 = vector.broadcast %199 : f32 to vector<8x128xf32>
    %905 = arith.mulf %710, %904 : vector<8x128xf32>
    %906 = arith.addf %903, %905 : vector<8x128xf32>
    %cst_28 = arith.constant 0.000000e+00 : f32
    %907 = vector.broadcast %cst_28 : f32 to vector<8x128xf32>
    %908 = arith.maximumf %906, %907 : vector<8x128xf32>
    %909 = vector.broadcast %200 : f32 to vector<8x128xf32>
    %910 = arith.mulf %413, %909 : vector<8x128xf32>
    %911 = vector.broadcast %246 : f32 to vector<8x128xf32>
    %912 = arith.addf %910, %911 : vector<8x128xf32>
    %913 = vector.broadcast %201 : f32 to vector<8x128xf32>
    %914 = arith.mulf %446, %913 : vector<8x128xf32>
    %915 = arith.addf %912, %914 : vector<8x128xf32>
    %916 = vector.broadcast %202 : f32 to vector<8x128xf32>
    %917 = arith.mulf %479, %916 : vector<8x128xf32>
    %918 = arith.addf %915, %917 : vector<8x128xf32>
    %919 = vector.broadcast %203 : f32 to vector<8x128xf32>
    %920 = arith.mulf %512, %919 : vector<8x128xf32>
    %921 = arith.addf %918, %920 : vector<8x128xf32>
    %922 = vector.broadcast %204 : f32 to vector<8x128xf32>
    %923 = arith.mulf %545, %922 : vector<8x128xf32>
    %924 = arith.addf %921, %923 : vector<8x128xf32>
    %925 = vector.broadcast %205 : f32 to vector<8x128xf32>
    %926 = arith.mulf %578, %925 : vector<8x128xf32>
    %927 = arith.addf %924, %926 : vector<8x128xf32>
    %928 = vector.broadcast %206 : f32 to vector<8x128xf32>
    %929 = arith.mulf %611, %928 : vector<8x128xf32>
    %930 = arith.addf %927, %929 : vector<8x128xf32>
    %931 = vector.broadcast %207 : f32 to vector<8x128xf32>
    %932 = arith.mulf %644, %931 : vector<8x128xf32>
    %933 = arith.addf %930, %932 : vector<8x128xf32>
    %934 = vector.broadcast %208 : f32 to vector<8x128xf32>
    %935 = arith.mulf %677, %934 : vector<8x128xf32>
    %936 = arith.addf %933, %935 : vector<8x128xf32>
    %937 = vector.broadcast %209 : f32 to vector<8x128xf32>
    %938 = arith.mulf %710, %937 : vector<8x128xf32>
    %939 = arith.addf %936, %938 : vector<8x128xf32>
    %cst_29 = arith.constant 0.000000e+00 : f32
    %940 = vector.broadcast %cst_29 : f32 to vector<8x128xf32>
    %941 = arith.maximumf %939, %940 : vector<8x128xf32>
    %942 = vector.broadcast %210 : f32 to vector<8x128xf32>
    %943 = arith.mulf %413, %942 : vector<8x128xf32>
    %944 = vector.broadcast %247 : f32 to vector<8x128xf32>
    %945 = arith.addf %943, %944 : vector<8x128xf32>
    %946 = vector.broadcast %211 : f32 to vector<8x128xf32>
    %947 = arith.mulf %446, %946 : vector<8x128xf32>
    %948 = arith.addf %945, %947 : vector<8x128xf32>
    %949 = vector.broadcast %212 : f32 to vector<8x128xf32>
    %950 = arith.mulf %479, %949 : vector<8x128xf32>
    %951 = arith.addf %948, %950 : vector<8x128xf32>
    %952 = vector.broadcast %213 : f32 to vector<8x128xf32>
    %953 = arith.mulf %512, %952 : vector<8x128xf32>
    %954 = arith.addf %951, %953 : vector<8x128xf32>
    %955 = vector.broadcast %214 : f32 to vector<8x128xf32>
    %956 = arith.mulf %545, %955 : vector<8x128xf32>
    %957 = arith.addf %954, %956 : vector<8x128xf32>
    %958 = vector.broadcast %215 : f32 to vector<8x128xf32>
    %959 = arith.mulf %578, %958 : vector<8x128xf32>
    %960 = arith.addf %957, %959 : vector<8x128xf32>
    %961 = vector.broadcast %216 : f32 to vector<8x128xf32>
    %962 = arith.mulf %611, %961 : vector<8x128xf32>
    %963 = arith.addf %960, %962 : vector<8x128xf32>
    %964 = vector.broadcast %217 : f32 to vector<8x128xf32>
    %965 = arith.mulf %644, %964 : vector<8x128xf32>
    %966 = arith.addf %963, %965 : vector<8x128xf32>
    %967 = vector.broadcast %218 : f32 to vector<8x128xf32>
    %968 = arith.mulf %677, %967 : vector<8x128xf32>
    %969 = arith.addf %966, %968 : vector<8x128xf32>
    %970 = vector.broadcast %219 : f32 to vector<8x128xf32>
    %971 = arith.mulf %710, %970 : vector<8x128xf32>
    %972 = arith.addf %969, %971 : vector<8x128xf32>
    %cst_30 = arith.constant 0.000000e+00 : f32
    %973 = vector.broadcast %cst_30 : f32 to vector<8x128xf32>
    %974 = arith.maximumf %972, %973 : vector<8x128xf32>
    %975 = vector.broadcast %220 : f32 to vector<8x128xf32>
    %976 = arith.mulf %413, %975 : vector<8x128xf32>
    %977 = vector.broadcast %248 : f32 to vector<8x128xf32>
    %978 = arith.addf %976, %977 : vector<8x128xf32>
    %979 = vector.broadcast %221 : f32 to vector<8x128xf32>
    %980 = arith.mulf %446, %979 : vector<8x128xf32>
    %981 = arith.addf %978, %980 : vector<8x128xf32>
    %982 = vector.broadcast %222 : f32 to vector<8x128xf32>
    %983 = arith.mulf %479, %982 : vector<8x128xf32>
    %984 = arith.addf %981, %983 : vector<8x128xf32>
    %985 = vector.broadcast %223 : f32 to vector<8x128xf32>
    %986 = arith.mulf %512, %985 : vector<8x128xf32>
    %987 = arith.addf %984, %986 : vector<8x128xf32>
    %988 = vector.broadcast %224 : f32 to vector<8x128xf32>
    %989 = arith.mulf %545, %988 : vector<8x128xf32>
    %990 = arith.addf %987, %989 : vector<8x128xf32>
    %991 = vector.broadcast %225 : f32 to vector<8x128xf32>
    %992 = arith.mulf %578, %991 : vector<8x128xf32>
    %993 = arith.addf %990, %992 : vector<8x128xf32>
    %994 = vector.broadcast %226 : f32 to vector<8x128xf32>
    %995 = arith.mulf %611, %994 : vector<8x128xf32>
    %996 = arith.addf %993, %995 : vector<8x128xf32>
    %997 = vector.broadcast %227 : f32 to vector<8x128xf32>
    %998 = arith.mulf %644, %997 : vector<8x128xf32>
    %999 = arith.addf %996, %998 : vector<8x128xf32>
    %1000 = vector.broadcast %228 : f32 to vector<8x128xf32>
    %1001 = arith.mulf %677, %1000 : vector<8x128xf32>
    %1002 = arith.addf %999, %1001 : vector<8x128xf32>
    %1003 = vector.broadcast %229 : f32 to vector<8x128xf32>
    %1004 = arith.mulf %710, %1003 : vector<8x128xf32>
    %1005 = arith.addf %1002, %1004 : vector<8x128xf32>
    %cst_31 = arith.constant 0.000000e+00 : f32
    %1006 = vector.broadcast %cst_31 : f32 to vector<8x128xf32>
    %1007 = arith.maximumf %1005, %1006 : vector<8x128xf32>
    %1008 = vector.broadcast %230 : f32 to vector<8x128xf32>
    %1009 = arith.mulf %413, %1008 : vector<8x128xf32>
    %1010 = vector.broadcast %249 : f32 to vector<8x128xf32>
    %1011 = arith.addf %1009, %1010 : vector<8x128xf32>
    %1012 = vector.broadcast %231 : f32 to vector<8x128xf32>
    %1013 = arith.mulf %446, %1012 : vector<8x128xf32>
    %1014 = arith.addf %1011, %1013 : vector<8x128xf32>
    %1015 = vector.broadcast %232 : f32 to vector<8x128xf32>
    %1016 = arith.mulf %479, %1015 : vector<8x128xf32>
    %1017 = arith.addf %1014, %1016 : vector<8x128xf32>
    %1018 = vector.broadcast %233 : f32 to vector<8x128xf32>
    %1019 = arith.mulf %512, %1018 : vector<8x128xf32>
    %1020 = arith.addf %1017, %1019 : vector<8x128xf32>
    %1021 = vector.broadcast %234 : f32 to vector<8x128xf32>
    %1022 = arith.mulf %545, %1021 : vector<8x128xf32>
    %1023 = arith.addf %1020, %1022 : vector<8x128xf32>
    %1024 = vector.broadcast %235 : f32 to vector<8x128xf32>
    %1025 = arith.mulf %578, %1024 : vector<8x128xf32>
    %1026 = arith.addf %1023, %1025 : vector<8x128xf32>
    %1027 = vector.broadcast %236 : f32 to vector<8x128xf32>
    %1028 = arith.mulf %611, %1027 : vector<8x128xf32>
    %1029 = arith.addf %1026, %1028 : vector<8x128xf32>
    %1030 = vector.broadcast %237 : f32 to vector<8x128xf32>
    %1031 = arith.mulf %644, %1030 : vector<8x128xf32>
    %1032 = arith.addf %1029, %1031 : vector<8x128xf32>
    %1033 = vector.broadcast %238 : f32 to vector<8x128xf32>
    %1034 = arith.mulf %677, %1033 : vector<8x128xf32>
    %1035 = arith.addf %1032, %1034 : vector<8x128xf32>
    %1036 = vector.broadcast %239 : f32 to vector<8x128xf32>
    %1037 = arith.mulf %710, %1036 : vector<8x128xf32>
    %1038 = arith.addf %1035, %1037 : vector<8x128xf32>
    %cst_32 = arith.constant 0.000000e+00 : f32
    %1039 = vector.broadcast %cst_32 : f32 to vector<8x128xf32>
    %1040 = arith.maximumf %1038, %1039 : vector<8x128xf32>
    %1041 = vector.broadcast %250 : f32 to vector<8x128xf32>
    %1042 = arith.mulf %743, %1041 : vector<8x128xf32>
    %1043 = vector.broadcast %280 : f32 to vector<8x128xf32>
    %1044 = arith.addf %1042, %1043 : vector<8x128xf32>
    %1045 = vector.broadcast %251 : f32 to vector<8x128xf32>
    %1046 = arith.mulf %776, %1045 : vector<8x128xf32>
    %1047 = arith.addf %1044, %1046 : vector<8x128xf32>
    %1048 = vector.broadcast %252 : f32 to vector<8x128xf32>
    %1049 = arith.mulf %809, %1048 : vector<8x128xf32>
    %1050 = arith.addf %1047, %1049 : vector<8x128xf32>
    %1051 = vector.broadcast %253 : f32 to vector<8x128xf32>
    %1052 = arith.mulf %842, %1051 : vector<8x128xf32>
    %1053 = arith.addf %1050, %1052 : vector<8x128xf32>
    %1054 = vector.broadcast %254 : f32 to vector<8x128xf32>
    %1055 = arith.mulf %875, %1054 : vector<8x128xf32>
    %1056 = arith.addf %1053, %1055 : vector<8x128xf32>
    %1057 = vector.broadcast %255 : f32 to vector<8x128xf32>
    %1058 = arith.mulf %908, %1057 : vector<8x128xf32>
    %1059 = arith.addf %1056, %1058 : vector<8x128xf32>
    %1060 = vector.broadcast %256 : f32 to vector<8x128xf32>
    %1061 = arith.mulf %941, %1060 : vector<8x128xf32>
    %1062 = arith.addf %1059, %1061 : vector<8x128xf32>
    %1063 = vector.broadcast %257 : f32 to vector<8x128xf32>
    %1064 = arith.mulf %974, %1063 : vector<8x128xf32>
    %1065 = arith.addf %1062, %1064 : vector<8x128xf32>
    %1066 = vector.broadcast %258 : f32 to vector<8x128xf32>
    %1067 = arith.mulf %1007, %1066 : vector<8x128xf32>
    %1068 = arith.addf %1065, %1067 : vector<8x128xf32>
    %1069 = vector.broadcast %259 : f32 to vector<8x128xf32>
    %1070 = arith.mulf %1040, %1069 : vector<8x128xf32>
    %1071 = arith.addf %1068, %1070 : vector<8x128xf32>
    %1072 = vector.broadcast %260 : f32 to vector<8x128xf32>
    %1073 = arith.mulf %743, %1072 : vector<8x128xf32>
    %1074 = vector.broadcast %281 : f32 to vector<8x128xf32>
    %1075 = arith.addf %1073, %1074 : vector<8x128xf32>
    %1076 = vector.broadcast %261 : f32 to vector<8x128xf32>
    %1077 = arith.mulf %776, %1076 : vector<8x128xf32>
    %1078 = arith.addf %1075, %1077 : vector<8x128xf32>
    %1079 = vector.broadcast %262 : f32 to vector<8x128xf32>
    %1080 = arith.mulf %809, %1079 : vector<8x128xf32>
    %1081 = arith.addf %1078, %1080 : vector<8x128xf32>
    %1082 = vector.broadcast %263 : f32 to vector<8x128xf32>
    %1083 = arith.mulf %842, %1082 : vector<8x128xf32>
    %1084 = arith.addf %1081, %1083 : vector<8x128xf32>
    %1085 = vector.broadcast %264 : f32 to vector<8x128xf32>
    %1086 = arith.mulf %875, %1085 : vector<8x128xf32>
    %1087 = arith.addf %1084, %1086 : vector<8x128xf32>
    %1088 = vector.broadcast %265 : f32 to vector<8x128xf32>
    %1089 = arith.mulf %908, %1088 : vector<8x128xf32>
    %1090 = arith.addf %1087, %1089 : vector<8x128xf32>
    %1091 = vector.broadcast %266 : f32 to vector<8x128xf32>
    %1092 = arith.mulf %941, %1091 : vector<8x128xf32>
    %1093 = arith.addf %1090, %1092 : vector<8x128xf32>
    %1094 = vector.broadcast %267 : f32 to vector<8x128xf32>
    %1095 = arith.mulf %974, %1094 : vector<8x128xf32>
    %1096 = arith.addf %1093, %1095 : vector<8x128xf32>
    %1097 = vector.broadcast %268 : f32 to vector<8x128xf32>
    %1098 = arith.mulf %1007, %1097 : vector<8x128xf32>
    %1099 = arith.addf %1096, %1098 : vector<8x128xf32>
    %1100 = vector.broadcast %269 : f32 to vector<8x128xf32>
    %1101 = arith.mulf %1040, %1100 : vector<8x128xf32>
    %1102 = arith.addf %1099, %1101 : vector<8x128xf32>
    %1103 = vector.broadcast %270 : f32 to vector<8x128xf32>
    %1104 = arith.mulf %743, %1103 : vector<8x128xf32>
    %1105 = vector.broadcast %282 : f32 to vector<8x128xf32>
    %1106 = arith.addf %1104, %1105 : vector<8x128xf32>
    %1107 = vector.broadcast %271 : f32 to vector<8x128xf32>
    %1108 = arith.mulf %776, %1107 : vector<8x128xf32>
    %1109 = arith.addf %1106, %1108 : vector<8x128xf32>
    %1110 = vector.broadcast %272 : f32 to vector<8x128xf32>
    %1111 = arith.mulf %809, %1110 : vector<8x128xf32>
    %1112 = arith.addf %1109, %1111 : vector<8x128xf32>
    %1113 = vector.broadcast %273 : f32 to vector<8x128xf32>
    %1114 = arith.mulf %842, %1113 : vector<8x128xf32>
    %1115 = arith.addf %1112, %1114 : vector<8x128xf32>
    %1116 = vector.broadcast %274 : f32 to vector<8x128xf32>
    %1117 = arith.mulf %875, %1116 : vector<8x128xf32>
    %1118 = arith.addf %1115, %1117 : vector<8x128xf32>
    %1119 = vector.broadcast %275 : f32 to vector<8x128xf32>
    %1120 = arith.mulf %908, %1119 : vector<8x128xf32>
    %1121 = arith.addf %1118, %1120 : vector<8x128xf32>
    %1122 = vector.broadcast %276 : f32 to vector<8x128xf32>
    %1123 = arith.mulf %941, %1122 : vector<8x128xf32>
    %1124 = arith.addf %1121, %1123 : vector<8x128xf32>
    %1125 = vector.broadcast %277 : f32 to vector<8x128xf32>
    %1126 = arith.mulf %974, %1125 : vector<8x128xf32>
    %1127 = arith.addf %1124, %1126 : vector<8x128xf32>
    %1128 = vector.broadcast %278 : f32 to vector<8x128xf32>
    %1129 = arith.mulf %1007, %1128 : vector<8x128xf32>
    %1130 = arith.addf %1127, %1129 : vector<8x128xf32>
    %1131 = vector.broadcast %279 : f32 to vector<8x128xf32>
    %1132 = arith.mulf %1040, %1131 : vector<8x128xf32>
    %1133 = arith.addf %1130, %1132 : vector<8x128xf32>
    %c0_33 = arith.constant 0 : index
    %1134 = arith.index_cast %284 : i32 to index
    %c0_34 = arith.constant 0 : index
    %1135 = vector.load %arg3[%c0_33, %1134, %c0_34] : memref<3x8x128xf32, #tpu.memory_space<vmem>>, vector<1x8x128xf32>
    %1136 = vector.shape_cast %1135 : vector<1x8x128xf32> to vector<8x128xf32>
    %1137 = vector.shape_cast %1071 : vector<8x128xf32> to vector<1x8x128xf32>
    tpu.vector_store %arg3[%c0_33, %1134, %c0_34], %1137 {strides = array<i32>} : memref<3x8x128xf32, #tpu.memory_space<vmem>>, vector<1x8x128xf32>,
    %c1_35 = arith.constant 1 : index
    %1138 = arith.index_cast %284 : i32 to index
    %c0_36 = arith.constant 0 : index
    %1139 = vector.load %arg3[%c1_35, %1138, %c0_36] : memref<3x8x128xf32, #tpu.memory_space<vmem>>, vector<1x8x128xf32>
    %1140 = vector.shape_cast %1139 : vector<1x8x128xf32> to vector<8x128xf32>
    %1141 = vector.shape_cast %1102 : vector<8x128xf32> to vector<1x8x128xf32>
    tpu.vector_store %arg3[%c1_35, %1138, %c0_36], %1141 {strides = array<i32>} : memref<3x8x128xf32, #tpu.memory_space<vmem>>, vector<1x8x128xf32>,
    %c2_37 = arith.constant 2 : index
    %1142 = arith.index_cast %284 : i32 to index
    %c0_38 = arith.constant 0 : index
    %1143 = vector.load %arg3[%c2_37, %1142, %c0_38] : memref<3x8x128xf32, #tpu.memory_space<vmem>>, vector<1x8x128xf32>
    %1144 = vector.shape_cast %1143 : vector<1x8x128xf32> to vector<8x128xf32>
    %1145 = vector.shape_cast %1133 : vector<8x128xf32> to vector<1x8x128xf32>
    tpu.vector_store %arg3[%c2_37, %1142, %c0_38], %1145 {strides = array<i32>} : memref<3x8x128xf32, #tpu.memory_space<vmem>>, vector<1x8x128xf32>,
    %c1_i32 = arith.constant 1 : i32
    return
  }
  func.func @transform_0(%arg0: i32) -> i32 {
    %c0_i32 = arith.constant 0 : i32
    %c0_i32_0 = arith.constant 0 : i32
    return %c0_i32 : i32
  }
  func.func @transform_1(%arg0: i32) -> (i32, i32, i32) {
    %c0_i32 = arith.constant 0 : i32
    %c0_i32_0 = arith.constant 0 : i32
    %c0_i32_1 = arith.constant 0 : i32
    return %c0_i32, %arg0, %c0_i32_0 : i32, i32, i32
  }
  func.func @transform_2(%arg0: i32) -> (i32, i32, i32) {
    %c0_i32 = arith.constant 0 : i32
    %c0_i32_0 = arith.constant 0 : i32
    %c0_i32_1 = arith.constant 0 : i32
    return %c0_i32, %arg0, %c0_i32_0 : i32, i32, i32
  }
}

</mosaic_0001>

<bundles_post_ra>
// kernel: tpu_custom_call.1
= control target key start
LH: loop header
LB: loop body
LE: loop exit
PB: predicated region body
PF: predicated region fallthrough
CT: control target
= control target key end

     0   :  { %7 = vsyncpa [#allocation5], 0  ;;  %s3081_s0 = inlined_call_operand.hbm [shape: f32[283], index: 0, kind: input, shape index: {}]   ;;  %s3082_s1 = inlined_call_operand.hbm [shape: f32[2,8,128], index: 1, kind: input, shape index: {}]   ;;  %s3083_s2 = inlined_call_operand.hbm [shape: f32[3,8,128], index: 2, kind: output, shape index: {}]  }
   0x1   :  { %8 = vsyncpa [#allocation3], 0 }
   0x2   :  { %9 = vsyncpa [#allocation4], 0  ;;  %s1451_s11 = scalar_lea.hbm %s3081_s0, 48  ;;  %s1453_s16 = scalar_lea.hbm %s3081_s0, 64 }
   0x3   :  { %p1452_p0 = scmp.ne.s32.totalorder %s3081_s0, %s1451_s11  ;;  %p1454_p1 = scmp.lt.u32.totalorder %s1453_s16, %s1451_s11 }
   0x4   :  { %p1455_p2 = scmp.lt.u32.totalorder %s1451_s11, %s3081_s0 }
   0x6   :  { %p1456_p3 = por %p1455_p2, %p1454_p1 }
   0x8   :  { %p1457_p4 = pnand %p1456_p3, %p1452_p0 }
   0xa   :  { %1460 = shalt.err (!%p1457_p4)
}
   0xb   :  { %s1511_s19 = smov [#allocation2]   ;;  %s1512_s22 = smov [#allocation6]  }
   0xc   :  { %17 = dma.hbm_to_smem %s3081_s0, 48, %s1511_s19, [#allocation5]  }
   0xd   :  { %s23_s23 = sshll.u32 %s1512_s22, 4  ;;  %s1461_s26 = scalar_lea.hbm %s3082_s1, 256  ;;  %s24_s23 = int_to_ptr.vmem [resolvable:$true] %s23_s23 }
   0xe   :  { %p1462_p5 = scmp.ne.s32.totalorder %s3082_s1, %s1461_s26  ;;  %p1465_p6 = scmp.lt.u32.totalorder %s1461_s26, %s3082_s1 }
  0x10   :  { %p1467_p7 = pnand %p1465_p6, %p1462_p5 }
  0x12   :  { %1470 = shalt.err (!%p1467_p7)
}
  0x13   :  { %s1471_s3 = scalar_lea.vmem %s24_s23, 256  ;;  %p1476_p9 = scmp.lt.s32.totalorder %s24_s23, %s24_s23 }
  0x14   :  { %p1472_p8 = scmp.ne.s32.totalorder %s24_s23, %s1471_s3  ;;  %p1477_p10 = scmp.lt.s32.totalorder %s1471_s3, %s1471_s3 }
  0x16   :  { %p1478_p11 = por %p1477_p10, %p1476_p9 }
  0x18   :  { %p1479_p12 = pnand %p1478_p11, %p1472_p8 }
  0x1a   :  { %1482 = shalt.err (!%p1479_p12)
}
  0x1b   :  { %s1513_s0 = smov 128   ;;  %s1514_s4 = smov 8  }
  0x1c   :  { %29 = dma.hbm_to_vmem [thread:$0]  %s3082_s1, 256, %s24_s23, [#allocation3], %s1513_s0, %s1513_s0, %s1514_s4  }
  0x1d   :  { %1505 = dma.done.wait [#allocation5], 48  }
  0x1e   :  { %1506 = vsyncadd [#allocation5], 4294967248 }
  0x1f   :  { %1507 = dma.done.wait [#allocation3], 256  }
  0x20   :  { %1508 = vsyncadd [#allocation3], 4294967040 }
  0x21   :  { %36 = sfence }
  0x22   :  { %s37_s7 = sld [smem:[#allocation2]]  ;;  %s1164_s8 = sld [smem:[#allocation2 + $0x1]]  ;;  %v320_v0 = vld [vmem:[#allocation6] sm:$0xff]  ;;  %v1575_v1 = vld [vmem:[#allocation6 + $0x8] sm:$0xff] }
  0x23   :  { %s1165_s9 = sld [smem:[#allocation2 + $0x2]]  ;;  %s1166_s10 = sld [smem:[#allocation2 + $0x3]] }
  0x24   :  { %s1167_s11 = sld [smem:[#allocation2 + $0x4]]  ;;  %s1561_s12 = sld [smem:[#allocation2 + $0x5]] }
  0x25   :  { %s1563_s13 = sld [smem:[#allocation2 + $0x6]]  ;;  %s1565_s14 = sld [smem:[#allocation2 + $0x7]] }
  0x26   :  { %s1567_s15 = sld [smem:[#allocation2 + $0x8]]  ;;  %s1569_s16 = sld [smem:[#allocation2 + $0x9]] }
  0x27   :  { %s1571_s1 = sld [smem:[#allocation2 + $0xa]]  ;;  %s1573_s17 = sld [smem:[#allocation2 + $0xb]] }
  0x28   :  { %s1577_s18 = sld [smem:[#allocation2 + $0xc]]  ;;  %s1579_s19 = sld [smem:[#allocation2 + $0xd]]  ;;  %v324_v2 = vstv %s37_s7  ;;  %v328_v3 = vstv %s1164_s8 }
  0x29   :  { %s1581_s20 = sld [smem:[#allocation2 + $0xe]]  ;;  %s1583_s21 = sld [smem:[#allocation2 + $0xf]]  ;;  %v325_v4 = vmul.f32 %v324_v2, %v320_v0  ;;  %v332_v5 = vstv %s1165_s9  ;;  %v336_v6 = vstv %s1166_s10  ;;  %v329_v7 = vmul.f32 %v328_v3, %v1575_v1 }
  0x2a   :  { %s1585_s22 = sld [smem:[#allocation2 + $0x10]]  ;;  %s1587_s23 = sld [smem:[#allocation2 + $0x11]]  ;;  %v333_v8 = vmul.f32 %v332_v5, %v320_v0  ;;  %v340_v9 = vstv %s1167_s11  ;;  %v344_v10 = vstv %s1561_s12  ;;  %v337_v11 = vmul.f32 %v336_v6, %v1575_v1 }
  0x2b   :  { %s1591_s24 = sld [smem:[#allocation2 + $0x12]]  ;;  %s1593_s25 = sld [smem:[#allocation2 + $0x13]]  ;;  %v341_v12 = vmul.f32 %v340_v9, %v320_v0  ;;  %v348_v13 = vstv %s1563_s13  ;;  %v352_v14 = vstv %s1565_s14  ;;  %v345_v15 = vmul.f32 %v344_v10, %v1575_v1 }
  0x2c   :  { %s1598_s26 = sld [smem:[#allocation2 + $0x14]]  ;;  %s1600_s27 = sld [smem:[#allocation2 + $0x15]]  ;;  %v349_v16 = vmul.f32 %v348_v13, %v320_v0  ;;  %v356_v17 = vstv %s1567_s15  ;;  %v360_v18 = vstv %s1569_s16  ;;  %v353_v19 = vmul.f32 %v352_v14, %v1575_v1 }
  0x2d   :  { %s1605_s28 = sld [smem:[#allocation2 + $0x16]]  ;;  %s1607_s29 = sld [smem:[#allocation2 + $0x17]]  ;;  %v357_v20 = vmul.f32 %v356_v17, %v320_v0  ;;  %v364_v21 = vstv %s1571_s1  ;;  %v368_v22 = vstv %s1573_s17  ;;  %v361_v23 = vmul.f32 %v360_v18, %v1575_v1 }
  0x2e   :  { %s1612_s30 = sld [smem:[#allocation2 + $0x18]]  ;;  %s1614_s3 = sld [smem:[#allocation2 + $0x19]]  ;;  %v365_v24 = vmul.f32 %v364_v21, %v320_v0  ;;  %v372_v25 = vstv %s1577_s18  ;;  %v376_v26 = vstv %s1579_s19  ;;  %v369_v27 = vmul.f32 %v368_v22, %v1575_v1 }
  0x2f   :  { %s1619_s5 = sld [smem:[#allocation2 + $0x1a]]  ;;  %s1621_s6 = sld [smem:[#allocation2 + $0x1b]]  ;;  %v373_v28 = vmul.f32 %v372_v25, %v320_v0  ;;  %v380_v29 = vstv %s1581_s20  ;;  %v384_v30 = vstv %s1583_s21  ;;  %v377_v31 = vmul.f32 %v376_v26, %v1575_v1 }
  0x30   :  { %v381_v32 = vmul.f32 %v380_v29, %v320_v0  ;;  %v388_v33 = vstv %s1585_s22  ;;  %v392_v34 = vstv %s1587_s23  ;;  %s1629_s7 = sld [smem:[#allocation2 + $0x1c]]  ;;  %s1631_s8 = sld [smem:[#allocation2 + $0x1d]]  ;;  %v385_v35 = vmul.f32 %v384_v30, %v1575_v1 }
  0x31   :  { %v389_v36 = vmul.f32 %v388_v33, %v320_v0  ;;  %v393_v37 = vmul.f32 %v392_v34, %v1575_v1  ;;  %v396_v38 = vstv %s1591_s24  ;;  %s1636_s9 = sld [smem:[#allocation2 + $0x1e]]  ;;  %v400_v42 = vstv %s1593_s25  ;;  %s1641_s10 = sld [smem:[#allocation2 + $0x1f]] }
  0x32   :  { %v326_v39 = vstv %s1598_s26  ;;  %v334_v40 = vstv %s1600_s27  ;;  %v397_v41 = vmul.f32 %v396_v38, %v320_v0  ;;  %s1643_s11 = sld [smem:[#allocation2 + $0x20]]  ;;  %s1647_s12 = sld [smem:[#allocation2 + $0x21]]  ;;  %v401_v62 = vmul.f32 %v400_v42, %v1575_v1 }
  0x33   :  { %v327_v43 = vadd.f32 %v326_v39, %v325_v4  ;;  %v335_v44 = vadd.f32 %v334_v40, %v333_v8  ;;  %v342_v45 = vstv %s1605_s28  ;;  %v350_v46 = vstv %s1607_s29  ;;  %s1651_s13 = sld [smem:[#allocation2 + $0x22]]  ;;  %s1653_s14 = sld [smem:[#allocation2 + $0x23]] }
  0x34   :  { %v343_v47 = vadd.f32 %v342_v45, %v341_v12  ;;  %v351_v48 = vadd.f32 %v350_v46, %v349_v16  ;;  %v358_v49 = vstv %s1612_s30  ;;  %v366_v50 = vstv %s1614_s3  ;;  %s1657_s15 = sld [smem:[#allocation2 + $0x24]]  ;;  %s1659_s16 = sld [smem:[#allocation2 + $0x25]] }
  0x35   :  { %v330_v51 = vadd.f32 %v329_v7, %v327_v43  ;;  %v338_v52 = vadd.f32 %v337_v11, %v335_v44  ;;  %v359_v53 = vadd.f32 %v358_v49, %v357_v20  ;;  %v367_v54 = vadd.f32 %v366_v50, %v365_v24  ;;  %s1664_s1 = sld [smem:[#allocation2 + $0x26]]  ;;  %s1666_s17 = sld [smem:[#allocation2 + $0x27]] }
  0x36   :  { %v346_v55 = vadd.f32 %v345_v15, %v343_v47  ;;  %v354_v56 = vadd.f32 %v353_v19, %v351_v48  ;;  %v374_v57 = vstv %s1619_s5  ;;  %v382_v58 = vstv %s1621_s6  ;;  %s1672_s18 = sld [smem:[#allocation2 + $0x28]]  ;;  %s1674_s19 = sld [smem:[#allocation2 + $0x29]] }
  0x37   :  { %v1661_v59 = vmax.f32 %v330_v51, 0.0  ;;  %v362_v60 = vadd.f32 %v361_v23, %v359_v53  ;;  %v370_v61 = vadd.f32 %v369_v27, %v367_v54  ;;  %v1668_v63 = vmax.f32 %v338_v52, 0.0  ;;  %s1682_s20 = sld [smem:[#allocation2 + $0x2a]]  ;;  %s1684_s21 = sld [smem:[#allocation2 + $0x2b]] }
  0x38   :  { %v1670_v0 = vmax.f32 %v346_v55, 0.0  ;;  %v375_v2 = vadd.f32 %v374_v57, %v373_v28  ;;  %v383_v3 = vadd.f32 %v382_v58, %v381_v32  ;;  %v1676_v4 = vmax.f32 %v354_v56, 0.0  ;;  %s1686_s22 = sld [smem:[#allocation2 + $0x2c]]  ;;  %s1688_s23 = sld [smem:[#allocation2 + $0x2d]] }
  0x39   :  { %3091 = vst [vmem:[#allocation11_spill] sm:$0xff] %v1661_v59  ;;  %3092 = vst [vmem:[#allocation12_spill] sm:$0xff] %v1668_v63  ;;  %v1678_v1 = vmax.f32 %v362_v60, 0.0  ;;  %v390_v5 = vstv %s1629_s7  ;;  %v398_v6 = vstv %s1631_s8  ;;  %v1690_v11 = vmax.f32 %v370_v61, 0.0  ;;  %s1695_s24 = sld [smem:[#allocation2 + $0x2e]]  ;;  %s1697_s25 = sld [smem:[#allocation2 + $0x2f]] }
  0x3a   :  { %3093 = vst [vmem:[#allocation13_spill] sm:$0xff] %v1670_v0  ;;  %v378_v7 = vadd.f32 %v377_v31, %v375_v2  ;;  %v386_v8 = vadd.f32 %v385_v35, %v383_v3  ;;  %v391_v9 = vadd.f32 %v390_v5, %v389_v36  ;;  %v399_v10 = vadd.f32 %v398_v6, %v397_v41  ;;  %s1702_s26 = sld [smem:[#allocation2 + $0x30]]  ;;  %s1704_s27 = sld [smem:[#allocation2 + $0x31]] }
  0x3b   :  { %3094 = vst [vmem:[#allocation14_spill] sm:$0xff] %v1690_v11  ;;  %v404_v12 = vstv %s1636_s9  ;;  %v408_v13 = vstv %s1641_s10  ;;  %v411_v14 = vstv %s1643_s11  ;;  %v414_v18 = vstv %s1647_s12  ;;  %s1717_s28 = sld [smem:[#allocation2 + $0x32]]  ;;  %s1719_s29 = sld [smem:[#allocation2 + $0x33]] }
  0x3c   :  { %v1699_v15 = vmax.f32 %v378_v7, 0.0  ;;  %v394_v16 = vadd.f32 %v393_v37, %v391_v9  ;;  %v402_v17 = vadd.f32 %v401_v62, %v399_v10  ;;  %v1706_v19 = vmax.f32 %v386_v8, 0.0  ;;  %s1727_s30 = sld [smem:[#allocation2 + $0x34]]  ;;  %s1729_s3 = sld [smem:[#allocation2 + $0x35]] }
  0x3d   :  { %v1709_v20 = vmul.f32 %v404_v12, %v1661_v59  ;;  %v1712_v21 = vmul.f32 %v408_v13, %v1668_v63  ;;  %v1715_v22 = vmul.f32 %v411_v14, %v1670_v0  ;;  %v417_v25 = vstv %s1651_s13  ;;  %s1739_s5 = sld [smem:[#allocation2 + $0x36]]  ;;  %s1741_s6 = sld [smem:[#allocation2 + $0x37]] }
  0x3e   :  { %3095 = vst [vmem:[#allocation15_spill] sm:$0xff] %v1706_v19  ;;  %v1721_v23 = vmax.f32 %v394_v16, 0.0  ;;  %v1723_v24 = vmax.f32 %v402_v17, 0.0  ;;  %v420_v26 = vstv %s1653_s14  ;;  %v1732_v27 = vmul.f32 %v414_v18, %v1676_v4  ;;  %s1751_s7 = sld [smem:[#allocation2 + $0x38]]  ;;  %s1753_s8 = sld [smem:[#allocation2 + $0x39]] }
  0x3f   :  { %v1735_v28 = vmul.f32 %v417_v25, %v1678_v1  ;;  %v423_v29 = vstv %s1657_s15  ;;  %v426_v30 = vstv %s1659_s16  ;;  %v1744_v31 = vmul.f32 %v420_v26, %v1690_v11  ;;  %s1763_s9 = sld [smem:[#allocation2 + $0x3a]]  ;;  %s1765_s10 = sld [smem:[#allocation2 + $0x3b]] }
  0x40   :  { %3096 = vst [vmem:[#allocation16_spill] sm:$0xff] %v1723_v24  ;;  %v1747_v32 = vmul.f32 %v423_v29, %v1699_v15  ;;  %v429_v33 = vstv %s1664_s1  ;;  %v432_v34 = vstv %s1666_s17  ;;  %v1756_v35 = vmul.f32 %v426_v30, %v1706_v19  ;;  %s1775_s11 = sld [smem:[#allocation2 + $0x3c]]  ;;  %s1777_s12 = sld [smem:[#allocation2 + $0x3d]] }
  0x41   :  { %v1759_v36 = vmul.f32 %v429_v33, %v1721_v23  ;;  %v436_v37 = vstv %s1672_s18  ;;  %v440_v38 = vstv %s1674_s19  ;;  %v1768_v39 = vmul.f32 %v432_v34, %v1723_v24  ;;  %s1787_s13 = sld [smem:[#allocation2 + $0x3e]]  ;;  %s1789_s14 = sld [smem:[#allocation2 + $0x3f]] }
  0x42   :  { %3097 = vst [vmem:[#allocation17_spill] sm:$0xff] %v1756_v35  ;;  %v1771_v40 = vmul.f32 %v436_v37, %v1661_v59  ;;  %v443_v41 = vstv %s1682_s20  ;;  %v446_v42 = vstv %s1684_s21  ;;  %v1780_v43 = vmul.f32 %v440_v38, %v1668_v63  ;;  %s1799_s15 = sld [smem:[#allocation2 + $0x40]]  ;;  %s1801_s16 = sld [smem:[#allocation2 + $0x41]] }
  0x43   :  { %3098 = vst [vmem:[#allocation18_spill] sm:$0xff] %v1759_v36  ;;  %3099 = vst [vmem:[#allocation19_spill] sm:$0xff] %v1768_v39  ;;  %v1783_v44 = vmul.f32 %v443_v41, %v1670_v0  ;;  %v449_v45 = vstv %s1686_s22  ;;  %v452_v46 = vstv %s1688_s23  ;;  %v1792_v47 = vmul.f32 %v446_v42, %v1676_v4  ;;  %s1811_s1 = sld [smem:[#allocation2 + $0x42]]  ;;  %s1813_s17 = sld [smem:[#allocation2 + $0x43]] }
  0x44   :  { %v1795_v48 = vmul.f32 %v449_v45, %v1678_v1  ;;  %v455_v49 = vstv %s1695_s24  ;;  %v458_v50 = vstv %s1697_s25  ;;  %v1804_v51 = vmul.f32 %v452_v46, %v1690_v11  ;;  %s1823_s18 = sld [smem:[#allocation2 + $0x44]]  ;;  %s1825_s19 = sld [smem:[#allocation2 + $0x45]] }
  0x45   :  { %v1807_v52 = vmul.f32 %v455_v49, %v1699_v15  ;;  %v461_v53 = vstv %s1702_s26  ;;  %v464_v54 = vstv %s1704_s27  ;;  %v1816_v55 = vmul.f32 %v458_v50, %v1706_v19  ;;  %s1835_s20 = sld [smem:[#allocation2 + $0x46]]  ;;  %s1837_s21 = sld [smem:[#allocation2 + $0x47]] }
  0x46   :  { %v1819_v56 = vmul.f32 %v461_v53, %v1721_v23  ;;  %v468_v57 = vstv %s1717_s28  ;;  %v472_v58 = vstv %s1719_s29  ;;  %v1828_v60 = vmul.f32 %v464_v54, %v1723_v24  ;;  %s1847_s22 = sld [smem:[#allocation2 + $0x48]]  ;;  %s1849_s23 = sld [smem:[#allocation2 + $0x49]] }
  0x47   :  { %3100 = vst [vmem:[#allocation20_spill] sm:$0xff] %v1816_v55  ;;  %v1831_v61 = vmul.f32 %v468_v57, %v1661_v59  ;;  %v475_v62 = vstv %s1727_s30  ;;  %v478_v2 = vstv %s1729_s3  ;;  %v1840_v3 = vmul.f32 %v472_v58, %v1668_v63  ;;  %s1859_s24 = sld [smem:[#allocation2 + $0x4a]]  ;;  %s1861_s25 = sld [smem:[#allocation2 + $0x4b]] }
  0x48   :  { %3101 = vst [vmem:[#allocation21_spill] sm:$0xff] %v1819_v56  ;;  %3102 = vst [vmem:[#allocation22_spill] sm:$0xff] %v1828_v60  ;;  %v1843_v5 = vmul.f32 %v475_v62, %v1670_v0  ;;  %v481_v6 = vstv %s1739_s5  ;;  %v484_v7 = vstv %s1741_s6  ;;  %v1852_v8 = vmul.f32 %v478_v2, %v1676_v4  ;;  %s1871_s26 = sld [smem:[#allocation2 + $0x4c]]  ;;  %s1873_s27 = sld [smem:[#allocation2 + $0x4d]] }
  0x49   :  { %v1855_v9 = vmul.f32 %v481_v6, %v1678_v1  ;;  %v487_v10 = vstv %s1751_s7  ;;  %v490_v12 = vstv %s1753_s8  ;;  %v1864_v13 = vmul.f32 %v484_v7, %v1690_v11  ;;  %s1883_s28 = sld [smem:[#allocation2 + $0x4e]]  ;;  %s1885_s29 = sld [smem:[#allocation2 + $0x4f]] }
  0x4a   :  { %v1867_v14 = vmul.f32 %v487_v10, %v1699_v15  ;;  %v493_v16 = vstv %s1763_s9  ;;  %v496_v17 = vstv %s1765_s10  ;;  %v1876_v18 = vmul.f32 %v490_v12, %v1706_v19  ;;  %s1895_s30 = sld [smem:[#allocation2 + $0x50]]  ;;  %s1897_s3 = sld [smem:[#allocation2 + $0x51]] }
  0x4b   :  { %v1879_v25 = vmul.f32 %v493_v16, %v1721_v23  ;;  %v500_v26 = vstv %s1775_s11  ;;  %v504_v29 = vstv %s1777_s12  ;;  %v1888_v30 = vmul.f32 %v496_v17, %v1723_v24  ;;  %s1907_s5 = sld [smem:[#allocation2 + $0x52]]  ;;  %s1909_s6 = sld [smem:[#allocation2 + $0x53]] }
  0x4c   :  { %3103 = vst [vmem:[#allocation23_spill] sm:$0xff] %v1867_v14  ;;  %3104 = vst [vmem:[#allocation24_spill] sm:$0xff] %v1876_v18  ;;  %v1891_v33 = vmul.f32 %v500_v26, %v1661_v59  ;;  %v507_v34 = vstv %s1787_s13  ;;  %v510_v37 = vstv %s1789_s14  ;;  %v1900_v38 = vmul.f32 %v504_v29, %v1668_v63  ;;  %s1919_s7 = sld [smem:[#allocation2 + $0x54]]  ;;  %s1921_s8 = sld [smem:[#allocation2 + $0x55]] }
  0x4d   :  { %3105 = vst [vmem:[#allocation25_spill] sm:$0xff] %v1879_v25  ;;  %3106 = vst [vmem:[#allocation26_spill] sm:$0xff] %v1888_v30  ;;  %v1903_v41 = vmul.f32 %v507_v34, %v1670_v0  ;;  %v513_v42 = vstv %s1799_s15  ;;  %v516_v45 = vstv %s1801_s16  ;;  %v1912_v46 = vmul.f32 %v510_v37, %v1676_v4  ;;  %s1931_s9 = sld [smem:[#allocation2 + $0x56]]  ;;  %s1933_s10 = sld [smem:[#allocation2 + $0x57]] }
  0x4e   :  { %v1915_v49 = vmul.f32 %v513_v42, %v1678_v1  ;;  %v519_v50 = vstv %s1811_s1  ;;  %v522_v53 = vstv %s1813_s17  ;;  %v1924_v54 = vmul.f32 %v516_v45, %v1690_v11  ;;  %s1943_s11 = sld [smem:[#allocation2 + $0x58]]  ;;  %s1945_s12 = sld [smem:[#allocation2 + $0x59]] }
  0x4f   :  { %v1927_v57 = vmul.f32 %v519_v50, %v1699_v15  ;;  %v525_v58 = vstv %s1823_s18  ;;  %v528_v62 = vstv %s1825_s19  ;;  %v1936_v2 = vmul.f32 %v522_v53, %v1706_v19  ;;  %s1955_s13 = sld [smem:[#allocation2 + $0x5a]]  ;;  %s1957_s14 = sld [smem:[#allocation2 + $0x5b]] }
  0x50   :  { %v1939_v6 = vmul.f32 %v525_v58, %v1721_v23  ;;  %v532_v7 = vstv %s1835_s20  ;;  %v536_v10 = vstv %s1837_s21  ;;  %v1948_v12 = vmul.f32 %v528_v62, %v1723_v24  ;;  %s1967_s15 = sld [smem:[#allocation2 + $0x5c]]  ;;  %s1969_s16 = sld [smem:[#allocation2 + $0x5d]] }
  0x51   :  { %3107 = vst [vmem:[#allocation27_spill] sm:$0xff] %v1927_v57  ;;  %3108 = vst [vmem:[#allocation28_spill] sm:$0xff] %v1936_v2  ;;  %v1951_v16 = vmul.f32 %v532_v7, %v1661_v59  ;;  %v539_v17 = vstv %s1847_s22  ;;  %v542_v26 = vstv %s1849_s23  ;;  %v1960_v29 = vmul.f32 %v536_v10, %v1668_v63  ;;  %s1979_s1 = sld [smem:[#allocation2 + $0x5e]]  ;;  %s1981_s17 = sld [smem:[#allocation2 + $0x5f]] }
  0x52   :  { %3109 = vst [vmem:[#allocation29_spill] sm:$0xff] %v1939_v6  ;;  %3110 = vst [vmem:[#allocation30_spill] sm:$0xff] %v1948_v12  ;;  %v1963_v34 = vmul.f32 %v539_v17, %v1670_v0  ;;  %v545_v37 = vstv %s1859_s24  ;;  %v548_v42 = vstv %s1861_s25  ;;  %v1972_v45 = vmul.f32 %v542_v26, %v1676_v4  ;;  %s1991_s18 = sld [smem:[#allocation2 + $0x60]]  ;;  %s1993_s19 = sld [smem:[#allocation2 + $0x61]] }
  0x53   :  { %v1975_v50 = vmul.f32 %v545_v37, %v1678_v1  ;;  %v551_v53 = vstv %s1871_s26  ;;  %v554_v58 = vstv %s1873_s27  ;;  %v1984_v62 = vmul.f32 %v548_v42, %v1690_v11  ;;  %s2003_s20 = sld [smem:[#allocation2 + $0x62]]  ;;  %s2005_s21 = sld [smem:[#allocation2 + $0x63]] }
  0x54   :  { %v1987_v7 = vmul.f32 %v551_v53, %v1699_v15  ;;  %v557_v10 = vstv %s1883_s28  ;;  %v560_v17 = vstv %s1885_s29  ;;  %v1996_v26 = vmul.f32 %v554_v58, %v1706_v19  ;;  %s2015_s22 = sld [smem:[#allocation2 + $0x64]]  ;;  %s2017_s23 = sld [smem:[#allocation2 + $0x65]] }
  0x55   :  { %3111 = vst [vmem:[#allocation31_spill] sm:$0xff] %v1984_v62  ;;  %v1999_v37 = vmul.f32 %v557_v10, %v1721_v23  ;;  %v564_v12 = vstv %s1895_s30  ;;  %v568_v42 = vstv %s1897_s3  ;;  %v2008_v53 = vmul.f32 %v560_v17, %v1723_v24  ;;  %s2027_s24 = sld [smem:[#allocation2 + $0x66]]  ;;  %s2029_s25 = sld [smem:[#allocation2 + $0x67]] }
  0x56   :  { %3112 = vst [vmem:[#allocation32_spill] sm:$0xff] %v1987_v7  ;;  %3113 = vst [vmem:[#allocation33_spill] sm:$0xff] %v1996_v26  ;;  %v2011_v30 = vmul.f32 %v564_v12, %v1661_v59  ;;  %v571_v60 = vstv %s1907_s5  ;;  %v574_v58 = vstv %s1909_s6  ;;  %v2020_v10 = vmul.f32 %v568_v42, %v1668_v63  ;;  %s2039_s26 = sld [smem:[#allocation2 + $0x68]]  ;;  %s2041_s27 = sld [smem:[#allocation2 + $0x69]] }
  0x57   :  { %3114 = vst [vmem:[#allocation34_spill] sm:$0xff] %v1999_v37  ;;  %3115 = vst [vmem:[#allocation35_spill] sm:$0xff] %v2008_v53  ;;  %v2023_v37 = vmul.f32 %v571_v60, %v1670_v0  ;;  %v577_v39 = vstv %s1919_s7  ;;  %v580_v17 = vstv %s1921_s8  ;;  %v2032_v12 = vmul.f32 %v574_v58, %v1676_v4  ;;  %s2051_s28 = sld [smem:[#allocation2 + $0x6a]]  ;;  %s2053_s29 = sld [smem:[#allocation2 + $0x6b]] }
  0x58   :  { %v2035_v53 = vmul.f32 %v577_v39, %v1678_v1  ;;  %v583_v6 = vstv %s1931_s9  ;;  %v586_v42 = vstv %s1933_s10  ;;  %v2044_v60 = vmul.f32 %v580_v17, %v1690_v11  ;;  %s2063_s30 = sld [smem:[#allocation2 + $0x6c]]  ;;  %s2065_s3 = sld [smem:[#allocation2 + $0x6d]] }
  0x59   :  { %v2047_v25 = vmul.f32 %v583_v6, %v1699_v15  ;;  %v589_v26 = vstv %s1943_s11  ;;  %v592_v58 = vstv %s1945_s12  ;;  %v2056_v39 = vmul.f32 %v586_v42, %v1706_v19  ;;  %s2075_s5 = sld [smem:[#allocation2 + $0x6e]]  ;;  %s2077_s6 = sld [smem:[#allocation2 + $0x6f]] }
  0x5a   :  { %3116 = vst [vmem:[#allocation36_spill] sm:$0xff] %v2044_v60  ;;  %v2059_v56 = vmul.f32 %v589_v26, %v1721_v23  ;;  %v596_v36 = vstv %s1955_s13  ;;  %v600_v17 = vstv %s1957_s14  ;;  %v2068_v6 = vmul.f32 %v592_v58, %v1723_v24  ;;  %s2087_s7 = sld [smem:[#allocation2 + $0x70]]  ;;  %s2089_s8 = sld [smem:[#allocation2 + $0x71]] }
  0x5b   :  { %3117 = vst [vmem:[#allocation37_spill] sm:$0xff] %v2047_v25  ;;  %3118 = vst [vmem:[#allocation38_spill] sm:$0xff] %v2056_v39  ;;  %v2071_v2 = vmul.f32 %v596_v36, %v1661_v59  ;;  %v603_v18 = vstv %s1967_s15  ;;  %v606_v42 = vstv %s1969_s16  ;;  %v2080_v26 = vmul.f32 %v600_v17, %v1668_v63  ;;  %s2099_s9 = sld [smem:[#allocation2 + $0x72]]  ;;  %s2101_s10 = sld [smem:[#allocation2 + $0x73]] }
  0x5c   :  { %3119 = vst [vmem:[#allocation39_spill] sm:$0xff] %v2059_v56  ;;  %3120 = vst [vmem:[#allocation40_spill] sm:$0xff] %v2068_v6  ;;  %v2083_v56 = vmul.f32 %v603_v18, %v1670_v0  ;;  %v609_v39 = vstv %s1979_s1  ;;  %v612_v58 = vstv %s1981_s17  ;;  %v2092_v36 = vmul.f32 %v606_v42, %v1676_v4  ;;  %s2111_s11 = sld [smem:[#allocation2 + $0x74]]  ;;  %s2113_s12 = sld [smem:[#allocation2 + $0x75]] }
  0x5d   :  { %v2095_v6 = vmul.f32 %v609_v39, %v1678_v1  ;;  %v615_v25 = vstv %s1991_s18  ;;  %v618_v17 = vstv %s1993_s19  ;;  %v2104_v18 = vmul.f32 %v612_v58, %v1690_v11  ;;  %s2123_s13 = sld [smem:[#allocation2 + $0x76]]  ;;  %s2133_s14 = sld [smem:[#allocation2 + $0x77]] }
  0x5e   :  { %v2107_v7 = vmul.f32 %v615_v25, %v1699_v15  ;;  %v621_v55 = vstv %s2003_s20  ;;  %v624_v42 = vstv %s2005_s21  ;;  %v2116_v39 = vmul.f32 %v618_v17, %v1706_v19  ;;  %s2151_s15 = sld [smem:[#allocation2 + $0x82]]  ;;  %s2153_s16 = sld [smem:[#allocation2 + $0x83]] }
  0x5f   :  { %3121 = vst [vmem:[#allocation41_spill] sm:$0xff] %v2095_v6  ;;  %3122 = vst [vmem:[#allocation42_spill] sm:$0xff] %v2104_v18  ;;  %v2119_v35 = vmul.f32 %v621_v55, %v1721_v23  ;;  %v628_v58 = vstv %s2015_s22  ;;  %v632_v18 = vstv %s2017_s23  ;;  %v2126_v25 = vmul.f32 %v624_v42, %v1723_v24  ;;  %s2163_s1 = sld [smem:[#allocation2 + $0x84]]  ;;  %s2165_s17 = sld [smem:[#allocation2 + $0x85]] }
  0x60   :  { %3123 = vst [vmem:[#allocation43_spill] sm:$0xff] %v2107_v7  ;;  %3124 = vst [vmem:[#allocation44_spill] sm:$0xff] %v2116_v39  ;;  %v2129_v7 = vmul.f32 %v628_v58, %v1661_v59  ;;  %v635_v6 = vstv %s2027_s24  ;;  %v638_v17 = vstv %s2029_s25  ;;  %v2136_v55 = vmul.f32 %v632_v18, %v1668_v63  ;;  %s2175_s18 = sld [smem:[#allocation2 + $0x86]]  ;;  %s2177_s19 = sld [smem:[#allocation2 + $0x87]] }
  0x61   :  { %3125 = vst [vmem:[#allocation45_spill] sm:$0xff] %v2119_v35  ;;  %3126 = vst [vmem:[#allocation46_spill] sm:$0xff] %v2126_v25  ;;  %v2139_v35 = vmul.f32 %v635_v6, %v1670_v0  ;;  %v641_v39 = vstv %s2039_s26  ;;  %v644_v57 = vstv %s2041_s27  ;;  %v2144_v42 = vmul.f32 %v638_v17, %v1676_v4  ;;  %s2187_s20 = sld [smem:[#allocation2 + $0x88]]  ;;  %s2189_s21 = sld [smem:[#allocation2 + $0x89]] }
  0x62   :  { %v2147_v58 = vmul.f32 %v641_v39, %v1678_v1  ;;  %v647_v25 = vstv %s2051_s28  ;;  %v650_v14 = vstv %s2053_s29  ;;  %v2156_v6 = vmul.f32 %v644_v57, %v1690_v11  ;;  %s2279_s22 = sld [smem:[#allocation2 + $0x78]]  ;;  %s2281_s23 = sld [smem:[#allocation2 + $0x8a]] }
  0x63   :  { %v2159_v18 = vmul.f32 %v647_v25, %v1699_v15  ;;  %v653_v60 = vstv %s2063_s30  ;;  %v656_v17 = vstv %s2065_s3  ;;  %v2168_v39 = vmul.f32 %v650_v14, %v1706_v19  ;;  %s2287_s24 = sld [smem:[#allocation2 + $0x79]]  ;;  %s2289_s25 = sld [smem:[#allocation2 + $0x7a]] }
  0x64   :  { %3127 = vst [vmem:[#allocation47_spill] sm:$0xff] %v2147_v58  ;;  %v2171_v58 = vmul.f32 %v653_v60, %v1721_v23  ;;  %v660_v62 = vstv %s2075_s5  ;;  %v664_v57 = vstv %s2077_s6  ;;  %v2180_v25 = vmul.f32 %v656_v17, %v1723_v24  ;;  %s2295_s26 = sld [smem:[#allocation2 + $0x7b]]  ;;  %s2307_s28 = sld [smem:[#allocation2 + $0x7c]] }
  0x65   :  { %3128 = vst [vmem:[#allocation48_spill] sm:$0xff] %v2159_v18  ;;  %3129 = vst [vmem:[#allocation49_spill] sm:$0xff] %v2168_v39  ;;  %v2183_v18 = vmul.f32 %v660_v62, %v1661_v59  ;;  %v667_v14 = vstv %s2087_s7  ;;  %v670_v39 = vstv %s2089_s8  ;;  %v2192_v60 = vmul.f32 %v664_v57, %v1668_v63  ;;  %s2297_s27 = sld [smem:[#allocation2 + $0x8b]]  ;;  %s2313_s29 = sld [smem:[#allocation2 + $0x7d]] }
  0x66   :  { %3130 = vst [vmem:[#allocation50_spill] sm:$0xff] %v2171_v58  ;;  %3131 = vst [vmem:[#allocation51_spill] sm:$0xff] %v2180_v25  ;;  %v2195_v58 = vmul.f32 %v667_v14, %v1670_v0  ;;  %v673_v17 = vstv %s2099_s9  ;;  %v676_v62 = vstv %s2101_s10  ;;  %v2200_v59 = vmul.f32 %v670_v39, %v1676_v4  ;;  %s2315_s30 = sld [smem:[#allocation2 + $0x7e]]  ;;  %s2321_s3 = sld [smem:[#allocation2 + $0x7f]] }
  0x67   :  { %3132 = vst [vmem:[#allocation52_spill] sm:$0xff] %v2183_v18  ;;  %v2203_v18 = vmul.f32 %v673_v17, %v1678_v1  ;;  %v679_v25 = vstv %s2111_s11  ;;  %v682_v24 = vstv %s2113_s12  ;;  %v2208_v57 = vmul.f32 %v676_v62, %v1690_v11  ;;  %s2333_s5 = sld [smem:[#allocation2 + $0x80]]  ;;  %s2335_s6 = sld [smem:[#allocation2 + $0x81]] }
  0x68   :  { %3133 = vst [vmem:[#allocation53_spill] sm:$0xff] %v2195_v58  ;;  %3134 = vst [vmem:[#allocation54_spill] sm:$0xff] %v2200_v59  ;;  %v2211_v14 = vmul.f32 %v679_v25, %v1699_v15  ;;  %v2214_v58 = vmul.f32 %v682_v24, %v1706_v19  ;;  %v685_v0 = vstv %s2123_s13  ;;  %v406_v63 = vstv %s2151_s15  ;;  %s2342_s7 = sld [smem:[#allocation2 + $0x8c]]  ;;  %s2350_s8 = sld [smem:[#allocation2 + $0x8d]] }
  0x69   :  { %3135 = vst [vmem:[#allocation55_spill] sm:$0xff] %v2203_v18  ;;  %3136 = vst [vmem:[#allocation56_spill] sm:$0xff] %v2208_v57  ;;  %v438_v39 = vstv %s2153_s16  ;;  %v2220_v59 = vmul.f32 %v685_v0, %v1721_v23  ;;  %v407_v18 = vadd.f32 %v406_v63, %v1709_v20  ;;  %v470_v57 = vstv %s2163_s1  ;;  %s2352_s9 = sld [smem:[#allocation2 + $0x8e]]  ;;  %s2358_s10 = sld [smem:[#allocation2 + $0x8f]] }
  0x6a   :  { %3137 = vst [vmem:[#allocation57_spill] sm:$0xff] %v2211_v14  ;;  %3138 = vst [vmem:[#allocation58_spill] sm:$0xff] %v2214_v58  ;;  %v439_v62 = vadd.f32 %v438_v39, %v1771_v40  ;;  %v502_v11 = vstv %s2165_s17  ;;  %v471_v25 = vadd.f32 %v470_v57, %v1831_v61  ;;  %v534_v58 = vstv %s2175_s18  ;;  %v3143_v57 = vld [vmem:[#allocation27_spill] sm:$0xff]  ;;  %s2364_s11 = sld [smem:[#allocation2 + $0x90]]  ;;  %s2366_s12 = sld [smem:[#allocation2 + $0x91]] }
  0x6b   :  { %3139 = vst [vmem:[#allocation59_spill] sm:$0xff] %v2220_v59  ;;  %v503_v24 = vadd.f32 %v502_v11, %v1891_v33  ;;  %v566_v14 = vstv %s2177_s19  ;;  %v410_v19 = vadd.f32 %v1712_v21, %v407_v18  ;;  %v535_v59 = vadd.f32 %v534_v58, %v1951_v16  ;;  %v3142_v18 = vld [vmem:[#allocation23_spill] sm:$0xff]  ;;  %s2373_s13 = sld [smem:[#allocation2 + $0x92]]  ;;  %s2382_s15 = sld [smem:[#allocation2 + $0x94]] }
  0x6c   :  { %v442_v0 = vadd.f32 %v1780_v43, %v439_v62  ;;  %v567_v17 = vadd.f32 %v566_v14, %v2011_v30  ;;  %v474_v63 = vadd.f32 %v1840_v3, %v471_v25  ;;  %v598_v40 = vstv %s2187_s20  ;;  %v3144_v14 = vld [vmem:[#allocation41_spill] sm:$0xff]  ;;  %v3148_v62 = vld [vmem:[#allocation32_spill] sm:$0xff]  ;;  %s2388_s16 = sld [smem:[#allocation2 + $0x95]]  ;;  %s2390_s1 = sld [smem:[#allocation2 + $0x96]] }
  0x6d   :  { %v506_v20 = vadd.f32 %v1900_v38, %v503_v24  ;;  %v630_v39 = vstv %s2189_s21  ;;  %v413_v61 = vadd.f32 %v1715_v22, %v410_v19  ;;  %v538_v33 = vadd.f32 %v1960_v29, %v535_v59  ;;  %v3149_v24 = vld [vmem:[#allocation37_spill] sm:$0xff]  ;;  %s2395_s17 = sld [smem:[#allocation2 + $0x97]]  ;;  %s2397_s18 = sld [smem:[#allocation2 + $0x98]] }
  0x6e   :  { %v445_v11 = vadd.f32 %v1783_v44, %v442_v0  ;;  %v570_v21 = vadd.f32 %v2020_v10, %v567_v17  ;;  %v477_v43 = vadd.f32 %v1843_v5, %v474_v63  ;;  %v599_v30 = vadd.f32 %v598_v40, %v2071_v2  ;;  %v3145_v17 = vld [vmem:[#allocation47_spill] sm:$0xff]  ;;  %v3150_v63 = vld [vmem:[#allocation24_spill] sm:$0xff]  ;;  %s2403_s19 = sld [smem:[#allocation2 + $0x99]]  ;;  %s2410_s20 = sld [smem:[#allocation2 + $0x9a]] }
  0x6f   :  { %v509_v16 = vadd.f32 %v1903_v41, %v506_v20  ;;  %v631_v3 = vadd.f32 %v630_v39, %v2129_v7  ;;  %v416_v38 = vadd.f32 %v1732_v27, %v413_v61  ;;  %v541_v19 = vadd.f32 %v1963_v34, %v538_v33  ;;  %v3151_v40 = vld [vmem:[#allocation28_spill] sm:$0xff]  ;;  %v3152_v61 = vld [vmem:[#allocation42_spill] sm:$0xff]  ;;  %s2412_s21 = sld [smem:[#allocation2 + $0x9b]] }
  0x70   :  { %v448_v58 = vadd.f32 %v1792_v47, %v445_v11  ;;  %v573_v22 = vadd.f32 %v2023_v37, %v570_v21  ;;  %v480_v59 = vadd.f32 %v1852_v8, %v477_v43  ;;  %v602_v5 = vadd.f32 %v2080_v26, %v599_v30  ;;  %v3140_v26 = vld [vmem:[#allocation31_spill] sm:$0xff]  ;;  %v3153_v21 = vld [vmem:[#allocation18_spill] sm:$0xff] }
  0x71   :  { %v512_v44 = vadd.f32 %v1912_v46, %v509_v16  ;;  %v634_v41 = vadd.f32 %v2136_v55, %v631_v3  ;;  %v419_v2 = vadd.f32 %v1735_v28, %v416_v38  ;;  %v544_v27 = vadd.f32 %v1972_v45, %v541_v19  ;;  %v3141_v55 = vld [vmem:[#allocation36_spill] sm:$0xff]  ;;  %v3154_v16 = vld [vmem:[#allocation21_spill] sm:$0xff] }
  0x72   :  { %v451_v29 = vadd.f32 %v1795_v48, %v448_v58  ;;  %v576_v47 = vadd.f32 %v2032_v12, %v573_v22  ;;  %v483_v34 = vadd.f32 %v1855_v9, %v480_v59  ;;  %v605_v8 = vadd.f32 %v2083_v56, %v602_v5  ;;  %v3155_v3 = vld [vmem:[#allocation33_spill] sm:$0xff]  ;;  %v3156_v58 = vld [vmem:[#allocation38_spill] sm:$0xff] }
  0x73   :  { %v515_v7 = vadd.f32 %v1915_v49, %v512_v44  ;;  %v637_v46 = vadd.f32 %v2139_v35, %v634_v41  ;;  %v422_v37 = vadd.f32 %v1744_v31, %v419_v2  ;;  %v547_v28 = vadd.f32 %v1975_v50, %v544_v27  ;;  %v3157_v22 = vld [vmem:[#allocation25_spill] sm:$0xff]  ;;  %v3159_v41 = vld [vmem:[#allocation43_spill] sm:$0xff] }
  0x74   :  { %v454_v10 = vadd.f32 %v1804_v51, %v451_v29  ;;  %v579_v48 = vadd.f32 %v2035_v53, %v576_v47  ;;  %v486_v45 = vadd.f32 %v1864_v13, %v483_v34  ;;  %v608_v9 = vadd.f32 %v2092_v36, %v605_v8  ;;  %v3146_v36 = vld [vmem:[#allocation17_spill] sm:$0xff]  ;;  %v3160_v29 = vld [vmem:[#allocation48_spill] sm:$0xff]  ;;  %v3161_v27 = vld [vmem:[#allocation19_spill] sm:$0xff] }
  0x75   :  { %v518_v12 = vadd.f32 %v1924_v54, %v515_v7  ;;  %v640_v49 = vadd.f32 %v2144_v42, %v637_v46  ;;  %v425_v56 = vadd.f32 %v1747_v32, %v422_v37  ;;  %v550_v31 = vadd.f32 %v3140_v26, %v547_v28  ;;  %v3147_v42 = vld [vmem:[#allocation20_spill] sm:$0xff]  ;;  %v3158_v44 = vld [vmem:[#allocation29_spill] sm:$0xff]  ;;  %v3162_v34 = vld [vmem:[#allocation22_spill] sm:$0xff] }
  0x76   :  { %v457_v35 = vadd.f32 %v1807_v52, %v454_v10  ;;  %v582_v51 = vadd.f32 %v3141_v55, %v579_v48  ;;  %v489_v50 = vadd.f32 %v3142_v18, %v486_v45  ;;  %v611_v13 = vadd.f32 %v3144_v14, %v608_v9  ;;  %v3163_v8 = vld [vmem:[#allocation34_spill] sm:$0xff]  ;;  %v3164_v37 = vld [vmem:[#allocation39_spill] sm:$0xff]  ;;  %v3167_v9 = vld [vmem:[#allocation44_spill] sm:$0xff] }
  0x77   :  { %v521_v53 = vadd.f32 %v3143_v57, %v518_v12  ;;  %v643_v54 = vadd.f32 %v3145_v17, %v640_v49  ;;  %v428_v32 = vadd.f32 %v3146_v36, %v425_v56  ;;  %v553_v25 = vadd.f32 %v3148_v62, %v550_v31  ;;  %v3165_v28 = vld [vmem:[#allocation26_spill] sm:$0xff]  ;;  %v3168_v56 = vld [vmem:[#allocation49_spill] sm:$0xff]  ;;  %v3169_v55 = vld [vmem:[#allocation35_spill] sm:$0xff] }
  0x78   :  { %v460_v52 = vadd.f32 %v3147_v42, %v457_v35  ;;  %v585_v0 = vadd.f32 %v3149_v24, %v582_v51  ;;  %v492_v20 = vadd.f32 %v3150_v63, %v489_v50  ;;  %v614_v11 = vadd.f32 %v3152_v61, %v611_v13  ;;  %v3166_v45 = vld [vmem:[#allocation30_spill] sm:$0xff]  ;;  %v3170_v18 = vld [vmem:[#allocation16_spill] sm:$0xff]  ;;  %v3173_v17 = vld [vmem:[#allocation45_spill] sm:$0xff] }
  0x79   :  { %v524_v39 = vadd.f32 %v3151_v40, %v521_v53  ;;  %v646_v33 = vadd.f32 %v2156_v6, %v643_v54  ;;  %v431_v43 = vadd.f32 %v3153_v21, %v428_v32  ;;  %v556_v38 = vadd.f32 %v3155_v3, %v553_v25  ;;  %v3172_v14 = vld [vmem:[#allocation40_spill] sm:$0xff]  ;;  %v3174_v36 = vld [vmem:[#allocation50_spill] sm:$0xff]  ;;  %v3176_v63 = vld [vmem:[#allocation51_spill] sm:$0xff] }
  0x7a   :  { %v463_v30 = vadd.f32 %v3154_v16, %v460_v52  ;;  %v588_v19 = vadd.f32 %v3156_v58, %v585_v0  ;;  %v495_v59 = vadd.f32 %v3157_v22, %v492_v20  ;;  %v617_v2 = vadd.f32 %v3159_v41, %v614_v11  ;;  %v3175_v24 = vld [vmem:[#allocation46_spill] sm:$0xff]  ;;  %v3177_v40 = vld [vmem:[#allocation52_spill] sm:$0xff]  ;;  %v3178_v61 = vld [vmem:[#allocation11_spill] sm:$0xff] }
  0x7b   :  { %v527_v5 = vadd.f32 %v3158_v44, %v524_v39  ;;  %v649_v6 = vadd.f32 %v3160_v29, %v646_v33  ;;  %v434_v47 = vadd.f32 %v3161_v27, %v431_v43  ;;  %v559_v46 = vadd.f32 %v3163_v8, %v556_v38  ;;  %v3179_v22 = vld [vmem:[#allocation12_spill] sm:$0xff]  ;;  %v3180_v44 = vld [vmem:[#allocation13_spill] sm:$0xff] }
  0x7c   :  { %v466_v7 = vadd.f32 %v3162_v34, %v463_v30  ;;  %v591_v10 = vadd.f32 %v3164_v37, %v588_v19  ;;  %v498_v48 = vadd.f32 %v3165_v28, %v495_v59  ;;  %v620_v49 = vadd.f32 %v3167_v9, %v617_v2  ;;  %v3181_v2 = vld [vmem:[#allocation53_spill] sm:$0xff] }
  0x7d   :  { %v530_v12 = vadd.f32 %v3166_v45, %v527_v5  ;;  %v652_v35 = vadd.f32 %v3168_v56, %v649_v6  ;;  %v2323_v26 = vmax.f32 %v434_v47, 0.0  ;;  %v562_v51 = vadd.f32 %v3169_v55, %v559_v46  ;;  %v3185_v56 = vld [vmem:[#allocation55_spill] sm:$0xff] }
  0x7e   :  { %v2325_v31 = vmax.f32 %v466_v7, 0.0  ;;  %v3171_v50 = vstv %s2133_s14  ;;  %v2337_v53 = vmax.f32 %v498_v48, 0.0  ;;  %v594_v13 = vadd.f32 %v3172_v14, %v591_v10  ;;  %s2380_s14 = sld [smem:[#allocation2 + $0x93]]  ;;  %v3182_v7 = vld [vmem:[#allocation14_spill] sm:$0xff] }
  0x7f   :  { %v2331_v57 = vmul.f32 %v3171_v50, %v3170_v18  ;;  %v623_v54 = vadd.f32 %v3173_v17, %v620_v49  ;;  %v655_v32 = vadd.f32 %v3174_v36, %v652_v35  ;;  %v2344_v42 = vmax.f32 %v530_v12, 0.0  ;;  %v3186_v17 = vld [vmem:[#allocation56_spill] sm:$0xff] }
  0x80   :  { %v2346_v52 = vmax.f32 %v562_v51, 0.0  ;;  %v662_v62 = vstv %s2281_s23  ;;  %v692_v25 = vstv %s2279_s22  ;;  %v694_v33 = vstv %s2297_s27  ;;  %s2420_s22 = sld [smem:[#allocation2 + $0x9c]]  ;;  %s2429_s23 = sld [smem:[#allocation2 + $0x9d]] }
  0x81   :  { %v626_v0 = vadd.f32 %v3175_v24, %v623_v54  ;;  %v658_v20 = vadd.f32 %v3176_v63, %v655_v32  ;;  %v663_v39 = vadd.f32 %v662_v62, %v3177_v40  ;;  %v693_v11 = vmul.f32 %v692_v25, %v3178_v61  ;;  %s2450_s27 = sld [smem:[#allocation2 + $0xa1]]  ;;  %v3187_v63 = vld [vmem:[#allocation57_spill] sm:$0xff] }
  0x82   :  { %v696_v21 = vstv %s2287_s24  ;;  %v699_v43 = vstv %s2289_s25  ;;  %v702_v16 = vstv %s2295_s26  ;;  %v2368_v30 = vmax.f32 %v594_v13, 0.0  ;;  %s2431_s24 = sld [smem:[#allocation2 + $0x9e]]  ;;  %s2439_s25 = sld [smem:[#allocation2 + $0x9f]] }
  0x83   :  { %v2370_v3 = vmax.f32 %v626_v0, 0.0  ;;  %v666_v38 = vadd.f32 %v2192_v60, %v663_v39  ;;  %v695_v58 = vadd.f32 %v694_v33, %v693_v11  ;;  %v2375_v19 = vmax.f32 %v658_v20, 0.0  ;;  %s2441_s26 = sld [smem:[#allocation2 + $0xa0]] }
  0x84   :  { %v697_v59 = vmul.f32 %v696_v21, %v3179_v22  ;;  %v700_v5 = vmul.f32 %v699_v43, %v3180_v44  ;;  %v705_v41 = vstv %s2307_s28  ;;  %v703_v60 = vmul.f32 %v702_v16, %v1676_v4  ;;  %v3183_v4 = vld [vmem:[#allocation54_spill] sm:$0xff]  ;;  %s2452_s28 = sld [smem:[#allocation2 + $0xa2]] }
  0x85   :  { %v669_v29 = vadd.f32 %v3181_v2, %v666_v38  ;;  %v708_v6 = vstv %s2313_s29  ;;  %v711_v27 = vstv %s2315_s30  ;;  %v706_v34 = vmul.f32 %v705_v41, %v1678_v1  ;;  %v3184_v1 = vld [vmem:[#allocation15_spill] sm:$0xff]  ;;  %s2462_s29 = sld [smem:[#allocation2 + $0xa3]]  ;;  %s2469_s30 = sld [smem:[#allocation2 + $0xa4]]  ;;  %v3188_v16 = vld [vmem:[#allocation58_spill] sm:$0xff] }
  0x86   :  { %v698_v47 = vadd.f32 %v697_v59, %v695_v58  ;;  %v709_v8 = vmul.f32 %v708_v6, %v3182_v7  ;;  %v714_v46 = vstv %s2321_s3  ;;  %v712_v10 = vmul.f32 %v711_v27, %v1699_v15  ;;  %s2475_s3 = sld [smem:[#allocation2 + $0xa5]] }
  0x87   :  { %v672_v37 = vadd.f32 %v3183_v4, %v669_v29  ;;  %v717_v28 = vstv %s2333_s5  ;;  %v720_v48 = vstv %s2335_s6  ;;  %v715_v12 = vmul.f32 %v714_v46, %v3184_v1  ;;  %s2477_s5 = sld [smem:[#allocation2 + $0xa6]]  ;;  %s2486_s6 = sld [smem:[#allocation2 + $0xa7]]  ;;  %v3189_v29 = vld [vmem:[#allocation59_spill] sm:$0xff] }
  0x88   :  { %v701_v45 = vadd.f32 %v700_v5, %v698_v47  ;;  %v2407_v9 = vmul.f32 %v717_v28, %v1721_v23  ;;  %v724_v49 = vstv %s2342_s7  ;;  %v2416_v35 = vmul.f32 %v720_v48, %v3170_v18  ;;  %s2488_s7 = sld [smem:[#allocation2 + $0xa8]] }
  0x89   :  { %v675_v15 = vadd.f32 %v3185_v56, %v672_v37  ;;  %v728_v55 = vstv %s2350_s8  ;;  %v731_v51 = vstv %s2352_s9  ;;  %v2423_v23 = vmul.f32 %v724_v49, %v2323_v26  ;;  %s2496_s8 = sld [smem:[#allocation2 + $0xa9]]  ;;  %s2498_s9 = sld [smem:[#allocation2 + $0xaa]] }
  0x8a   :  { %v704_v50 = vadd.f32 %v703_v60, %v701_v45  ;;  %v2426_v14 = vmul.f32 %v728_v55, %v2325_v31  ;;  %v734_v13 = vstv %s2358_s10  ;;  %v2435_v54 = vmul.f32 %v731_v51, %v2337_v53  ;;  %s2507_s10 = sld [smem:[#allocation2 + $0xab]] }
  0x8b   :  { %v678_v18 = vadd.f32 %v3186_v17, %v675_v15  ;;  %v737_v36 = vstv %s2364_s11  ;;  %v740_v32 = vstv %s2366_s12  ;;  %v2444_v25 = vmul.f32 %v734_v13, %v2344_v42  ;;  %s2509_s11 = sld [smem:[#allocation2 + $0xac]]  ;;  %s2519_s12 = sld [smem:[#allocation2 + $0xad]] }
  0x8c   :  { %v707_v62 = vadd.f32 %v706_v34, %v704_v50  ;;  %v2447_v24 = vmul.f32 %v737_v36, %v2346_v52  ;;  %v743_v0 = vstv %s2373_s13  ;;  %v2456_v40 = vmul.f32 %v740_v32, %v2368_v30  ;;  %s2521_s13 = sld [smem:[#allocation2 + $0xae]] }
  0x8d   :  { %v681_v20 = vadd.f32 %v3187_v63, %v678_v18  ;;  %v2459_v39 = vmul.f32 %v743_v0, %v2370_v3  ;;  %v746_v61 = vstv %s2380_s14  ;;  %v749_v21 = vstv %s2382_s15  ;;  %s2529_s14 = sld [smem:[#allocation2 + $0xaf]]  ;;  %s2531_s15 = sld [smem:[#allocation2 + $0xb0]] }
  0x8e   :  { %v710_v11 = vadd.f32 %v709_v8, %v707_v62  ;;  %v2465_v33 = vmul.f32 %v746_v61, %v2375_v19  ;;  %v756_v43 = vstv %s2390_s1  ;;  %v752_v58 = vstv %s2388_s16  ;;  %s2538_s16 = sld [smem:[#allocation2 + $0xb1]]  ;;  %s2546_s1 = sld [smem:[#allocation2 + $0xb2]] }
  0x8f   :  { %v684_v38 = vadd.f32 %v3188_v16, %v681_v20  ;;  %v760_v22 = vstv %s2395_s17  ;;  %v763_v59 = vstv %s2397_s18  ;;  %v2480_v5 = vmul.f32 %v756_v43, %v2323_v26  ;;  %s2548_s17 = sld [smem:[#allocation2 + $0xb4]]  ;;  %s2560_s18 = sld [smem:[#allocation2 + $0xb3]] }
  0x90   :  { %v713_v44 = vadd.f32 %v712_v10, %v710_v11  ;;  %v2483_v41 = vmul.f32 %v760_v22, %v2325_v31  ;;  %v766_v2 = vstv %s2403_s19  ;;  %v2492_v6 = vmul.f32 %v763_v59, %v2337_v53  ;;  %s2569_s19 = sld [smem:[#allocation2 + $0xb5]] }
  0x91   :  { %v687_v60 = vadd.f32 %v3189_v29, %v684_v38  ;;  %v769_v27 = vstv %s2410_s20  ;;  %v772_v47 = vstv %s2412_s21  ;;  %v2501_v7 = vmul.f32 %v766_v2, %v2344_v42  ;;  %s2579_s20 = sld [smem:[#allocation2 + $0xf0]]  ;;  %s2581_s21 = sld [smem:[#allocation2 + $0xf1]] }
  0x92   :  { %v716_v34 = vadd.f32 %v715_v12, %v713_v44  ;;  %v2504_v8 = vmul.f32 %v769_v27, %v2346_v52  ;;  %v775_v46 = vstv %s2420_s22  ;;  %v2513_v37 = vmul.f32 %v772_v47, %v2368_v30  ;;  %s2595_s22 = sld [smem:[#allocation2 + $0xf2]] }
  0x93   :  { %v690_v4 = vadd.f32 %v2331_v57, %v687_v60  ;;  %v2516_v10 = vmul.f32 %v775_v46, %v2370_v3  ;;  %v778_v28 = vstv %s2429_s23  ;;  %v781_v1 = vstv %s2431_s24  ;;  %s2597_s23 = sld [smem:[#allocation2 + $0xf3]]  ;;  %s2603_s24 = sld [smem:[#allocation2 + $0xf4]] }
  0x94   :  { %v719_v48 = vadd.f32 %v2407_v9, %v716_v34  ;;  %v2525_v45 = vmul.f32 %v778_v28, %v2375_v19  ;;  %v788_v12 = vstv %s2441_s26  ;;  %v784_v49 = vstv %s2439_s25  ;;  %s2613_s25 = sld [smem:[#allocation2 + $0xb6]]  ;;  %s2615_s26 = sld [smem:[#allocation2 + $0xb7]] }
  0x95   :  { %v2533_v57 = vmax.f32 %v690_v4, 0.0  ;;  %v792_v56 = vstv %s2450_s27  ;;  %v795_v15 = vstv %s2452_s28  ;;  %v789_v55 = vmul.f32 %v788_v12, %v2323_v26  ;;  %s2627_s27 = sld [smem:[#allocation2 + $0xb8]]  ;;  %s2641_s28 = sld [smem:[#allocation2 + $0xb9]] }
  0x96   :  { %v722_v9 = vadd.f32 %v2416_v35, %v719_v48  ;;  %v2543_v51 = vmul.f32 %v792_v56, %v2325_v31  ;;  %v798_v50 = vstv %s2462_s29  ;;  %v2557_v35 = vmul.f32 %v795_v15, %v2337_v53  ;;  %s2643_s29 = sld [smem:[#allocation2 + $0xba]] }
  0x97   :  { %v2551_v13 = vmul.f32 %v749_v21, %v2533_v57  ;;  %v2554_v17 = vmul.f32 %v781_v1, %v2533_v57  ;;  %v801_v18 = vstv %s2469_s30  ;;  %v2565_v32 = vmul.f32 %v798_v50, %v2344_v42  ;;  %s2653_s30 = sld [smem:[#allocation2 + $0xbb]] }
  0x98   :  { %v2562_v36 = vmax.f32 %v722_v9, 0.0  ;;  %v804_v62 = vstv %s2475_s3  ;;  %v807_v0 = vstv %s2477_s5  ;;  %v2572_v63 = vmul.f32 %v801_v18, %v2346_v52  ;;  %s2661_s3 = sld [smem:[#allocation2 + $0xbc]]  ;;  %s2667_s5 = sld [smem:[#allocation2 + $0xbd]] }
  0x99   :  { %v2575_v20 = vmul.f32 %v804_v62, %v2368_v30  ;;  %v810_v61 = vstv %s2486_s6  ;;  %v813_v11 = vstv %s2488_s7  ;;  %v2590_v16 = vmul.f32 %v807_v0, %v2370_v3  ;;  %s2671_s6 = sld [smem:[#allocation2 + $0xbe]]  ;;  %s2679_s7 = sld [smem:[#allocation2 + $0xbf]] }
  0x9a   :  { %v2584_v21 = vmul.f32 %v752_v58, %v2562_v36  ;;  %v2587_v43 = vmul.f32 %v784_v49, %v2562_v36  ;;  %v2593_v38 = vmul.f32 %v810_v61, %v2375_v19  ;;  %v816_v22 = vstv %s2496_s8  ;;  %s2681_s8 = sld [smem:[#allocation2 + $0xf5]] }
  0x9b   :  { %v820_v58 = vstv %s2498_s9  ;;  %v824_v59 = vstv %s2507_s10  ;;  %v827_v44 = vstv %s2509_s11  ;;  %v2606_v2 = vmul.f32 %v813_v11, %v2533_v57  ;;  %s2689_s9 = sld [smem:[#allocation2 + $0xc0]]  ;;  %s2698_s10 = sld [smem:[#allocation2 + $0xc1]] }
  0x9c   :  { %v2609_v29 = vmul.f32 %v816_v22, %v2562_v36  ;;  %v821_v60 = vmul.f32 %v820_v58, %v2323_v26  ;;  %v825_v27 = vmul.f32 %v824_v59, %v2325_v31  ;;  %v830_v47 = vstv %s2519_s12  ;;  %s2704_s11 = sld [smem:[#allocation2 + $0xc2]]  ;;  %s2709_s12 = sld [smem:[#allocation2 + $0xc3]] }
  0x9d   :  { %v833_v34 = vstv %s2521_s13  ;;  %v836_v46 = vstv %s2529_s14  ;;  %v839_v4 = vstv %s2531_s15  ;;  %v828_v28 = vmul.f32 %v827_v44, %v2337_v53  ;;  %s2711_s13 = sld [smem:[#allocation2 + $0xc4]]  ;;  %s2717_s14 = sld [smem:[#allocation2 + $0xc5]] }
  0x9e   :  { %v831_v48 = vmul.f32 %v830_v47, %v2344_v42  ;;  %v834_v1 = vmul.f32 %v833_v34, %v2346_v52  ;;  %v2625_v12 = vmul.f32 %v836_v46, %v2368_v30  ;;  %v2630_v49 = vmul.f32 %v839_v4, %v2370_v3  ;;  %s2722_s15 = sld [smem:[#allocation2 + $0xc6]] }
  0x9f   :  { %v842_v56 = vstv %s2538_s16  ;;  %v845_v15 = vstv %s2546_s1  ;;  %v852_v9 = vstv %s2548_s17  ;;  %v726_v50 = vstv %s2579_s20  ;;  %s2724_s16 = sld [smem:[#allocation2 + $0xc7]]  ;;  %s2730_s1 = sld [smem:[#allocation2 + $0xc8]] }
  0xa0   :  { %v758_v18 = vstv %s2581_s21  ;;  %v2638_v62 = vmul.f32 %v842_v56, %v2375_v19  ;;  %v848_v0 = vstv %s2560_s18  ;;  %v727_v61 = vadd.f32 %v726_v50, %v2423_v23  ;;  %s2732_s17 = sld [smem:[#allocation2 + $0xc9]]  ;;  %s2736_s18 = sld [smem:[#allocation2 + $0xca]] }
  0xa1   :  { %v759_v11 = vadd.f32 %v758_v18, %v2480_v5  ;;  %v790_v22 = vstv %s2595_s22  ;;  %v822_v58 = vstv %s2597_s23  ;;  %v2650_v47 = vmul.f32 %v845_v15, %v2533_v57  ;;  %s2743_s20 = sld [smem:[#allocation2 + $0xcb]]  ;;  %s2745_s21 = sld [smem:[#allocation2 + $0xcc]] }
  0xa2   :  { %v791_v59 = vadd.f32 %v790_v22, %v789_v55  ;;  %v823_v44 = vadd.f32 %v822_v58, %v821_v60  ;;  %v853_v34 = vmul.f32 %v852_v9, %v2323_v26  ;;  %v730_v46 = vadd.f32 %v2426_v14, %v727_v61  ;;  %s2752_s22 = sld [smem:[#allocation2 + $0xcd]]  ;;  %s2754_s23 = sld [smem:[#allocation2 + $0xce]] }
  0xa3   :  { %v762_v4 = vadd.f32 %v2483_v41, %v759_v11  ;;  %v854_v23 = vstv %s2603_s24  ;;  %v856_v56 = vstv %s2569_s19  ;;  %v859_v18 = vstv %s2613_s25  ;;  %s2738_s19 = sld [smem:[#allocation2 + $0xf6]]  ;;  %s2759_s24 = sld [smem:[#allocation2 + $0xcf]] }
  0xa4   :  { %v794_v5 = vadd.f32 %v2543_v51, %v791_v59  ;;  %v826_v50 = vadd.f32 %v825_v27, %v823_v44  ;;  %v855_v55 = vadd.f32 %v854_v23, %v853_v34  ;;  %v857_v60 = vmul.f32 %v856_v56, %v2325_v31  ;;  %s2761_s25 = sld [smem:[#allocation2 + $0xd0]] }
  0xa5   :  { %v733_v15 = vadd.f32 %v2435_v54, %v730_v46  ;;  %v765_v9 = vadd.f32 %v2492_v6, %v762_v4  ;;  %v862_v22 = vstv %s2615_s26  ;;  %v860_v27 = vmul.f32 %v859_v18, %v2337_v53  ;;  %s2766_s26 = sld [smem:[#allocation2 + $0xd2]] }
  0xa6   :  { %v797_v14 = vadd.f32 %v2557_v35, %v794_v5  ;;  %v829_v41 = vadd.f32 %v828_v28, %v826_v50  ;;  %v858_v51 = vadd.f32 %v857_v60, %v855_v55  ;;  %v863_v6 = vmul.f32 %v862_v22, %v2344_v42 }
  0xa7   :  { %v736_v61 = vadd.f32 %v2444_v25, %v733_v15  ;;  %v768_v54 = vadd.f32 %v2501_v7, %v765_v9  ;;  %v865_v11 = vstv %s2627_s27  ;;  %v868_v34 = vstv %s2641_s28  ;;  %s2775_s27 = sld [smem:[#allocation2 + $0xd1]]  ;;  %s2777_s28 = sld [smem:[#allocation2 + $0xd3]] }
  0xa8   :  { %v800_v58 = vadd.f32 %v2565_v32, %v797_v14  ;;  %v832_v59 = vadd.f32 %v831_v48, %v829_v41  ;;  %v861_v44 = vadd.f32 %v860_v27, %v858_v51  ;;  %v866_v35 = vmul.f32 %v865_v11, %v2346_v52 }
  0xa9   :  { %v739_v28 = vadd.f32 %v2447_v24, %v736_v61  ;;  %v771_v25 = vadd.f32 %v2504_v8, %v768_v54  ;;  %v871_v7 = vstv %s2643_s29  ;;  %v869_v48 = vmul.f32 %v868_v34, %v2368_v30  ;;  %s2781_s29 = sld [smem:[#allocation2 + $0xd4]] }
  0xaa   :  { %v803_v46 = vadd.f32 %v2572_v63, %v800_v58  ;;  %v835_v4 = vadd.f32 %v834_v1, %v832_v59  ;;  %v864_v32 = vadd.f32 %v863_v6, %v861_v44  ;;  %v849_v24 = vmul.f32 %v848_v0, %v2562_v36 }
  0xab   :  { %v742_v23 = vadd.f32 %v2456_v40, %v739_v28  ;;  %v774_v56 = vadd.f32 %v2513_v37, %v771_v25  ;;  %v874_v5 = vstv %s2653_s30  ;;  %v872_v1 = vmul.f32 %v871_v7, %v2370_v3  ;;  %s2783_s30 = sld [smem:[#allocation2 + $0xf7]] }
  0xac   :  { %v806_v8 = vadd.f32 %v2575_v20, %v803_v46  ;;  %v838_v50 = vadd.f32 %v2625_v12, %v835_v4  ;;  %v867_v63 = vadd.f32 %v866_v35, %v864_v32  ;;  %v875_v37 = vmul.f32 %v874_v5, %v2375_v19 }
  0xad   :  { %v745_v55 = vadd.f32 %v2459_v39, %v742_v23  ;;  %v777_v40 = vadd.f32 %v2516_v10, %v774_v56  ;;  %v877_v60 = vstv %s2661_s3  ;;  %v880_v15 = vstv %s2667_s5  ;;  %s2789_s3 = sld [smem:[#allocation2 + $0xd5]]  ;;  %s2794_s5 = sld [smem:[#allocation2 + $0xd6]] }
  0xae   :  { %v809_v0 = vadd.f32 %v2590_v16, %v806_v8  ;;  %v841_v20 = vadd.f32 %v2630_v49, %v838_v50  ;;  %v870_v12 = vadd.f32 %v869_v48, %v867_v63  ;;  %v878_v9 = vmul.f32 %v877_v60, %v2533_v57 }
  0xaf   :  { %v748_v39 = vadd.f32 %v2465_v33, %v745_v55  ;;  %v780_v10 = vadd.f32 %v2525_v45, %v777_v40  ;;  %v884_v18 = vstv %s2671_s6  ;;  %v886_v41 = vstv %s2681_s8  ;;  %s2796_s6 = sld [smem:[#allocation2 + $0xd7]]  ;;  %s2813_s8 = sld [smem:[#allocation2 + $0xd9]] }
  0xb0   :  { %v812_v16 = vadd.f32 %v2593_v38, %v809_v0  ;;  %v844_v49 = vadd.f32 %v2638_v62, %v841_v20  ;;  %v873_v22 = vadd.f32 %v872_v1, %v870_v12  ;;  %v885_v14 = vmul.f32 %v884_v18, %v2323_v26 }
  0xb1   :  { %v751_v33 = vadd.f32 %v2551_v13, %v748_v39  ;;  %v783_v45 = vadd.f32 %v2554_v17, %v780_v10  ;;  %v888_v51 = vstv %s2679_s7  ;;  %v891_v54 = vstv %s2689_s9  ;;  %s2804_s7 = sld [smem:[#allocation2 + $0xd8]]  ;;  %s2815_s9 = sld [smem:[#allocation2 + $0xdc]] }
  0xb2   :  { %v815_v38 = vadd.f32 %v2606_v2, %v812_v16  ;;  %v847_v62 = vadd.f32 %v2650_v47, %v844_v49  ;;  %v876_v27 = vadd.f32 %v875_v37, %v873_v22  ;;  %v887_v61 = vadd.f32 %v886_v41, %v885_v14 }
  0xb3   :  { %v754_v13 = vadd.f32 %v2584_v21, %v751_v33  ;;  %v889_v17 = vmul.f32 %v888_v51, %v2325_v31  ;;  %v786_v2 = vadd.f32 %v2587_v43, %v783_v45  ;;  %v892_v11 = vmul.f32 %v891_v54, %v2337_v53 }
  0xb4   :  { %v818_v47 = vadd.f32 %v2609_v29, %v815_v38  ;;  %v850_v6 = vadd.f32 %v849_v24, %v847_v62  ;;  %v879_v58 = vadd.f32 %v878_v9, %v876_v27  ;;  %v881_v21 = vmul.f32 %v880_v15, %v2562_v36 }
  0xb5   :  { %v890_v59 = vadd.f32 %v889_v17, %v887_v61  ;;  %v894_v44 = vstv %s2698_s10  ;;  %v2756_v35 = vmax.f32 %v754_v13, 0.0  ;;  %v897_v28 = vstv %s2704_s11  ;;  %s2821_s10 = sld [smem:[#allocation2 + $0xda]]  ;;  %s2823_s11 = sld [smem:[#allocation2 + $0xdd]] }
  0xb6   :  { %v895_v43 = vmul.f32 %v894_v44, %v2344_v42  ;;  %v900_v25 = vstv %s2709_s12  ;;  %v903_v34 = vstv %s2711_s13  ;;  %v2768_v7 = vmax.f32 %v786_v2, 0.0  ;;  %s2827_s12 = sld [smem:[#allocation2 + $0xde]]  ;;  %s2829_s13 = sld [smem:[#allocation2 + $0xf8]] }
  0xb7   :  { %v893_v29 = vadd.f32 %v892_v11, %v890_v59  ;;  %v2770_v46 = vmax.f32 %v818_v47, 0.0  ;;  %v2772_v4 = vmax.f32 %v850_v6, 0.0  ;;  %v898_v32 = vmul.f32 %v897_v28, %v2346_v52 }
  0xb8   :  { %v882_v48 = vadd.f32 %v881_v21, %v879_v58  ;;  %v901_v56 = vmul.f32 %v900_v25, %v2368_v30  ;;  %v904_v24 = vmul.f32 %v903_v34, %v2370_v3  ;;  %v906_v5 = vstv %s2717_s14  ;;  %s2835_s14 = sld [smem:[#allocation2 + $0xdb]] }
  0xb9   :  { %v896_v23 = vadd.f32 %v895_v43, %v893_v29  ;;  %v909_v8 = vstv %s2722_s15  ;;  %v912_v50 = vstv %s2724_s16  ;;  %v916_v63 = vstv %s2730_s1  ;;  %s2839_s15 = sld [smem:[#allocation2 + $0xdf]]  ;;  %s2841_s16 = sld [smem:[#allocation2 + $0xe0]] }
  0xba   :  { %v917_v55 = vmul.f32 %v916_v63, %v2323_v26  ;;  %v918_v40 = vstv %s2738_s19  ;;  %v920_v37 = vstv %s2732_s17  ;;  %v923_v0 = vstv %s2736_s18  ;;  %s2846_s1 = sld [smem:[#allocation2 + $0xe1]]  ;;  %s2850_s17 = sld [smem:[#allocation2 + $0xe2]] }
  0xbb   :  { %v899_v1 = vadd.f32 %v898_v32, %v896_v23  ;;  %v921_v60 = vmul.f32 %v920_v37, %v2325_v31  ;;  %v926_v20 = vstv %s2743_s20  ;;  %v929_v12 = vstv %s2745_s21  ;;  %s2852_s18 = sld [smem:[#allocation2 + $0xe3]]  ;;  %s2860_s19 = sld [smem:[#allocation2 + $0xe6]] }
  0xbc   :  { %v907_v39 = vmul.f32 %v906_v5, %v2375_v19  ;;  %v919_v10 = vadd.f32 %v918_v40, %v917_v55  ;;  %v924_v9 = vmul.f32 %v923_v0, %v2337_v53  ;;  %v2806_v18 = vmax.f32 %v882_v48, 0.0  ;;  %s2866_s20 = sld [smem:[#allocation2 + $0xe4]]  ;;  %s2871_s21 = sld [smem:[#allocation2 + $0xe7]] }
  0xbd   :  { %v902_v15 = vadd.f32 %v901_v56, %v899_v1  ;;  %v910_v16 = vmul.f32 %v909_v8, %v2533_v57  ;;  %v913_v49 = vmul.f32 %v912_v50, %v2562_v36  ;;  %v932_v22 = vstv %s2752_s22  ;;  %s2873_s22 = sld [smem:[#allocation2 + $0xf9]] }
  0xbe   :  { %v922_v33 = vadd.f32 %v921_v60, %v919_v10  ;;  %v927_v45 = vmul.f32 %v926_v20, %v2344_v42  ;;  %v930_v41 = vmul.f32 %v929_v12, %v2346_v52  ;;  %v933_v51 = vmul.f32 %v932_v22, %v2368_v30 }
  0xbf   :  { %v905_v14 = vadd.f32 %v904_v24, %v902_v15  ;;  %v935_v38 = vstv %s2754_s23  ;;  %v938_v62 = vstv %s2759_s24  ;;  %v948_v27 = vstv %s2766_s26  ;;  %s2878_s23 = sld [smem:[#allocation2 + $0xe8]]  ;;  %s2880_s24 = sld [smem:[#allocation2 + $0xe9]] }
  0xc0   :  { %v925_v13 = vadd.f32 %v924_v9, %v922_v33  ;;  %v941_v17 = vstv %s2761_s25  ;;  %v944_v54 = vstv %s2775_s27  ;;  %v949_v2 = vmul.f32 %v948_v27, %v2323_v26  ;;  %s2884_s25 = sld [smem:[#allocation2 + $0xe5]]  ;;  %s2886_s26 = sld [smem:[#allocation2 + $0xea]] }
  0xc1   :  { %v908_v61 = vadd.f32 %v907_v39, %v905_v14  ;;  %v950_v47 = vstv %s2783_s30  ;;  %v952_v6 = vstv %s2777_s28  ;;  %v955_v11 = vstv %s2781_s29  ;;  %s2891_s27 = sld [smem:[#allocation2 + $0xeb]]  ;;  %s2893_s28 = sld [smem:[#allocation2 + $0xec]] }
  0xc2   :  { %v928_v21 = vadd.f32 %v927_v45, %v925_v13  ;;  %v953_v59 = vmul.f32 %v952_v6, %v2325_v31  ;;  %v956_v44 = vmul.f32 %v955_v11, %v2337_v53  ;;  %v951_v43 = vadd.f32 %v950_v47, %v949_v2  ;;  %s2903_s29 = sld [smem:[#allocation2 + $0xed]]  ;;  %s2905_s30 = sld [smem:[#allocation2 + $0xee]] }
  0xc3   :  { %v911_v58 = vadd.f32 %v910_v16, %v908_v61  ;;  %v958_v29 = vstv %s2789_s3  ;;  %v961_v28 = vstv %s2794_s5  ;;  %v964_v25 = vstv %s2796_s6  ;;  %s2909_s3 = sld [smem:[#allocation2 + $0xfa]]  ;;  %s2911_s5 = sld [smem:[#allocation2 + $0x118]] }
  0xc4   :  { %v931_v32 = vadd.f32 %v930_v41, %v928_v21  ;;  %v936_v48 = vmul.f32 %v935_v38, %v2370_v3  ;;  %v939_v23 = vmul.f32 %v938_v62, %v2375_v19  ;;  %v942_v56 = vmul.f32 %v941_v17, %v2533_v57  ;;  %s2916_s6 = sld [smem:[#allocation2 + $0xfb]] }
  0xc5   :  { %v914_v34 = vadd.f32 %v913_v49, %v911_v58  ;;  %v954_v24 = vadd.f32 %v953_v59, %v951_v43  ;;  %v959_v5 = vmul.f32 %v958_v29, %v2344_v42  ;;  %v967_v8 = vstv %s2804_s7  ;;  %s2921_s7 = sld [smem:[#allocation2 + $0xfc]] }
  0xc6   :  { %v934_v50 = vadd.f32 %v933_v51, %v931_v32  ;;  %v945_v63 = vmul.f32 %v944_v54, %v2562_v36  ;;  %v962_v1 = vmul.f32 %v961_v28, %v2346_v52  ;;  %v965_v55 = vmul.f32 %v964_v25, %v2368_v30 }
  0xc7   :  { %v2862_v40 = vmax.f32 %v914_v34, 0.0  ;;  %v957_v37 = vadd.f32 %v956_v44, %v954_v24  ;;  %v970_v60 = vstv %s2813_s8  ;;  %v980_v0 = vstv %s2815_s9  ;;  %s2923_s8 = sld [smem:[#allocation2 + $0xfd]]  ;;  %s2928_s9 = sld [smem:[#allocation2 + $0xef]] }
  0xc8   :  { %v937_v20 = vadd.f32 %v936_v48, %v934_v50  ;;  %v968_v12 = vmul.f32 %v967_v8, %v2370_v3  ;;  %v973_v15 = vstv %s2821_s10  ;;  %v981_v39 = vmul.f32 %v980_v0, %v2323_v26  ;;  %s2930_s10 = sld [smem:[#allocation2 + $0xfe]] }
  0xc9   :  { %v960_v10 = vadd.f32 %v959_v5, %v957_v37  ;;  %v982_v9 = vstv %s2829_s13  ;;  %v984_v16 = vstv %s2823_s11  ;;  %v987_v49 = vstv %s2827_s12  ;;  %s2934_s11 = sld [smem:[#allocation2 + $0xff]]  ;;  %s2936_s12 = sld [smem:[#allocation2 + $0x100]] }
  0xca   :  { %v940_v22 = vadd.f32 %v939_v23, %v937_v20  ;;  %v983_v14 = vadd.f32 %v982_v9, %v981_v39  ;;  %v985_v33 = vmul.f32 %v984_v16, %v2325_v31  ;;  %v988_v45 = vmul.f32 %v987_v49, %v2337_v53  ;;  %s2947_s13 = sld [smem:[#allocation2 + $0x101]] }
  0xcb   :  { %v963_v41 = vadd.f32 %v962_v1, %v960_v10  ;;  %v976_v51 = vstv %s2835_s14  ;;  %v990_v38 = vstv %s2839_s15  ;;  %v993_v62 = vstv %s2841_s16  ;;  %s2949_s14 = sld [smem:[#allocation2 + $0x104]]  ;;  %s2954_s15 = sld [smem:[#allocation2 + $0x105]] }
  0xcc   :  { %v943_v27 = vadd.f32 %v942_v56, %v940_v22  ;;  %v986_v61 = vadd.f32 %v985_v33, %v983_v14  ;;  %v991_v13 = vmul.f32 %v990_v38, %v2344_v42  ;;  %v996_v17 = vstv %s2846_s1  ;;  %s2956_s16 = sld [smem:[#allocation2 + $0x119]]  ;;  %s2961_s1 = sld [smem:[#allocation2 + $0x102]] }
  0xcd   :  { %v966_v54 = vadd.f32 %v965_v55, %v963_v41  ;;  %v971_v2 = vmul.f32 %v970_v60, %v2375_v19  ;;  %v999_v47 = vstv %s2850_s17  ;;  %v1002_v6 = vstv %s2852_s18  ;;  %s2963_s17 = sld [smem:[#allocation2 + $0x106]]  ;;  %s2969_s18 = sld [smem:[#allocation2 + $0x107]] }
  0xce   :  { %v974_v11 = vmul.f32 %v973_v15, %v2533_v57  ;;  %v977_v58 = vmul.f32 %v976_v51, %v2562_v36  ;;  %v989_v21 = vadd.f32 %v988_v45, %v986_v61  ;;  %v994_v59 = vmul.f32 %v993_v62, %v2346_v52 }
  0xcf   :  { %v946_v44 = vadd.f32 %v945_v63, %v943_v27  ;;  %v969_v43 = vadd.f32 %v968_v12, %v966_v54  ;;  %v997_v29 = vmul.f32 %v996_v17, %v2368_v30  ;;  %v1012_v28 = vstv %s2860_s19  ;;  %s2971_s19 = sld [smem:[#allocation2 + $0x108]] }
  0xd0   :  { %v992_v25 = vadd.f32 %v991_v13, %v989_v21  ;;  %v1000_v34 = vmul.f32 %v999_v47, %v2370_v3  ;;  %v1003_v32 = vmul.f32 %v1002_v6, %v2375_v19  ;;  %v1005_v48 = vstv %s2866_s20  ;;  %s2978_s20 = sld [smem:[#allocation2 + $0x109]] }
  0xd1   :  { %v972_v23 = vadd.f32 %v971_v2, %v969_v43  ;;  %v1013_v56 = vmul.f32 %v1012_v28, %v2323_v26  ;;  %v1014_v24 = vstv %s2873_s22  ;;  %v1016_v5 = vstv %s2871_s21  ;;  %s2985_s21 = sld [smem:[#allocation2 + $0x103]]  ;;  %s2987_s22 = sld [smem:[#allocation2 + $0x10e]] }
  0xd2   :  { %v995_v8 = vadd.f32 %v994_v59, %v992_v25  ;;  %v1017_v50 = vmul.f32 %v1016_v5, %v2325_v31  ;;  %v1019_v63 = vstv %s2878_s23  ;;  %v1022_v1 = vstv %s2880_s24  ;;  %s2993_s23 = sld [smem:[#allocation2 + $0x10a]]  ;;  %s2998_s24 = sld [smem:[#allocation2 + $0x10f]] }
  0xd3   :  { %v975_v55 = vadd.f32 %v974_v11, %v972_v23  ;;  %v1008_v26 = vstv %s2884_s25  ;;  %v1015_v37 = vadd.f32 %v1014_v24, %v1013_v56  ;;  %v1020_v60 = vmul.f32 %v1019_v63, %v2337_v53  ;;  %s3000_s25 = sld [smem:[#allocation2 + $0x11a]] }
  0xd4   :  { %v998_v0 = vadd.f32 %v997_v29, %v995_v8  ;;  %v1025_v20 = vstv %s2886_s26  ;;  %v1028_v12 = vstv %s2891_s27  ;;  %v1031_v31 = vstv %s2893_s28  ;;  %s3006_s26 = sld [smem:[#allocation2 + $0x10b]]  ;;  %s3010_s27 = sld [smem:[#allocation2 + $0x110]] }
  0xd5   :  { %v2941_v15 = vmax.f32 %v946_v44, 0.0  ;;  %v978_v39 = vadd.f32 %v977_v58, %v975_v55  ;;  %v1018_v10 = vadd.f32 %v1017_v50, %v1015_v37  ;;  %v1023_v9 = vmul.f32 %v1022_v1, %v2344_v42  ;;  %s3012_s28 = sld [smem:[#allocation2 + $0x111]] }
  0xd6   :  { %v1001_v16 = vadd.f32 %v1000_v34, %v998_v0  ;;  %v1006_v53 = vmul.f32 %v1005_v48, %v2533_v57  ;;  %v1009_v49 = vmul.f32 %v1008_v26, %v2562_v36  ;;  %v1026_v22 = vmul.f32 %v1025_v20, %v2346_v52 }
  0xd7   :  { %v1021_v14 = vadd.f32 %v1020_v60, %v1018_v10  ;;  %v1029_v33 = vmul.f32 %v1028_v12, %v2368_v30  ;;  %v1032_v45 = vmul.f32 %v1031_v31, %v2370_v3  ;;  %v1034_v41 = vstv %s2903_s29  ;;  %s3019_s29 = sld [smem:[#allocation2 + $0x10c]] }
  0xd8   :  { %v1004_v42 = vadd.f32 %v1003_v32, %v1001_v16  ;;  %v1037_v51 = vstv %s2905_s30  ;;  %v1044_v52 = vstv %s2909_s3  ;;  %v1046_v38 = vstv %s2911_s5  ;;  %s3021_s30 = sld [smem:[#allocation2 + $0x112]]  ;;  %s3025_s3 = sld [smem:[#allocation2 + $0x113]] }
  0xd9   :  { %v2965_v62 = vmax.f32 %v978_v39, 0.0  ;;  %v1024_v30 = vadd.f32 %v1023_v9, %v1021_v14  ;;  %v1045_v3 = vmul.f32 %v1044_v52, %v2756_v35  ;;  %v1048_v27 = vstv %s2916_s6  ;;  %s3028_s5 = sld [smem:[#allocation2 + $0x10d]]  ;;  %s3034_s6 = sld [smem:[#allocation2 + $0x114]] }
  0xda   :  { %v1007_v61 = vadd.f32 %v1006_v53, %v1004_v42  ;;  %v1049_v13 = vmul.f32 %v1048_v27, %v2768_v7  ;;  %v1051_v17 = vstv %s2921_s7  ;;  %v1054_v54 = vstv %s2923_s8  ;;  %s3041_s7 = sld [smem:[#allocation2 + $0x115]]  ;;  %s3047_s8 = sld [smem:[#allocation2 + $0x116]] }
  0xdb   :  { %v1027_v2 = vadd.f32 %v1026_v22, %v1024_v30  ;;  %v1040_v47 = vstv %s2928_s9  ;;  %v1047_v6 = vadd.f32 %v1046_v38, %v1045_v3  ;;  %v1052_v11 = vmul.f32 %v1051_v17, %v2770_v46  ;;  %s1442_s9 = sld [smem:[#allocation2 + $0x117]] }
  0xdc   :  { %v1010_v58 = vadd.f32 %v1009_v49, %v1007_v61  ;;  %v1057_v21 = vstv %s2930_s10  ;;  %v1060_v59 = vstv %s2934_s11  ;;  %v1063_v44 = vstv %s2936_s12  ;;  %s1515_s10 = smov [#allocation7]  }
  0xdd   :  { %v1030_v43 = vadd.f32 %v1029_v33, %v1027_v2  ;;  %v1035_v29 = vmul.f32 %v1034_v41, %v2375_v19  ;;  %v1050_v28 = vadd.f32 %v1049_v13, %v1047_v6  ;;  %v1055_v25 = vmul.f32 %v1054_v54, %v2772_v4  ;;  %s1148_s11 = sshll.u32 %s1515_s10, 4  ;;  %s1149_s11 = int_to_ptr.vmem [resolvable:$true] %s1148_s11 }
  0xde   :  { %v1038_v34 = vmul.f32 %v1037_v51, %v2533_v57  ;;  %v1041_v32 = vmul.f32 %v1040_v47, %v2562_v36  ;;  %v1058_v48 = vmul.f32 %v1057_v21, %v2806_v18  ;;  %v1061_v23 = vmul.f32 %v1060_v59, %v2862_v40  ;;  %s1483_s12 = scalar_lea.vmem %s1149_s11, 384  ;;  %p1488_p0 = scmp.lt.s32.totalorder %s1149_s11, %s1149_s11 }
  0xdf   :  { %v2995_v19 = vmax.f32 %v1010_v58, 0.0  ;;  %v1033_v56 = vadd.f32 %v1032_v45, %v1030_v43  ;;  %v1053_v24 = vadd.f32 %v1052_v11, %v1050_v28  ;;  %v1064_v5 = vmul.f32 %v1063_v44, %v2941_v15  ;;  %p1484_p13 = scmp.ne.s32.totalorder %s1149_s11, %s1483_s12  ;;  %p1489_p1 = scmp.lt.s32.totalorder %s1483_s12, %s1483_s12 }
  0xe0   :  { %v1066_v57 = vstv %s2947_s13  ;;  %v1075_v36 = vstv %s2949_s14  ;;  %v1077_v8 = vstv %s2956_s16  ;;  %v1079_v50 = vstv %s2954_s15 }
  0xe1   :  { %v1036_v63 = vadd.f32 %v1035_v29, %v1033_v56  ;;  %v1056_v1 = vadd.f32 %v1055_v25, %v1053_v24  ;;  %v1076_v55 = vmul.f32 %v1075_v36, %v2756_v35  ;;  %v1080_v26 = vmul.f32 %v1079_v50, %v2768_v7  ;;  %p1490_p2 = por %p1489_p1, %p1488_p0 }
  0xe2   :  { %v1069_v37 = vstv %s2961_s1  ;;  %v1082_v60 = vstv %s2963_s17  ;;  %v1085_v0 = vstv %s2969_s18  ;;  %v1088_v20 = vstv %s2971_s19 }
  0xe3   :  { %v1039_v12 = vadd.f32 %v1038_v34, %v1036_v63  ;;  %v1059_v31 = vadd.f32 %v1058_v48, %v1056_v1  ;;  %v1078_v39 = vadd.f32 %v1077_v8, %v1076_v55  ;;  %v1083_v10 = vmul.f32 %v1082_v60, %v2770_v46  ;;  %p1491_p3 = pnand %p1490_p2, %p1484_p13 }
  0xe4   :  { %v1067_v9 = vmul.f32 %v1066_v57, %v2965_v62  ;;  %v1091_v16 = vstv %s2978_s20  ;;  %v1086_v14 = vmul.f32 %v1085_v0, %v2772_v4  ;;  %v1070_v33 = vmul.f32 %v1069_v37, %v2995_v19 }
  0xe5   :  { %v1042_v53 = vadd.f32 %v1041_v32, %v1039_v12  ;;  %v1062_v49 = vadd.f32 %v1061_v23, %v1059_v31  ;;  %v1081_v22 = vadd.f32 %v1080_v26, %v1078_v39  ;;  %v1072_v45 = vstv %s2985_s21 }
  0xe6   :  { %v1089_v41 = vmul.f32 %v1088_v20, %v2806_v18  ;;  %v1106_v42 = vstv %s2987_s22  ;;  %v1092_v30 = vmul.f32 %v1091_v16, %v2862_v40  ;;  %v1094_v3 = vstv %s2993_s23 }
  0xe7   :  { %v1043_v51 = vmax.f32 %v1042_v53, 0.0  ;;  %v1065_v52 = vadd.f32 %v1064_v5, %v1062_v49  ;;  %v1084_v38 = vadd.f32 %v1083_v10, %v1081_v22  ;;  %v1107_v27 = vmul.f32 %v1106_v42, %v2756_v35 }
  0xe8   :  { %v1108_v61 = vstv %s3000_s25  ;;  %v1110_v13 = vstv %s2998_s24  ;;  %v1097_v47 = vstv %s3006_s26  ;;  %v1113_v58 = vstv %s3010_s27 }
  0xe9   :  { %v1068_v17 = vadd.f32 %v1067_v9, %v1065_v52  ;;  %v1073_v54 = vmul.f32 %v1072_v45, %v1043_v51  ;;  %v1087_v2 = vadd.f32 %v1086_v14, %v1084_v38  ;;  %v1109_v6 = vadd.f32 %v1108_v61, %v1107_v27 }
  0xea   :  { %v1111_v11 = vmul.f32 %v1110_v13, %v2768_v7  ;;  %v1116_v21 = vstv %s3012_s28  ;;  %v1095_v44 = vmul.f32 %v1094_v3, %v2941_v15  ;;  %v1114_v43 = vmul.f32 %v1113_v58, %v2770_v46 }
  0xeb   :  { %v1071_v35 = vadd.f32 %v1070_v33, %v1068_v17  ;;  %v1090_v59 = vadd.f32 %v1089_v41, %v1087_v2  ;;  %v1100_v29 = vstv %s3019_s29  ;;  %v1117_v25 = vmul.f32 %v1116_v21, %v2772_v4 }
  0xec   :  { %v1112_v28 = vadd.f32 %v1111_v11, %v1109_v6  ;;  %v1119_v34 = vstv %s3021_s30  ;;  %v1098_v48 = vmul.f32 %v1097_v47, %v2965_v62  ;;  %v1122_v23 = vstv %s3025_s3 }
  0xed   :  { %v1074_v7 = vadd.f32 %v1073_v54, %v1071_v35  ;;  %v1093_v32 = vadd.f32 %v1092_v30, %v1090_v59  ;;  %v1103_v56 = vstv %s3028_s5  ;;  %v1120_v5 = vmul.f32 %v1119_v34, %v2806_v18 }
  0xee   :  { %v1115_v24 = vadd.f32 %v1114_v43, %v1112_v28  ;;  %v1101_v46 = vmul.f32 %v1100_v29, %v2995_v19  ;;  %v1125_v36 = vstv %s3034_s6  ;;  %v1123_v4 = vmul.f32 %v1122_v23, %v2862_v40 }
  0xef   :  { %v1096_v57 = vadd.f32 %v1095_v44, %v1093_v32  ;;  %1137 = vst [vmem:[#allocation7] sm:$0xff] %v1074_v7  ;;  %v1104_v63 = vmul.f32 %v1103_v56, %v1043_v51  ;;  %v1128_v1 = vstv %s3041_s7  ;;  %v1126_v26 = vmul.f32 %v1125_v36, %v2941_v15 }
  0xf0   :  { %v1118_v8 = vadd.f32 %v1117_v25, %v1115_v24  ;;  %v1131_v60 = vstv %s3047_s8  ;;  %v1129_v20 = vmul.f32 %v1128_v1, %v2965_v62  ;;  %v1134_v12 = vstv %s1442_s9 }
  0xf1   :  { %v1099_v50 = vadd.f32 %v1098_v48, %v1096_v57  ;;  %v1132_v39 = vmul.f32 %v1131_v60, %v2995_v19  ;;  %v1135_v9 = vmul.f32 %v1134_v12, %v1043_v51 }
  0xf2   :  { %v1121_v55 = vadd.f32 %v1120_v5, %v1118_v8 }
  0xf3   :  { %v1102_v37 = vadd.f32 %v1101_v46, %v1099_v50 }
  0xf4   :  { %v1124_v0 = vadd.f32 %v1123_v4, %v1121_v55 }
  0xf5   :  { %v1105_v18 = vadd.f32 %v1104_v63, %v1102_v37 }
  0xf6   :  { %v1127_v31 = vadd.f32 %v1126_v26, %v1124_v0 }
  0xf7   :  { %1139 = vst [vmem:[#allocation7 + $0x8] sm:$0xff] %v1105_v18 }
  0xf8   :  { %v1130_v10 = vadd.f32 %v1129_v20, %v1127_v31 }
  0xfa   :  { %v1133_v40 = vadd.f32 %v1132_v39, %v1130_v10 }
  0xfc   :  { %v1136_v16 = vadd.f32 %v1135_v9, %v1133_v40 }
  0xfe   :  { %1142 = vst [vmem:[#allocation7 + $0x10] sm:$0xff] %v1136_v16 }
  0xff   :  { %1494 = shalt.err (!%p1491_p3)
}
 0x100   :  { %s1495_s15 = scalar_lea.hbm %s3083_s2, 384 }
 0x101   :  { %p1496_p4 = scmp.ne.s32.totalorder %s3083_s2, %s1495_s15  ;;  %p1499_p5 = scmp.lt.u32.totalorder %s1495_s15, %s3083_s2 }
 0x103   :  { %p1501_p6 = pnand %p1499_p5, %p1496_p4 }
 0x105   :  { %1504 = shalt.err (!%p1501_p6)
}
 0x106   :  { %1154 = dma.vmem_to_hbm [thread:$0]  %s1149_s11, 384, %s3083_s2, [#allocation4], %s1513_s0, %s1513_s0, %s1514_s4  }
 0x107   :  { %1509 = dma.done.wait [#allocation4], 384  }
 0x108   :  { %1510 = vsyncadd [#allocation4], 4294966912 }
 0x109   :  { %1158 = vsyncpa [#allocation3], 1 }
 0x10a   :  { %1159 = vsyncpa [#allocation4], 1 }
 0x10b   :  { %1160 = vsyncpa [#allocation5], 1 }

</bundles_post_ra>
